<compile_context>
chip_gen: v7x
topology: tpu7x:2x2x1
jax: 0.10.0
libtpu: 0.0.40
codegen_flags: <defaults>
</compile_context>

<pallas_src>
import numpy as np
import jax
import jax.numpy as jnp
from jax.experimental import pallas as pl
from jax.experimental.pallas import tpu as pltpu


def _make_kernel(m_total, block_m, mask_tail):
    """Builds the per-tile kernel. m_total/block_m are trace-time constants."""

    def kernel(x_ref, pt_ref, p_ref, psq_ref, proto_ref, resid_ref, ploss_ref):
        x = x_ref[...]                                     # (BM, D) f32
        bm, d = x.shape
        k = p_ref.shape[0]

        # Squared distances up to a per-row constant (argmin-invariant):
        #   dist = ||p||^2 - 2 * x @ p^T
        xp = jnp.dot(x, pt_ref[...],
                     precision=jax.lax.Precision.HIGHEST,
                     preferred_element_type=jnp.float32)    # (BM, K) on MXU
        dist = psq_ref[...] - 2.0 * xp                      # (BM, K)

        # First-index argmin (torch.argmin tie-breaking): min + iota + min.
        min_d = jnp.min(dist, axis=1, keepdims=True)                    # (BM, 1)
        iota_k = jax.lax.broadcasted_iota(jnp.int32, (bm, k), 1)        # (BM, K)
        idx = jnp.min(jnp.where(dist == min_d, iota_k, k),
                      axis=1, keepdims=True)                            # (BM, 1)

        # Quantize: one_hot @ prototypes on the MXU (no gather).
        one_hot = (iota_k == idx).astype(jnp.float32)                   # (BM, K)
        proto = jnp.dot(one_hot, p_ref[...],
                        precision=jax.lax.Precision.HIGHEST,
                        preferred_element_type=jnp.float32)             # (BM, D)

        resid = x - proto
        proto_ref[...] = proto.astype(proto_ref.dtype)
        resid_ref[...] = resid.astype(resid_ref.dtype)

        # Fused loss partial: per-block sum of squared residuals, reduced over
        # rows, kept lane-dense as a (1, D) tile.  The wrapper sums nb tiny
        # tiles instead of re-reading the full residuals from HBM.
        rr = resid * resid
        if mask_tail:
            row = (pl.program_id(0) * block_m
                   + jax.lax.broadcasted_iota(jnp.int32, (bm, d), 0))
            rr = jnp.where(row < m_total, rr, 0.0)
        ploss_ref[0] = jnp.sum(rr, axis=0, keepdims=True)               # (1, D)

    return kernel


def _choose_block_m(m, target):
    """Pick rows-per-grid-step.

    Prefers the largest multiple of 8 that (a) divides M exactly (no pad /
    [:M] slice HBM passes) and (b) leaves at least 2 grid steps so the
    'parallel' axis can be split across both TensorCores on v7x.  Falls back
    to padding only when M has no such divisor.  Returns (block_m, needs_pad).
    """
    target = max(8, (target // 8) * 8)
    cap = min(target, m)
    best = 0
    bm = 8
    while bm <= cap:
        if m % bm == 0 and (m // bm >= 2 or m <= bm):
            best = bm
        bm += 8
    if best:
        return best, False
    return min(target, ((m + 7) // 8) * 8), True


def prototype_layer(x, prototypes, commitment_cost=0.25, *, block_m=1024):
    """x: (..., D) float32, prototypes: (K, D) float32.

    Returns (proto, residuals, loss) with the same forward values as the
    PyTorch PrototypeLayer.
    """
    x = x.astype(jnp.float32)
    prototypes = prototypes.astype(jnp.float32)
    x_shape = x.shape
    d = x_shape[-1]
    k = prototypes.shape[0]
    assert prototypes.shape[1] == d

    xf = x.reshape(-1, d)
    m = xf.shape[0]

    # Cap the tile so ~6 double-buffered row-tiles (x, proto, resid) stay well
    # inside VMEM even on v7x (64 MiB physical / 32 MiB scoped default).
    vmem_budget = 24 * (1 << 20)
    target = min(block_m, max(8, (vmem_budget // (6 * 4 * d)) // 8 * 8))
    bm, needs_pad = _choose_block_m(m, target)

    mp = ((m + bm - 1) // bm) * bm
    if needs_pad and mp != m:
        # TODO(synk): ragged tail still costs a pad + slice pass; only reached
        # when M has no multiple-of-8 divisor <= target.
        xf = jnp.pad(xf, ((0, mp - m), (0, 0)))
    nb = mp // bm

    p_t = prototypes.T                                              # (D, K)
    p_sq = jnp.sum(prototypes * prototypes, axis=1).reshape(1, k)   # (1, K)

    kernel = _make_kernel(m, bm, mask_tail=(mp != m))

    grid_spec = pltpu.PrefetchScalarGridSpec(
        num_scalar_prefetch=0,
        grid=(nb,),
        in_specs=[
            pl.BlockSpec((bm, d), lambda i: (i, 0)),       # x tile   (streamed)
            pl.BlockSpec((d, k), lambda i: (0, 0)),        # p^T      (resident)
            pl.BlockSpec((k, d), lambda i: (0, 0)),        # p        (resident)
            pl.BlockSpec((1, k), lambda i: (0, 0)),        # ||p||^2  (resident)
        ],
        out_specs=[
            pl.BlockSpec((bm, d), lambda i: (i, 0)),       # proto tile
            pl.BlockSpec((bm, d), lambda i: (i, 0)),       # resid tile
            pl.BlockSpec((1, 1, d), lambda i: (i, 0, 0)),  # loss partial sums
        ],
    )

    proto_flat, resid_flat, loss_part = pl.pallas_call(
        kernel,
        out_shape=(
            jax.ShapeDtypeStruct((mp, d), jnp.float32),
            jax.ShapeDtypeStruct((mp, d), jnp.float32),
            jax.ShapeDtypeStruct((nb, 1, d), jnp.float32),
        ),
        grid_spec=grid_spec,
        compiler_params=pltpu.CompilerParams(
            dimension_semantics=("parallel",)),
    )(xf, p_t, prototypes, p_sq)

    if mp != m:
        proto_flat = proto_flat[:m]
        resid_flat = resid_flat[:m]
    proto = proto_flat.reshape(x_shape)
    resid = resid_flat.reshape(x_shape)

    # q_latent_loss and e_latent_loss have identical forward values (detach
    # only affects gradients); the mean-of-squares comes from the fused
    # per-block partial sums (nb tiny tiles, not a re-read of resid).
    mse = jnp.sum(loss_part) / (m * d)
    loss = mse + commitment_cost * mse

    # proto = x + (proto - x).detach() has the same forward value as proto.
    # TODO(synk): straight-through / detach gradient semantics not implemented
    # (forward values only); a custom VJP is required for training use.
    return proto, resid, loss


# ---------------- pure-JAX reference for verification -----------------------
def reference_forward(x, prototypes, commitment_cost=0.25):
    x = x.astype(jnp.float32)
    p = prototypes.astype(jnp.float32)
    x_shape = x.shape
    d = x_shape[-1]
    xf = x.reshape(-1, d)
    dist = (jnp.sum(xf ** 2, axis=1, keepdims=True)
            + jnp.sum(p ** 2, axis=1)[None, :]
            - 2.0 * jnp.dot(xf, p.T, precision=jax.lax.Precision.HIGHEST))
    idx = jnp.argmin(dist, axis=1)
    proto = p[idx].reshape(x_shape)
    e_latent = jnp.mean((proto - x) ** 2)
    q_latent = jnp.mean((proto - x) ** 2)
    loss = q_latent + commitment_cost * e_latent
    resid = x - proto
    return proto, resid, loss


if __name__ == "__main__":
    key = jax.random.PRNGKey(0)
    kx, kp = jax.random.split(key)

    # x: (batch_size, seq_len, N, output_size); prototypes: (n_prototypes, output_size)
    B, S, N, D = 4, 8, 8, 128
    K = 16
    commitment_cost = 0.25

    x = jax.random.normal(kx, (B, S, N, D), jnp.float32)
    prototypes = jax.random.normal(kp, (K, D), jnp.float32)

    proto, resid, loss = prototype_layer(x, prototypes, commitment_cost)
    proto = jax.block_until_ready(proto)
    resid = jax.block_until_ready(resid)
    loss = jax.block_until_ready(loss)
    assert proto.shape == x.shape and resid.shape == x.shape and loss.shape == ()

    # ---- verification against a pure-JAX reference -------------------------
    proto_ref, resid_ref, loss_ref = reference_forward(x, prototypes, commitment_cost)

    p_np = np.asarray(prototypes, dtype=np.float64)
    xf_np = np.asarray(x, dtype=np.float64).reshape(-1, D)
    pk_np = np.asarray(proto, dtype=np.float64).reshape(-1, D)
    pr_np = np.asarray(proto_ref, dtype=np.float64).reshape(-1, D)

    # 1) every kernel output row is (numerically) one of the prototypes
    d_out = ((pk_np[:, None, :] - p_np[None, :, :]) ** 2).sum(-1)
    assert float(d_out.min(axis=1).max()) < 1e-6

    # 2) selection matches the reference except on genuine near-ties
    d_true = ((xf_np[:, None, :] - p_np[None, :, :]) ** 2).sum(-1)
    ds = np.sort(d_true, axis=1)
    near_tie = (ds[:, 1] - ds[:, 0]) < 1e-3
    same_row = np.max(np.abs(pk_np - pr_np), axis=1) < 1e-4
    assert bool(np.all(same_row | near_tie))

    # 3) strict value check on non-tie rows (normally all rows)
    keep = ~near_tie
    np.testing.assert_allclose(pk_np[keep], pr_np[keep], rtol=1e-5, atol=1e-5)
    np.testing.assert_allclose(
        np.asarray(resid, np.float64).reshape(-1, D)[keep],
        np.asarray(resid_ref, np.float64).reshape(-1, D)[keep],
        rtol=1e-5, atol=1e-5)

    # 4) residuals consistent with the returned proto; loss matches
    np.testing.assert_allclose(np.asarray(resid),
                               np.asarray(x) - np.asarray(proto),
                               rtol=1e-5, atol=1e-6)
    np.testing.assert_allclose(float(loss), float(loss_ref), rtol=1e-4, atol=1e-5)

    print("KERNEL_OK")
</pallas_src>

<mosaic_0001>
module attributes {stable_mosaic.version = 11 : i64} {
  func.func @kernel(%arg0: i32, %arg1: memref<256x128xf32, #tpu.memory_space<vmem>>, %arg2: memref<128x16xf32, #tpu.memory_space<vmem>>, %arg3: memref<16x128xf32, #tpu.memory_space<vmem>>, %arg4: memref<1x16xf32, #tpu.memory_space<vmem>>, %arg5: memref<256x128xf32, #tpu.memory_space<vmem>>, %arg6: memref<256x128xf32, #tpu.memory_space<vmem>>, %arg7: memref<1x1x128xf32, #tpu.memory_space<vmem>>) attributes {dimension_semantics = [#tpu.dimension_semantics<parallel>], iteration_bounds = array<i64: 1>, scalar_prefetch = 0 : i64, scratch_operands = 0 : i64, tpu.core_type = #tpu.core_type<tc>, window_params = [{transform_indices = @transform_0, window_bounds = array<i64: 256, 128>}, {pipeline_mode = #tpu.pipeline_mode<synchronous>, transform_indices = @transform_1, window_bounds = array<i64: 128, 16>}, {pipeline_mode = #tpu.pipeline_mode<synchronous>, transform_indices = @transform_2, window_bounds = array<i64: 16, 128>}, {pipeline_mode = #tpu.pipeline_mode<synchronous>, transform_indices = @transform_3, window_bounds = array<i64: 1, 16>}, {transform_indices = @transform_4, window_bounds = array<i64: 256, 128>}, {transform_indices = @transform_5, window_bounds = array<i64: 256, 128>}, {transform_indices = @transform_6, window_bounds = array<i64: 1, 1, 128>}]} {
    %c0 = arith.constant 0 : index
    %c0_0 = arith.constant 0 : index
    %0 = vector.load %arg1[%c0, %c0_0] : memref<256x128xf32, #tpu.memory_space<vmem>>, vector<256x128xf32>
    %c0_1 = arith.constant 0 : index
    %c0_2 = arith.constant 0 : index
    %1 = vector.load %arg2[%c0_1, %c0_2] : memref<128x16xf32, #tpu.memory_space<vmem>>, vector<128x16xf32>
    %cst = arith.constant dense<0.000000e+00> : vector<256x16xf32>
    %2 = tpu.matmul %0, %1, %cst {dimension_numbers = #tpu.dot_dimension_numbers<[1], [0], [0], [1], [0, 0, 1, 1], [], []>, precision = #tpu.contract_precision<fp32>} : vector<256x128xf32>, vector<128x16xf32>, vector<256x16xf32> -> vector<256x16xf32>
    %c0_3 = arith.constant 0 : index
    %c0_4 = arith.constant 0 : index
    %3 = vector.load %arg4[%c0_3, %c0_4] : memref<1x16xf32, #tpu.memory_space<vmem>>, vector<1x16xf32>
    %cst_5 = arith.constant 2.000000e+00 : f32
    %4 = vector.broadcast %cst_5 : f32 to vector<256x16xf32>
    %5 = arith.mulf %4, %2 : vector<256x16xf32>
    %6 = vector.broadcast %3 : vector<1x16xf32> to vector<256x16xf32>
    %7 = arith.subf %6, %5 : vector<256x16xf32>
    %cst_6 = arith.constant dense<0x7F800000> : vector<256xf32>
    %8 = vector.multi_reduction <minimumf>, %7, %cst_6 [1] : vector<256x16xf32> to vector<256xf32>
    %9 = vector.shape_cast %8 : vector<256xf32> to vector<256x1xf32>
    %10 = tpu.iota {dimensions = array<i32: 1>} : vector<256x16xi32>
    %11 = vector.broadcast %9 : vector<256x1xf32> to vector<256x16xf32>
    %12 = arith.cmpf oeq, %7, %11 : vector<256x16xf32>
    %c16_i32 = arith.constant 16 : i32
    %13 = vector.broadcast %c16_i32 : i32 to vector<256x16xi32>
    %14 = arith.select %12, %10, %13 : vector<256x16xi1>, vector<256x16xi32>
    %cst_7 = arith.constant dense<2147483647> : vector<256xi32>
    %15 = vector.multi_reduction <minsi>, %14, %cst_7 [1] : vector<256x16xi32> to vector<256xi32>
    %16 = vector.shape_cast %15 : vector<256xi32> to vector<256x1xi32>
    %17 = vector.broadcast %16 : vector<256x1xi32> to vector<256x16xi32>
    %18 = arith.cmpi eq, %10, %17 : vector<256x16xi32>
    %19 = arith.extui %18 : vector<256x16xi1> to vector<256x16xi32>
    %20 = arith.sitofp %19 : vector<256x16xi32> to vector<256x16xf32>
    %c0_8 = arith.constant 0 : index
    %c0_9 = arith.constant 0 : index
    %21 = vector.load %arg3[%c0_8, %c0_9] : memref<16x128xf32, #tpu.memory_space<vmem>>, vector<16x128xf32>
    %cst_10 = arith.constant dense<0.000000e+00> : vector<256x128xf32>
    %22 = tpu.matmul %20, %21, %cst_10 {dimension_numbers = #tpu.dot_dimension_numbers<[1], [0], [0], [1], [0, 0, 1, 1], [], []>, precision = #tpu.contract_precision<fp32>} : vector<256x16xf32>, vector<16x128xf32>, vector<256x128xf32> -> vector<256x128xf32>
    %23 = arith.subf %0, %22 : vector<256x128xf32>
    %c0_11 = arith.constant 0 : index
    %c0_12 = arith.constant 0 : index
    %24 = vector.load %arg5[%c0_11, %c0_12] : memref<256x128xf32, #tpu.memory_space<vmem>>, vector<256x128xf32>
    tpu.vector_store %arg5[%c0_11, %c0_12], %22 {strides = array<i32>} : memref<256x128xf32, #tpu.memory_space<vmem>>, vector<256x128xf32>,
    %c0_13 = arith.constant 0 : index
    %c0_14 = arith.constant 0 : index
    %25 = vector.load %arg6[%c0_13, %c0_14] : memref<256x128xf32, #tpu.memory_space<vmem>>, vector<256x128xf32>
    tpu.vector_store %arg6[%c0_13, %c0_14], %23 {strides = array<i32>} : memref<256x128xf32, #tpu.memory_space<vmem>>, vector<256x128xf32>,
    %26 = arith.mulf %23, %23 : vector<256x128xf32>
    %cst_15 = arith.constant dense<0.000000e+00> : vector<128xf32>
    %27 = vector.multi_reduction <add>, %26, %cst_15 [0] : vector<256x128xf32> to vector<128xf32>
    %28 = vector.shape_cast %27 : vector<128xf32> to vector<1x128xf32>
    %c0_16 = arith.constant 0 : index
    %c0_17 = arith.constant 0 : index
    %c0_18 = arith.constant 0 : index
    %29 = vector.load %arg7[%c0_16, %c0_17, %c0_18] : memref<1x1x128xf32, #tpu.memory_space<vmem>>, vector<1x1x128xf32>
    %30 = vector.shape_cast %29 : vector<1x1x128xf32> to vector<1x128xf32>
    %31 = vector.shape_cast %28 : vector<1x128xf32> to vector<1x1x128xf32>
    tpu.vector_store %arg7[%c0_16, %c0_17, %c0_18], %31 {strides = array<i32>} : memref<1x1x128xf32, #tpu.memory_space<vmem>>, vector<1x1x128xf32>,
    return
  }
  func.func @transform_0(%arg0: i32) -> (i32, i32) {
    %c0_i32 = arith.constant 0 : i32
    %c0_i32_0 = arith.constant 0 : i32
    return %arg0, %c0_i32 : i32, i32
  }
  func.func @transform_1(%arg0: i32) -> (i32, i32) {
    %c0_i32 = arith.constant 0 : i32
    %c0_i32_0 = arith.constant 0 : i32
    %c0_i32_1 = arith.constant 0 : i32
    return %c0_i32, %c0_i32_0 : i32, i32
  }
  func.func @transform_2(%arg0: i32) -> (i32, i32) {
    %c0_i32 = arith.constant 0 : i32
    %c0_i32_0 = arith.constant 0 : i32
    %c0_i32_1 = arith.constant 0 : i32
    return %c0_i32, %c0_i32_0 : i32, i32
  }
  func.func @transform_3(%arg0: i32) -> (i32, i32) {
    %c0_i32 = arith.constant 0 : i32
    %c0_i32_0 = arith.constant 0 : i32
    %c0_i32_1 = arith.constant 0 : i32
    return %c0_i32, %c0_i32_0 : i32, i32
  }
  func.func @transform_4(%arg0: i32) -> (i32, i32) {
    %c0_i32 = arith.constant 0 : i32
    %c0_i32_0 = arith.constant 0 : i32
    return %arg0, %c0_i32 : i32, i32
  }
  func.func @transform_5(%arg0: i32) -> (i32, i32) {
    %c0_i32 = arith.constant 0 : i32
    %c0_i32_0 = arith.constant 0 : i32
    return %arg0, %c0_i32 : i32, i32
  }
  func.func @transform_6(%arg0: i32) -> (i32, i32, i32) {
    %c0_i32 = arith.constant 0 : i32
    %c0_i32_0 = arith.constant 0 : i32
    %c0_i32_1 = arith.constant 0 : i32
    return %arg0, %c0_i32, %c0_i32_0 : i32, i32, i32
  }
}

</mosaic_0001>

<bundles_post_ra>
// kernel: tpu_custom_call.1
= control target key start
LH: loop header
LB: loop body
LE: loop exit
PB: predicated region body
PF: predicated region fallthrough
CT: control target
= control target key end

     0   :  { %12 = vsyncpa [#allocation3], 0  ;;  %s9486_s0 = inlined_call_operand.hbm [shape: f32[256,128], index: 0, kind: input, shape index: {}]   ;;  %s9487_s1 = inlined_call_operand.vmem [shape: f32[128,16], index: 1, kind: input, shape index: {}]   ;;  %s9488_s2 = inlined_call_operand.vmem [shape: f32[16,128], index: 2, kind: input, shape index: {}]   ;;  %s9489_s3 = inlined_call_operand.vmem [shape: f32[1,16], index: 3, kind: input, shape index: {}]   ;;  %s9490_s4 = inlined_call_operand.hbm [shape: f32[256,128], index: 4, kind: output, shape index: {0}]   ;;  %s9491_s5 = inlined_call_operand.hbm [shape: f32[256,128], index: 5, kind: output, shape index: {1}]   ;;  %s9492_s6 = inlined_call_operand.hbm [shape: f32[1,1,128], index: 6, kind: output, shape index: {2}]  }
   0x1   :  { %13 = vsyncpa [#allocation4], 0 }
   0x2   :  { %14 = vsyncpa [#allocation7], 0  ;;  %s7052_s21 = smov [#allocation2]   ;;  %s6958_s25 = scalar_lea.hbm %s9486_s0, 4096 }
   0x3   :  { %s20_s22 = sshll.u32 %s7052_s21, 4  ;;  %p6959_p0 = scmp.ne.s32.totalorder %s9486_s0, %s6958_s25  ;;  %s21_s22 = int_to_ptr.vmem [resolvable:$true] %s20_s22 }
   0x4   :  { %p6962_p1 = scmp.lt.u32.totalorder %s6958_s25, %s9486_s0 }
   0x6   :  { %p6964_p2 = pnand %p6962_p1, %p6959_p0 }
   0x8   :  { %6967 = shalt.err (!%p6964_p2)
}
   0x9   :  { %s6968_s30 = scalar_lea.vmem %s21_s22, 4096  ;;  %p6973_p4 = scmp.lt.s32.totalorder %s21_s22, %s21_s22 }
   0xa   :  { %p6969_p3 = scmp.ne.s32.totalorder %s21_s22, %s6968_s30  ;;  %p6974_p5 = scmp.lt.s32.totalorder %s6968_s30, %s6968_s30 }
   0xc   :  { %p6975_p6 = por %p6974_p5, %p6973_p4 }
   0xe   :  { %p6976_p7 = pnand %p6975_p6, %p6969_p3 }
  0x10   :  { %6979 = shalt.err (!%p6976_p7)
}
  0x11   :  { %s7053_s7 = smov 128   ;;  %s7054_s8 = smov 8  }
  0x12   :  { %26 = dma.hbm_to_vmem [thread:$0]  %s9486_s0, 4096, %s21_s22, [#allocation3], %s7053_s7, %s7053_s7, %s7054_s8  }
  0x13   :  { %7046 = dma.done.wait [#allocation3], 4096  }
  0x14   :  { %7047 = vsyncadd [#allocation3], 4294963200  ;;  %v68_v0 = vld [vmem:[%s9487_s1] sm:$0xff]  ;;  %v69_v1 = vld [vmem:[%s9487_s1 + $0x8] sm:$0xff]  ;;  %vm2129_vm0 = vcmask 130048   ;;  %s7057_s24 = smov [#allocation6]  }
  0x15   :  { %v70_v2 = vld [vmem:[%s9487_s1 + $0x10] sm:$0xff]  ;;  %v85_v3 = vand.u32 4294901760, %v68_v0  ;;  %v88_v4 = vand.u32 4294901760, %v69_v1  ;;  %v71_v5 = vld [vmem:[%s9487_s1 + $0x18] sm:$0xff]  ;;  %v7124_v7 = vld [vmem:[%s9487_s1 + $0x20] sm:$0xff]  ;;  %s4941_s25 = sshll.u32 %s7057_s24, 4  ;;  %s9437_s25 = int_to_ptr.vmem [resolvable:$true] %s4941_s25 }
  0x16   :  { %v91_v6 = vand.u32 4294901760, %v70_v2  ;;  %v7129_v8 = vld [vmem:[%s9487_s1 + $0x28] sm:$0xff]  ;;  %v94_v9 = vand.u32 4294901760, %v71_v5  ;;  %v97_v11 = vand.u32 4294901760, %v7124_v7  ;;  %v7140_v14 = vld [vmem:[%s9487_s1 + $0x30] sm:$0xff]  ;;  %v7145_v15 = vld [vmem:[%s9487_s1 + $0x38] sm:$0xff] }
  0x17   :  { %v7131_v10 = vpack.c.bf16 %v88_v4, %v85_v3  ;;  %v100_v12 = vand.u32 4294901760, %v7129_v8  ;;  %v36_v16 = vld [vmem:[#allocation2] sm:$0xff]  ;;  %v103_v19 = vand.u32 4294901760, %v7140_v14  ;;  %v106_v20 = vand.u32 4294901760, %v7145_v15  ;;  %v7168_v22 = vld [vmem:[%s9487_s1 + $0x48] sm:$0xff]  ;;  %v7187_v29 = vld [vmem:[%s9487_s1 + $0x50] sm:$0xff] }
  0x18   :  { %v7135_v13 = vpack.c.bf16 %v94_v9, %v91_v6  ;;  %v7149_v17 = vand.u32 4294901760, %v36_v16  ;;  %v7163_v21 = vld [vmem:[%s9487_s1 + $0x40] sm:$0xff]  ;;  %v37_v25 = vld [vmem:[#allocation2 + $0x8] sm:$0xff]  ;;  %v9507_v28 = vand.u32 4294901760, %v7168_v22  ;;  %v7192_v30 = vld [vmem:[%s9487_s1 + $0x58] sm:$0xff]  ;;  %v7210_v38 = vsub.f32 %v68_v0, %v85_v3 }
  0x19   :  { %6384 = vmatprep.subr.bf16.mxu0 %v7131_v10  ;;  %v7156_v18 = vpack.c.bf16 %v100_v12, %v97_v11  ;;  %v7180_v26 = vpack.c.bf16 %v106_v20, %v103_v19  ;;  %v9508_v27 = vand.u32 4294901760, %v7163_v21  ;;  %v38_v32 = vld [vmem:[#allocation2 + $0x10] sm:$0xff]  ;;  %v7197_v33 = vand.u32 4294901760, %v37_v25  ;;  %v39_v34 = vld [vmem:[#allocation2 + $0x18] sm:$0xff]  ;;  %v7203_v35 = vld [vmem:[%s9487_s1 + $0x60] sm:$0xff] }
  0x1a   :  { %9735 = vst [vmem:[#allocation12_spill] sm:$0xff] %v7135_v13  ;;  %6386 = vmatpush3.bf16.msra.mxu0 %v7131_v10  ;;  %v7171_v23 = vsub.f32 %v36_v16, %v7149_v17  ;;  %v7208_v36 = vld [vmem:[%s9487_s1 + $0x68] sm:$0xff]  ;;  %v7212_v39 = vsub.f32 %v69_v1, %v88_v4  ;;  %v40_v40 = vld [vmem:[#allocation2 + $0x20] sm:$0xff]  ;;  %v9506_v42 = vand.u32 4294901760, %v7187_v29  ;;  %v9504_v43 = vand.u32 4294901760, %v7192_v30  ;;  %v7232_v49 = vld [vmem:[%s9487_s1 + $0x70] sm:$0xff] }
  0x1b   :  { %6388 = vmatprep.subr.bf16.mxu0 %v7135_v13  ;;  %9736 = vst [vmem:[#allocation13_spill] sm:$0xff] %v7156_v18  ;;  %9738 = vst [vmem:[#allocation15_spill] sm:$0xff] %v7180_v26  ;;  %v7219_v41 = vpack.c.bf16 %v9507_v28, %v9508_v27  ;;  %v7223_v44 = vand.u32 4294901760, %v38_v32  ;;  %v7225_v45 = vand.u32 4294901760, %v39_v34  ;;  %v41_v46 = vld [vmem:[#allocation2 + $0x28] sm:$0xff]  ;;  %v9502_v47 = vand.u32 4294901760, %v7203_v35 }
  0x1c   :  { %9737 = vst [vmem:[#allocation14_spill] sm:$0xff] %v7171_v23  ;;  %v9493_v24 = vand.u32 4294901760, %v7171_v23  ;;  %v9499_v48 = vand.u32 4294901760, %v7208_v36  ;;  %v7237_v50 = vld [vmem:[%s9487_s1 + $0x78] sm:$0xff]  ;;  %v7240_v51 = vsub.f32 %v37_v25, %v7197_v33  ;;  %v7242_v52 = vand.u32 4294901760, %v40_v40 }
  0x1d   :  { %9739 = vst [vmem:[#allocation16_spill] sm:$0xff] %v7219_v41  ;;  %v9495_v53 = vand.u32 4294901760, %v7210_v38  ;;  %v9494_v54 = vand.u32 4294901760, %v7212_v39  ;;  %v7247_v55 = vsub.f32 %v70_v2, %v91_v6  ;;  %v7249_v56 = vsub.f32 %v71_v5, %v94_v9  ;;  %v42_v6 = vld [vmem:[#allocation2 + $0x30] sm:$0xff]  ;;  %v43_v9 = vld [vmem:[#allocation2 + $0x38] sm:$0xff] }
  0x1e   :  { %6390 = vmatpush3.bf16.msra.mxu0 %v7135_v13  ;;  %v168_v31 = vsub.f32 %v7171_v23, %v9493_v24  ;;  %9740 = vst [vmem:[#allocation17_spill] sm:$0xff] %v7240_v51  ;;  %v7256_v57 = vpack.c.bf16 %v9504_v43, %v9506_v42  ;;  %v7259_v58 = vsub.f32 %v38_v32, %v7223_v44  ;;  %v7261_v59 = vand.u32 4294901760, %v41_v46 }
  0x1f   :  { %6392 = vmatprep.subr.bf16.mxu0 %v7156_v18  ;;  %9741 = vst [vmem:[#allocation18_spill] sm:$0xff] %v7247_v55  ;;  %9742 = vst [vmem:[#allocation19_spill] sm:$0xff] %v7249_v56  ;;  %v9498_v60 = vand.u32 4294901760, %v7232_v49  ;;  %v9497_v61 = vand.u32 4294901760, %v7237_v50  ;;  %v7266_v62 = vsub.f32 %v39_v34, %v7225_v45  ;;  %v7272_v63 = vpack.c.bf16 %v9499_v48, %v9502_v47  ;;  %v46_v48 = vld [vmem:[#allocation2 + $0x50] sm:$0xff] }
  0x20   :  { %v169_v37 = vand.u32 4294901760, %v168_v31  ;;  %9743 = vst [vmem:[#allocation20_spill] sm:$0xff] %v7256_v57  ;;  %9744 = vst [vmem:[#allocation21_spill] sm:$0xff] %v7259_v58  ;;  %v9496_v0 = vand.u32 4294901760, %v7240_v51  ;;  %v7276_v1 = vsub.f32 %v40_v40, %v7242_v52  ;;  %v489_v2 = vsub.f32 %v7210_v38, %v9495_v53 }
  0x21   :  { %9745 = vst [vmem:[#allocation22_spill] sm:$0xff] %v7266_v62  ;;  %9746 = vst [vmem:[#allocation23_spill] sm:$0xff] %v7272_v63  ;;  %v496_v3 = vsub.f32 %v7212_v39, %v9494_v54  ;;  %v9500_v4 = vand.u32 4294901760, %v7247_v55  ;;  %v9501_v5 = vand.u32 4294901760, %v7249_v56  ;;  %v9503_v16 = vand.u32 4294901760, %v7259_v58 }
  0x22   :  { %6394 = vmatpush3.bf16.msra.mxu0 %v7156_v18  ;;  %5623 = vmatprep.mubr.f32.mxu0 %v169_v37  ;;  %9747 = vst [vmem:[#allocation24_spill] sm:$0xff] %v7276_v1  ;;  %v7290_v25 = vsub.f32 %v41_v46, %v7261_v59  ;;  %v7295_v31 = vsub.f32 %v7124_v7, %v97_v11  ;;  %v9505_v37 = vand.u32 4294901760, %v7266_v62  ;;  %v9509_v7 = vand.u32 4294901760, %v7276_v1 }
  0x23   :  { %6396 = vmatprep.subr.bf16.mxu0 %v7180_v26  ;;  %v7300_v32 = vsub.f32 %v7129_v8, %v100_v12  ;;  %v7306_v34 = vpack.c.bf16 %v9497_v61, %v9498_v60  ;;  %v178_v40 = vsub.f32 %v7240_v51, %v9496_v0  ;;  %v7313_v11 = vand.u32 4294901760, %v42_v6  ;;  %v44_v8 = vld [vmem:[#allocation2 + $0x40] sm:$0xff]  ;;  %v45_v0 = vld [vmem:[#allocation2 + $0x48] sm:$0xff] }
  0x24   :  { %9748 = vst [vmem:[#allocation25_spill] sm:$0xff] %v7290_v25  ;;  %9749 = vst [vmem:[#allocation26_spill] sm:$0xff] %v7295_v31  ;;  %v7315_v46 = vand.u32 4294901760, %v43_v9  ;;  %v490_v12 = vand.u32 4294901760, %v489_v2  ;;  %v497_v24 = vand.u32 4294901760, %v496_v3  ;;  %v503_v54 = vsub.f32 %v7247_v55, %v9500_v4 }
  0x25   :  { %9750 = vst [vmem:[#allocation27_spill] sm:$0xff] %v7300_v32  ;;  %9751 = vst [vmem:[#allocation28_spill] sm:$0xff] %v7306_v34  ;;  %v510_v53 = vsub.f32 %v7249_v56, %v9501_v5  ;;  %v188_v61 = vsub.f32 %v7259_v58, %v9503_v16  ;;  %v9510_v2 = vand.u32 4294901760, %v7295_v31  ;;  %v9513_v3 = vand.u32 4294901760, %v7300_v32 }
  0x26   :  { %6398 = vmatpush3.bf16.msra.mxu0 %v7180_v26  ;;  %v7334_v4 = vsub.f32 %v7266_v62, %v9505_v37  ;;  %v7336_v5 = vand.u32 4294901760, %v44_v8  ;;  %v7341_v47 = vsub.f32 %v7140_v14, %v103_v19  ;;  %v7346_v16 = vsub.f32 %v7145_v15, %v106_v20 }
  0x27   :  { %6400 = vmatprep.subr.bf16.mxu0 %v7219_v41  ;;  %v7351_v43 = vsub.f32 %v7276_v1, %v9509_v7  ;;  %v7354_v37 = vsub.f32 %v42_v6, %v7313_v11  ;;  %v7357_v42 = vsub.f32 %v43_v9, %v7315_v46  ;;  %v7359_v28 = vand.u32 4294901760, %v45_v0  ;;  %v47_v9 = vld [vmem:[#allocation2 + $0x58] sm:$0xff]  ;;  %v52_v1 = vld [vmem:[#allocation2 + $0x80] sm:$0xff] }
  0x28   :  { %9752 = vst [vmem:[#allocation29_spill] sm:$0xff] %v7341_v47  ;;  %9753 = vst [vmem:[#allocation30_spill] sm:$0xff] %v7346_v16  ;;  %v6415_v14 = vpack.c.bf16 %v497_v24, %v490_v12  ;;  %v504_v19 = vand.u32 4294901760, %v503_v54  ;;  %v511_v27 = vand.u32 4294901760, %v510_v53  ;;  %v7362_v15 = vand.u32 4294901760, %v46_v48 }
  0x29   :  { %9754 = vst [vmem:[#allocation31_spill] sm:$0xff] %v7354_v37  ;;  %9755 = vst [vmem:[#allocation32_spill] sm:$0xff] %v7357_v42  ;;  %v517_v20 = vsub.f32 %v7295_v31, %v9510_v2  ;;  %v524_v6 = vsub.f32 %v7300_v32, %v9513_v3  ;;  %v179_v60 = vand.u32 4294901760, %v178_v40  ;;  %v9756_v24 = vand.u32 4294901760, %v7290_v25  ;;  %v48_v2 = vld [vmem:[#allocation2 + $0x60] sm:$0xff] }
  0x2a   :  { %6402 = vmatpush3.bf16.msra.mxu0 %v7219_v41  ;;  %v7379_v54 = vsub.f32 %v44_v8, %v7336_v5  ;;  %v189_v12 = vand.u32 4294901760, %v188_v61  ;;  %v7384_v3 = vsub.f32 %v45_v0, %v7359_v28  ;;  %v199_v40 = vand.u32 4294901760, %v7334_v4  ;;  %v49_v41 = vld [vmem:[#allocation2 + $0x68] sm:$0xff] }
  0x2b   :  { %6404 = vmatprep.subr.bf16.mxu0 %v7256_v57  ;;  %v7376_v53 = vsub.f32 %v7290_v25, %v9756_v24  ;;  %v209_v7 = vand.u32 4294901760, %v7351_v43  ;;  %v6419_v24 = vpack.c.bf16 %v511_v27, %v504_v19  ;;  %v518_v61 = vand.u32 4294901760, %v517_v20  ;;  %v50_v27 = vld [vmem:[#allocation2 + $0x70] sm:$0xff] }
  0x2c   :  { %9757 = vst [vmem:[#allocation33_spill] sm:$0xff] %v7379_v54  ;;  %9758 = vst [vmem:[#allocation34_spill] sm:$0xff] %v7384_v3  ;;  %v525_v8 = vand.u32 4294901760, %v524_v6  ;;  %v9761_v26 = vand.u32 4294901760, %v7346_v16  ;;  %v7400_v43 = vand.u32 4294901760, %v47_v9  ;;  %v9764_v20 = vand.u32 4294901760, %v7354_v37 }
  0x2d   :  { %v219_v4 = vand.u32 4294901760, %v7376_v53  ;;  %v9765_v6 = vand.u32 4294901760, %v7357_v42  ;;  %v9766_v25 = vand.u32 4294901760, %v7168_v22  ;;  %v9793_v51 = vand.u32 4294901760, %v7203_v35 }
  0x2e   :  { %6406 = vmatpush3.bf16.msra.mxu0 %v7256_v57  ;;  %v7390_v57 = vsub.f32 %v46_v48, %v7362_v15  ;;  %v9762_v48 = vand.u32 4294901760, %v7163_v21 }
  0x2f   :  { %6408 = vmatprep.subr.bf16.mxu0 %v7272_v63  ;;  %v7419_v18 = vsub.f32 %v7168_v22, %v9766_v25  ;;  %v9770_v22 = vand.u32 4294901760, %v7379_v54 }
  0x30   :  { %9759 = vst [vmem:[#allocation35_spill] sm:$0xff] %v7390_v57  ;;  %v7405_v19 = vsub.f32 %v7163_v21, %v9762_v48  ;;  %v7424_v48 = vand.u32 4294901760, %v49_v41 }
  0x31   :  { %9767 = vst [vmem:[#allocation37_spill] sm:$0xff] %v7419_v18  ;;  %v248_v25 = vsub.f32 %v7379_v54, %v9770_v22  ;;  %v9774_v22 = vand.u32 4294901760, %v7419_v18  ;;  %v9775_v54 = vand.u32 4294901760, %v7390_v57 }
  0x32   :  { %6410 = vmatpush3.bf16.msra.mxu0 %v7272_v63  ;;  %v9760_v63 = vand.u32 4294901760, %v7341_v47  ;;  %9763 = vst [vmem:[#allocation36_spill] sm:$0xff] %v7405_v19  ;;  %9769 = vst [vmem:[#allocation39_spill] sm:$0xff] %v7424_v48 }
  0x33   :  { %6412 = vmatprep.subr.bf16.mxu0 %v7306_v34 }
  0x34   :  { %v531_v0 = vsub.f32 %v7341_v47, %v9760_v63  ;;  %v228_v63 = vsub.f32 %v7354_v37, %v9764_v20  ;;  %v9534_v20 = vand.u32 4294901760, %v7405_v19  ;;  %v51_v37 = vld [vmem:[#allocation2 + $0x78] sm:$0xff] }
  0x36   :  { %6414 = vmatpush3.bf16.msra.mxu0 %v7306_v34  ;;  %v538_v34 = vsub.f32 %v7346_v16, %v9761_v26  ;;  %v7413_v26 = vsub.f32 %v7357_v42, %v9765_v6  ;;  %v6423_v6 = vpack.c.bf16 %v525_v8, %v518_v61  ;;  %v532_v42 = vand.u32 4294901760, %v531_v0 }
  0x37   :  { %6416 = vmatprep.subr.bf16.mxu0 %v6415_v14  ;;  %v545_v21 = vsub.f32 %v7405_v19, %v9534_v20  ;;  %v229_v61 = vand.u32 4294901760, %v228_v63  ;;  %v9773_v8 = vand.u32 4294901760, %v7384_v3  ;;  %v7451_v20 = vsub.f32 %v7390_v57, %v9775_v54  ;;  %v55_v54 = vld [vmem:[#allocation2 + $0x98] sm:$0xff] }
  0x38   :  { %v539_v53 = vand.u32 4294901760, %v538_v34  ;;  %v239_v34 = vand.u32 4294901760, %v7413_v26  ;;  %v7457_v63 = vsub.f32 %v49_v41, %v7424_v48  ;;  %v7459_v26 = vand.u32 4294901760, %v51_v37 }
  0x39   :  { %5624 = vmatmul.mubr.f32.vlgmr.msra.gmra.mrb[0].mxu0 %v179_v60  ;;  %v7422_v60 = vand.u32 4294901760, %v48_v2  ;;  %v7443_v0 = vsub.f32 %v7384_v3, %v9773_v8  ;;  %v53_v8 = vld [vmem:[#allocation2 + $0x88] sm:$0xff]  ;;  %v546_v62 = vand.u32 4294901760, %v545_v21  ;;  %v7470_v41 = vand.u32 4294901760, %v52_v1 }
  0x3a   :  { %6418 = vmatpush3.bf16.msra.mxu0 %v6415_v14  ;;  %5626 = vmatprep.mubr.f32.mxu0 %v189_v12  ;;  %v7432_v14 = vsub.f32 %v47_v9, %v7400_v43  ;;  %v7434_v12 = vand.u32 4294901760, %v50_v27  ;;  %v552_v9 = vsub.f32 %v7419_v18, %v9774_v22  ;;  %9777 = vst [vmem:[#allocation43_spill] sm:$0xff] %v7457_v63  ;;  %9778 = vst [vmem:[#allocation44_spill] sm:$0xff] %v7459_v26 }
  0x3b   :  { %9768 = vst [vmem:[#allocation38_spill] sm:$0xff] %v7422_v60  ;;  %6420 = vmatprep.subr.bf16.mxu0 %v6419_v24  ;;  %v6427_v3 = vpack.c.bf16 %v539_v53, %v532_v42  ;;  %9782 = vst [vmem:[#allocation47_spill] sm:$0xff] %v7470_v41  ;;  %v9783_v57 = vand.u32 4294901760, %v7192_v30  ;;  %v249_v42 = vand.u32 4294901760, %v248_v25  ;;  %v259_v53 = vand.u32 4294901760, %v7443_v0 }
  0x3c   :  { %9771 = vst [vmem:[#allocation40_spill] sm:$0xff] %v7432_v14  ;;  %9772 = vst [vmem:[#allocation41_spill] sm:$0xff] %v7434_v12  ;;  %v553_v22 = vand.u32 4294901760, %v552_v9  ;;  %v7478_v21 = vand.u32 4294901760, %v53_v8  ;;  %v7498_v9 = vsub.f32 %v52_v1, %v7470_v41 }
  0x3d   :  { %5627 = vmatmul.mubr.f32.gmra.mrb[2].mxu0 %v199_v40  ;;  %v7454_v40 = vsub.f32 %v48_v2, %v7422_v60  ;;  %v7468_v2 = vsub.f32 %v50_v27, %v7434_v12  ;;  %v7475_v58 = vsub.f32 %v7192_v30, %v9783_v57  ;;  %v269_v27 = vand.u32 4294901760, %v7451_v20  ;;  %v56_v30 = vld [vmem:[#allocation2 + $0xa0] sm:$0xff] }
  0x3e   :  { %5629 = vmatprep.mubr.f32.mxu0 %v209_v7  ;;  %6422 = vmatpush3.bf16.msra.mxu0 %v6419_v24  ;;  %v54_v7 = vld [vmem:[#allocation2 + $0x90] sm:$0xff]  ;;  %v9779_v24 = vand.u32 4294901760, %v7187_v29  ;;  %9785 = vst [vmem:[#allocation49_spill] sm:$0xff] %v7478_v21  ;;  %v6431_v25 = vpack.c.bf16 %v553_v22, %v546_v62  ;;  %v9788_v20 = vand.u32 4294901760, %v7432_v14  ;;  %9789 = vst [vmem:[#allocation52_spill] sm:$0xff] %v7498_v9  ;;  %v7506_v22 = vand.u32 4294901760, %v55_v54 }
  0x3f   :  { %9776 = vst [vmem:[#allocation42_spill] sm:$0xff] %v7454_v40  ;;  %6424 = vmatprep.subr.bf16.mxu0 %v6423_v6  ;;  %9781 = vst [vmem:[#allocation46_spill] sm:$0xff] %v7468_v2  ;;  %v9790_v57 = vand.u32 4294901760, %v7475_v58  ;;  %v7504_v62 = vsub.f32 %v53_v8, %v7478_v21  ;;  %v9795_v1 = vand.u32 4294901760, %v7454_v40  ;;  %v9797_v8 = vand.u32 4294901760, %v7208_v36 }
  0x40   :  { %v7464_v13 = vsub.f32 %v7187_v29, %v9779_v24  ;;  %9784 = vst [vmem:[#allocation48_spill] sm:$0xff] %v7475_v58  ;;  %v7483_v24 = vand.u32 4294901760, %v54_v7  ;;  %9792 = vst [vmem:[#allocation54_spill] sm:$0xff] %v7506_v22 }
  0x41   :  { %5630 = vmatmul.mubr.f32.gmra.mrb[4].mxu0 %v219_v4  ;;  %v7488_v4 = vsub.f32 %v51_v37, %v7459_v26  ;;  %v566_v37 = vsub.f32 %v7475_v58, %v9790_v57  ;;  %9791 = vst [vmem:[#allocation53_spill] sm:$0xff] %v7504_v62  ;;  %v288_v0 = vsub.f32 %v7454_v40, %v9795_v1  ;;  %v57_v1 = vld [vmem:[#allocation2 + $0xa8] sm:$0xff] }
  0x42   :  { %9780 = vst [vmem:[#allocation45_spill] sm:$0xff] %v7464_v13  ;;  %v9545_v29 = vand.u32 4294901760, %v7464_v13  ;;  %5632 = vmatprep.mubr.f32.mxu0 %v229_v61  ;;  %6426 = vmatpush3.bf16.msra.mxu0 %v6423_v6  ;;  %9786 = vst [vmem:[#allocation50_spill] sm:$0xff] %v7483_v24  ;;  %v278_v61 = vsub.f32 %v7432_v14, %v9788_v20  ;;  %v7511_v20 = vsub.f32 %v7203_v35, %v9793_v51 }
  0x43   :  { %6428 = vmatprep.subr.bf16.mxu0 %v6427_v3  ;;  %9787 = vst [vmem:[#allocation51_spill] sm:$0xff] %v7488_v4  ;;  %v7517_v57 = vsub.f32 %v54_v7, %v7483_v24  ;;  %v7522_v14 = vsub.f32 %v7208_v36, %v9797_v8  ;;  %v9801_v7 = vand.u32 4294901760, %v7468_v2  ;;  %v7538_v51 = vsub.f32 %v55_v54, %v7506_v22  ;;  %v58_v54 = vld [vmem:[#allocation2 + $0xb0] sm:$0xff] }
  0x44   :  { %v559_v6 = vsub.f32 %v7464_v13, %v9545_v29  ;;  %9794 = vst [vmem:[#allocation55_spill] sm:$0xff] %v7511_v20  ;;  %v279_v23 = vand.u32 4294901760, %v278_v61  ;;  %v289_v24 = vand.u32 4294901760, %v288_v0  ;;  %v7544_v40 = vand.u32 4294901760, %v57_v1 }
  0x45   :  { %5633 = vmatmul.mubr.f32.gmra.mrb[6].mxu0 %v239_v34  ;;  %9796 = vst [vmem:[#allocation56_spill] sm:$0xff] %v7517_v57  ;;  %v567_v34 = vand.u32 4294901760, %v566_v37  ;;  %9798 = vst [vmem:[#allocation57_spill] sm:$0xff] %v7522_v14  ;;  %v308_v37 = vsub.f32 %v7468_v2, %v9801_v7  ;;  %v9559_v8 = vand.u32 4294901760, %v7522_v14  ;;  %v9804_v0 = vand.u32 4294901760, %v7498_v9  ;;  %v59_v2 = vld [vmem:[#allocation2 + $0xb8] sm:$0xff] }
  0x46   :  { %v560_v29 = vand.u32 4294901760, %v559_v6  ;;  %5635 = vmatprep.mubr.f32.mxu0 %v249_v42  ;;  %6430 = vmatpush3.bf16.msra.mxu0 %v6427_v3  ;;  %v9799_v6 = vand.u32 4294901760, %v7457_v63  ;;  %v7528_v42 = vand.u32 4294901760, %v56_v30  ;;  %v9558_v3 = vand.u32 4294901760, %v7511_v20  ;;  %9802 = vst [vmem:[#allocation59_spill] sm:$0xff] %v7544_v40 }
  0x47   :  { %6432 = vmatprep.subr.bf16.mxu0 %v6431_v25 }
  0x48   :  { %v298_v35 = vsub.f32 %v7457_v63, %v9799_v6  ;;  %9800 = vst [vmem:[#allocation58_spill] sm:$0xff] %v7528_v42  ;;  %v6435_v36 = vpack.c.bf16 %v567_v34, %v560_v29  ;;  %v573_v63 = vsub.f32 %v7511_v20, %v9558_v3  ;;  %v7550_v61 = vsub.f32 %v56_v30, %v7528_v42  ;;  %v60_v42 = vld [vmem:[#allocation2 + $0xc0] sm:$0xff] }
  0x49   :  { %5636 = vmatmul.mubr.f32.gmra.mrb[8].mxu0 %v259_v53  ;;  %v580_v53 = vsub.f32 %v7522_v14, %v9559_v8  ;;  %v309_v6 = vand.u32 4294901760, %v308_v37  ;;  %v328_v3 = vsub.f32 %v7498_v9, %v9804_v0  ;;  %v9805_v8 = vand.u32 4294901760, %v7504_v62  ;;  %v63_v9 = vld [vmem:[#allocation2 + $0xd8] sm:$0xff] }
  0x4a   :  { %5638 = vmatprep.mubr.f32.mxu0 %v269_v27  ;;  %6434 = vmatpush3.bf16.msra.mxu0 %v6431_v25  ;;  %v299_v29 = vand.u32 4294901760, %v298_v35  ;;  %v574_v34 = vand.u32 4294901760, %v573_v63  ;;  %v9803_v27 = vand.u32 4294901760, %v7488_v4  ;;  %v9806_v63 = vand.u32 4294901760, %v7232_v49 }
  0x4b   :  { %6436 = vmatprep.subr.bf16.mxu0 %v6435_v36  ;;  %v581_v7 = vand.u32 4294901760, %v580_v53  ;;  %v338_v35 = vsub.f32 %v7504_v62, %v9805_v8  ;;  %v7576_v8 = vsub.f32 %v57_v1, %v7544_v40  ;;  %v7578_v0 = vand.u32 4294901760, %v58_v54 }
  0x4c   :  { %v318_v25 = vsub.f32 %v7488_v4, %v9803_v27  ;;  %v7565_v37 = vsub.f32 %v7232_v49, %v9806_v63  ;;  %v9808_v27 = vand.u32 4294901760, %v7237_v50 }
  0x4d   :  { %5639 = vmatmul.mubr.f32.gmra.mrb[10].mxu0 %v279_v23  ;;  %v9810_v23 = vand.u32 4294901760, %v7517_v57  ;;  %9811 = vst [vmem:[#allocation62_spill] sm:$0xff] %v7578_v0  ;;  %v6439_v30 = vpack.c.bf16 %v581_v7, %v574_v34  ;;  %v339_v1 = vand.u32 4294901760, %v338_v35 }
  0x4e   :  { %9807 = vst [vmem:[#allocation60_spill] sm:$0xff] %v7565_v37  ;;  %v7570_v4 = vsub.f32 %v7237_v50, %v9808_v27  ;;  %5641 = vmatprep.mubr.f32.mxu0 %v289_v24  ;;  %6438 = vmatpush3.bf16.msra.mxu0 %v6435_v36  ;;  %v9572_v63 = vand.u32 4294901760, %v7565_v37  ;;  %v319_v50 = vand.u32 4294901760, %v318_v25  ;;  %v7583_v27 = vand.u32 4294901760, %v59_v2 }
  0x4f   :  { %v348_v53 = vsub.f32 %v7517_v57, %v9810_v23  ;;  %v7585_v24 = vand.u32 4294901760, %v60_v42  ;;  %6440 = vmatprep.subr.bf16.mxu0 %v6439_v30  ;;  %v329_v23 = vand.u32 4294901760, %v328_v3  ;;  %v61_v57 = vld [vmem:[#allocation2 + $0xc8] sm:$0xff]  ;;  %v9814_v25 = vand.u32 4294901760, %v7538_v51 }
  0x50   :  { %9809 = vst [vmem:[#allocation61_spill] sm:$0xff] %v7570_v4  ;;  %v9577_v62 = vand.u32 4294901760, %v7570_v4  ;;  %9812 = vst [vmem:[#allocation63_spill] sm:$0xff] %v7583_v27  ;;  %v587_v36 = vsub.f32 %v7565_v37, %v9572_v63  ;;  %v7598_v3 = vsub.f32 %v58_v54, %v7578_v0  ;;  %v62_v63 = vld [vmem:[#allocation2 + $0xd0] sm:$0xff]  ;;  %v7613_v54 = vand.u32 4294901760, %v61_v57 }
  0x51   :  { %9813 = vst [vmem:[#allocation64_spill] sm:$0xff] %v7585_v24  ;;  %5642 = vmatmul.mubr.f32.gmra.mrb[12].mxu0 %v299_v29  ;;  %v349_v34 = vand.u32 4294901760, %v348_v53  ;;  %v358_v49 = vsub.f32 %v7538_v51, %v9814_v25  ;;  %v9815_v29 = vand.u32 4294901760, %v7550_v61  ;;  %v7608_v53 = vsub.f32 %v59_v2, %v7583_v27 }
  0x52   :  { %v594_v7 = vsub.f32 %v7570_v4, %v9577_v62  ;;  %5644 = vmatprep.mubr.f32.mxu0 %v309_v6  ;;  %6442 = vmatpush3.bf16.msra.mxu0 %v6439_v30  ;;  %v588_v40 = vand.u32 4294901760, %v587_v36  ;;  %v7605_v6 = vpack.c.bf16 %v7249_v56, %v7247_v55  ;;  %v7611_v25 = vsub.f32 %v60_v42, %v7585_v24 }
  0x53   :  { %v368_v35 = vsub.f32 %v7550_v61, %v9815_v29  ;;  %9816 = vst [vmem:[#allocation65_spill] sm:$0xff] %v7608_v53  ;;  %9818 = vst [vmem:[#allocation67_spill] sm:$0xff] %v7613_v54  ;;  %v7617_v30 = vpack.c.bf16 %v7300_v32, %v7295_v31  ;;  %v7621_v36 = vpack.c.bf16 %v7212_v39, %v7210_v38  ;;  %v7632_v62 = vand.u32 4294901760, %v62_v63  ;;  %v67_v31 = vld [vmem:[#allocation2 + $0xf8] sm:$0xff] }
  0x54   :  { %v595_v22 = vand.u32 4294901760, %v594_v7  ;;  %9817 = vst [vmem:[#allocation66_spill] sm:$0xff] %v7611_v25  ;;  %v7625_v7 = vpack.c.bf16 %v7346_v16, %v7341_v47  ;;  %v7629_v2 = vpack.c.bf16 %v7419_v18, %v7405_v19  ;;  %v7644_v18 = vpack.c.bf16 %v7570_v4, %v7565_v37 }
  0x55   :  { %5645 = vmatmul.mubr.f32.gmra.mrb[14].mxu0 %v319_v50  ;;  %9819 = vst [vmem:[#allocation68_spill] sm:$0xff] %v7632_v62  ;;  %v64_v50 = vld [vmem:[#allocation2 + $0xe0] sm:$0xff]  ;;  %v7650_v19 = vsub.f32 %v61_v57, %v7613_v54  ;;  %v369_v4 = vand.u32 4294901760, %v368_v35  ;;  %v9822_v37 = vand.u32 4294901760, %v7598_v3  ;;  %v7661_v57 = vsub.f32 %v62_v63, %v7632_v62 }
  0x56   :  { %v6443_v29 = vpack.c.bf16 %v595_v22, %v588_v40  ;;  %5647 = vmatprep.mubr.f32.mxu0 %v329_v23  ;;  %v7636_v40 = vpack.c.bf16 %v7475_v58, %v7464_v13  ;;  %v7640_v22 = vpack.c.bf16 %v7522_v14, %v7511_v20  ;;  %v9820_v23 = vand.u32 4294901760, %v7576_v8 }
  0x57   :  { %v359_v58 = vand.u32 4294901760, %v358_v49  ;;  %v7654_v20 = vand.u32 4294901760, %v63_v9  ;;  %v65_v49 = vld [vmem:[#allocation2 + $0xe8] sm:$0xff]  ;;  %v9824_v16 = vand.u32 4294901760, %v7608_v53  ;;  %v9825_v35 = vand.u32 4294901760, %v7611_v25 }
  0x58   :  { %6444 = vmatprep.subr.bf16.mxu0 %v6443_v29  ;;  %v378_v42 = vsub.f32 %v7576_v8, %v9820_v23  ;;  %v388_v23 = vsub.f32 %v7598_v3, %v9822_v37  ;;  %v7675_v63 = vand.u32 4294901760, %v65_v49 }
  0x59   :  { %6446 = vmatpush3.bf16.msra.mxu0 %v6443_v29  ;;  %9821 = vst [vmem:[#allocation69_spill] sm:$0xff] %v7654_v20  ;;  %v7663_v29 = vand.u32 4294901760, %v64_v50  ;;  %v408_v47 = vsub.f32 %v7611_v25, %v9825_v35  ;;  %v7673_v37 = vsub.f32 %v63_v9, %v7654_v20 }
  0x5a   :  { %5648 = vmatmul.mubr.f32.gmra.mrb[16].mxu0 %v339_v1  ;;  %6448 = vmatprep.subr.bf16.mxu0 %v7621_v36  ;;  %v66_v1 = vld [vmem:[#allocation2 + $0xf0] sm:$0xff]  ;;  %v379_v13 = vand.u32 4294901760, %v378_v42  ;;  %9826 = vst [vmem:[#allocation71_spill] sm:$0xff] %v7675_v63  ;;  %v389_v32 = vand.u32 4294901760, %v388_v23  ;;  %v9597_v42 = vand.u32 4294901760, %v7661_v57  ;;  %v7688_v55 = vsub.f32 %v65_v49, %v7675_v63 }
  0x5b   :  { %5650 = vmatprep.mubr.f32.mxu0 %v349_v34  ;;  %9823 = vst [vmem:[#allocation70_spill] sm:$0xff] %v7663_v29  ;;  %v398_v34 = vsub.f32 %v7608_v53, %v9824_v16  ;;  %v7679_v14 = vsub.f32 %v64_v50, %v7663_v29  ;;  %v9828_v16 = vand.u32 4294901760, %v7650_v19  ;;  %v9596_v9 = vand.u32 4294901760, %v7673_v37 }
  0x5c   :  { %v409_v23 = vand.u32 4294901760, %v408_v47  ;;  %v428_v50 = vsub.f32 %v7661_v57, %v9597_v42 }
  0x5d   :  { %v418_v56 = vsub.f32 %v7650_v19, %v9828_v16  ;;  %v399_v35 = vand.u32 4294901760, %v398_v34  ;;  %v9601_v25 = vand.u32 4294901760, %v7679_v14  ;;  %v438_v49 = vsub.f32 %v7673_v37, %v9596_v9 }
  0x5e   :  { %5651 = vmatmul.mubr.f32.gmra.mrb[18].mxu0 %v359_v58  ;;  %v7681_v58 = vand.u32 4294901760, %v66_v1  ;;  %v9600_v34 = vand.u32 4294901760, %v7688_v55  ;;  %v429_v47 = vand.u32 4294901760, %v428_v50 }
  0x5f   :  { %5653 = vmatprep.mubr.f32.mxu0 %v369_v4  ;;  %v7690_v4 = vand.u32 4294901760, %v67_v31  ;;  %v448_v16 = vsub.f32 %v7679_v14, %v9601_v25  ;;  %v9851_v25 = vld [vmem:[#allocation42_spill] sm:$0xff] }
  0x60   :  { %9827 = vst [vmem:[#allocation72_spill] sm:$0xff] %v7681_v58  ;;  %v7697_v53 = vsub.f32 %v66_v1, %v7681_v58 }
  0x61   :  { %9829 = vst [vmem:[#allocation73_spill] sm:$0xff] %v7690_v4  ;;  %v449_v42 = vand.u32 4294901760, %v448_v16  ;;  %v9840_v16 = vld [vmem:[#allocation13_spill] sm:$0xff] }
  0x62   :  { %5654 = vmatmul.mubr.f32.gmra.mrb[20].mxu0 %v379_v13  ;;  %v419_v13 = vand.u32 4294901760, %v418_v56  ;;  %v9599_v1 = vand.u32 4294901760, %v7697_v53  ;;  %v458_v56 = vsub.f32 %v7688_v55, %v9600_v34  ;;  %v9850_v34 = vld [vmem:[#allocation40_spill] sm:$0xff] }
  0x63   :  { %5656 = vmatprep.mubr.f32.mxu0 %v389_v32  ;;  %v7704_v32 = vsub.f32 %v67_v31, %v7690_v4 }
  0x64   :  { %v468_v31 = vsub.f32 %v7697_v53, %v9599_v1  ;;  %v9849_v1 = vld [vmem:[#allocation20_spill] sm:$0xff] }
  0x65   :  { %v9598_v9 = vand.u32 4294901760, %v7704_v32 }
  0x66   :  { %5657 = vmatmul.mubr.f32.gmra.mrb[22].mxu0 %v399_v35  ;;  %v439_v35 = vand.u32 4294901760, %v438_v49 }
  0x67   :  { %5659 = vmatprep.mubr.f32.mxu0 %v409_v23  ;;  %v459_v23 = vand.u32 4294901760, %v458_v56  ;;  %v478_v50 = vsub.f32 %v7704_v32, %v9598_v9  ;;  %v9842_v56 = vld [vmem:[#allocation31_spill] sm:$0xff] }
  0x68   :  { %v9848_v9 = vld [vmem:[#allocation35_spill] sm:$0xff] }
  0x69   :  { %v479_v49 = vand.u32 4294901760, %v478_v50  ;;  %v9845_v50 = vld [vmem:[#allocation33_spill] sm:$0xff] }
  0x6a   :  { %5660 = vmatmul.mubr.f32.gmra.mrb[24].mxu0 %v419_v13  ;;  %v469_v13 = vand.u32 4294901760, %v468_v31  ;;  %v9843_v31 = vld [vmem:[#allocation15_spill] sm:$0xff] }
  0x6b   :  { %5662 = vmatprep.mubr.f32.mxu0 %v429_v47  ;;  %v9839_v47 = vld [vmem:[#allocation24_spill] sm:$0xff] }
  0x6e   :  { %5663 = vmatmul.mubr.f32.gmra.mrb[26].mxu0 %v439_v35  ;;  %v9841_v35 = vld [vmem:[#allocation25_spill] sm:$0xff] }
  0x6f   :  { %5665 = vmatprep.mubr.f32.mxu0 %v449_v42  ;;  %v9838_v42 = vld [vmem:[#allocation22_spill] sm:$0xff] }
  0x72   :  { %5666 = vmatmul.mubr.f32.gmra.mrb[28].mxu0 %v459_v23  ;;  %v9844_v23 = vld [vmem:[#allocation32_spill] sm:$0xff] }
  0x73   :  { %5668 = vmatprep.mubr.f32.mxu0 %v469_v13  ;;  %v9846_v13 = vld [vmem:[#allocation16_spill] sm:$0xff] }
  0x76   :  { %5669 = vmatmul.mubr.f32.gmra.mrb[30].mxu0 %v479_v49  ;;  %v9847_v49 = vld [vmem:[#allocation34_spill] sm:$0xff] }
  0x77   :  { %5703 = vmatprep.mubr.f32.mxu0 %v7149_v17 }
  0x7a   :  { %5704 = vmatmul.mubr.f32.vlgmr.msra.gmra.mrb[0].mxu0 %v7197_v33 }
  0x7b   :  { %6450 = vmatpush3.bf16.msra.mxu0 %v7621_v36  ;;  %5706 = vmatprep.mubr.f32.mxu0 %v7223_v44  ;;  %v9832_v36 = vld [vmem:[#allocation58_spill] sm:$0xff] }
  0x7c   :  { %6452 = vmatprep.subr.bf16.mxu0 %v7605_v6 }
  0x7e   :  { %5707 = vmatmul.mubr.f32.gmra.mrb[2].mxu0 %v7225_v45 }
  0x7f   :  { %5709 = vmatprep.mubr.f32.mxu0 %v7242_v52  ;;  %6454 = vmatpush3.bf16.msra.mxu0 %v7605_v6  ;;  %v9830_v6 = vld [vmem:[#allocation50_spill] sm:$0xff] }
  0x80   :  { %6456 = vmatprep.subr.bf16.mxu0 %v7617_v30 }
  0x82   :  { %5710 = vmatmul.mubr.f32.gmra.mrb[4].mxu0 %v7261_v59 }
  0x83   :  { %5712 = vmatprep.mubr.f32.mxu0 %v7313_v11  ;;  %6458 = vmatpush3.bf16.msra.mxu0 %v7617_v30  ;;  %v9831_v30 = vld [vmem:[#allocation54_spill] sm:$0xff] }
  0x84   :  { %6460 = vmatprep.subr.bf16.mxu0 %v7625_v7 }
  0x86   :  { %5713 = vmatmul.mubr.f32.gmra.mrb[6].mxu0 %v7315_v46 }
  0x87   :  { %5715 = vmatprep.mubr.f32.mxu0 %v7336_v5  ;;  %6462 = vmatpush3.bf16.msra.mxu0 %v7625_v7  ;;  %v9833_v7 = vld [vmem:[#allocation59_spill] sm:$0xff] }
  0x88   :  { %6464 = vmatprep.subr.bf16.mxu0 %v7629_v2 }
  0x8a   :  { %5716 = vmatmul.mubr.f32.gmra.mrb[8].mxu0 %v7359_v28 }
  0x8b   :  { %5718 = vmatprep.mubr.f32.mxu0 %v7362_v15  ;;  %6466 = vmatpush3.bf16.msra.mxu0 %v7629_v2  ;;  %v9835_v2 = vld [vmem:[#allocation17_spill] sm:$0xff] }
  0x8c   :  { %6468 = vmatprep.subr.bf16.mxu0 %v7636_v40 }
  0x8e   :  { %5719 = vmatmul.mubr.f32.gmra.mrb[10].mxu0 %v7400_v43 }
  0x8f   :  { %5721 = vmatprep.mubr.f32.mxu0 %v7422_v60  ;;  %6470 = vmatpush3.bf16.msra.mxu0 %v7636_v40  ;;  %v9836_v40 = vld [vmem:[#allocation21_spill] sm:$0xff] }
  0x90   :  { %6472 = vmatprep.subr.bf16.mxu0 %v7640_v22 }
  0x92   :  { %5722 = vmatmul.mubr.f32.gmra.mrb[12].mxu0 %v7424_v48  ;;  %v9873_v48 = vld [vmem:[#allocation27_spill] sm:$0xff] }
  0x93   :  { %5724 = vmatprep.mubr.f32.mxu0 %v7434_v12  ;;  %6474 = vmatpush3.bf16.msra.mxu0 %v7640_v22  ;;  %v9837_v22 = vld [vmem:[#allocation12_spill] sm:$0xff] }
  0x94   :  { %6476 = vmatprep.subr.bf16.mxu0 %v7644_v18 }
  0x96   :  { %5725 = vmatmul.mubr.f32.gmra.mrb[14].mxu0 %v7459_v26  ;;  %v9870_v26 = vand.u32 4294901760, %v9836_v40 }
  0x97   :  { %5727 = vmatprep.mubr.f32.mxu0 %v7470_v41  ;;  %6478 = vmatpush3.bf16.msra.mxu0 %v7644_v18  ;;  %v9834_v18 = vld [vmem:[#allocation14_spill] sm:$0xff]  ;;  %v9869_v41 = vand.u32 4294901760, %v9835_v2 }
  0x98   :  { %6480 = vmatprep.subr.bf16.mxu0 %v7131_v10 }
  0x9a   :  { %5728 = vmatmul.mubr.f32.gmra.mrb[16].mxu0 %v7478_v21 }
  0x9b   :  { %5730 = vmatprep.mubr.f32.mxu0 %v9830_v6 }
  0x9e   :  { %5731 = vmatmul.mubr.f32.gmra.mrb[18].mxu0 %v9831_v30  ;;  %v9867_v30 = vld [vmem:[#allocation19_spill] sm:$0xff] }
  0x9f   :  { %5733 = vmatprep.mubr.f32.mxu0 %v9832_v36  ;;  %v9868_v6 = vand.u32 4294901760, %v9867_v30 }
  0xa2   :  { %5734 = vmatmul.mubr.f32.gmra.mrb[20].mxu0 %v9833_v7  ;;  %v9861_v7 = vld [vmem:[#allocation56_spill] sm:$0xff] }
  0xa3   :  { %5736 = vmatprep.mubr.f32.mxu0 %v7578_v0  ;;  %v9860_v0 = vld [vmem:[#allocation53_spill] sm:$0xff] }
  0xa6   :  { %5737 = vmatmul.mubr.f32.gmra.mrb[22].mxu0 %v7583_v27  ;;  %v9859_v27 = vld [vmem:[#allocation52_spill] sm:$0xff] }
  0xa7   :  { %5739 = vmatprep.mubr.f32.mxu0 %v7585_v24  ;;  %v9858_v24 = vld [vmem:[#allocation51_spill] sm:$0xff] }
  0xaa   :  { %5740 = vmatmul.mubr.f32.gmra.mrb[24].mxu0 %v7613_v54 }
  0xab   :  { %5742 = vmatprep.mubr.f32.mxu0 %v7632_v62  ;;  %v9857_v62 = vand.u32 4294901760, %v7212_v39  ;;  %v9863_v39 = vld [vmem:[#allocation66_spill] sm:$0xff] }
  0xae   :  { %5743 = vmatmul.mubr.f32.gmra.mrb[26].mxu0 %v7654_v20  ;;  %v9856_v20 = vand.u32 4294901760, %v7210_v38  ;;  %v9862_v38 = vld [vmem:[#allocation65_spill] sm:$0xff] }
  0xaf   :  { %5745 = vmatprep.mubr.f32.mxu0 %v7663_v29  ;;  %v9855_v29 = vld [vmem:[#allocation28_spill] sm:$0xff] }
  0xb0   :  { %v6511_v54 = vpack.c.bf16 %v9857_v62, %v9856_v20  ;;  %v9864_v62 = vand.u32 4294901760, %v9834_v18  ;;  %v9865_v20 = vld [vmem:[#allocation18_spill] sm:$0xff] }
  0xb1   :  { %v9866_v36 = vand.u32 4294901760, %v9865_v20  ;;  %v9891_v20 = vld [vmem:[#allocation48_spill] sm:$0xff] }
  0xb2   :  { %5746 = vmatmul.mubr.f32.gmra.mrb[28].mxu0 %v7675_v63  ;;  %v9854_v63 = vld [vmem:[#allocation46_spill] sm:$0xff] }
  0xb3   :  { %5748 = vmatprep.mubr.f32.mxu0 %v7681_v58  ;;  %v9853_v58 = vld [vmem:[#allocation43_spill] sm:$0xff]  ;;  %v6515_v21 = vpack.c.bf16 %v9868_v6, %v9866_v36  ;;  %v9877_v6 = vld [vmem:[#allocation29_spill] sm:$0xff] }
  0xb6   :  { %5749 = vmatmul.mubr.f32.gmra.mrb[30].mxu0 %v7690_v4  ;;  %v9852_v4 = vld [vmem:[#allocation23_spill] sm:$0xff] }
  0xb7   :  { %5783 = vmatprep.mubr.f32.mxu0 %v9834_v18  ;;  %v9875_v18 = vand.u32 4294901760, %v9838_v42 }
  0xba   :  { %5784 = vmatmul.mubr.f32.vlgmr.msra.gmra.mrb[0].mxu0 %v9835_v2 }
  0xbb   :  { %6482 = vmatpush3.bf16.msra.mxu0 %v7131_v10  ;;  %5786 = vmatprep.mubr.f32.mxu0 %v9836_v40 }
  0xbc   :  { %6484 = vmatprep.subr.bf16.mxu0 %v9837_v22 }
  0xbe   :  { %5787 = vmatmul.mubr.f32.gmra.mrb[2].mxu0 %v9838_v42  ;;  %v9888_v42 = vand.u32 4294901760, %v9845_v50 }
  0xbf   :  { %5789 = vmatprep.mubr.f32.mxu0 %v9839_v47  ;;  %6486 = vmatpush3.bf16.msra.mxu0 %v9837_v22 }
  0xc0   :  { %6488 = vmatprep.subr.bf16.mxu0 %v9840_v16 }
  0xc2   :  { %5790 = vmatmul.mubr.f32.gmra.mrb[4].mxu0 %v9841_v35 }
  0xc3   :  { %5792 = vmatprep.mubr.f32.mxu0 %v9842_v56  ;;  %6490 = vmatpush3.bf16.msra.mxu0 %v9840_v16 }
  0xc4   :  { %6492 = vmatprep.subr.bf16.mxu0 %v9843_v31 }
  0xc6   :  { %5793 = vmatmul.mubr.f32.gmra.mrb[6].mxu0 %v9844_v23 }
  0xc7   :  { %5795 = vmatprep.mubr.f32.mxu0 %v9845_v50  ;;  %6494 = vmatpush3.bf16.msra.mxu0 %v9843_v31 }
  0xc8   :  { %6496 = vmatprep.subr.bf16.mxu0 %v9846_v13 }
  0xca   :  { %5796 = vmatmul.mubr.f32.gmra.mrb[8].mxu0 %v9847_v49 }
  0xcb   :  { %5798 = vmatprep.mubr.f32.mxu0 %v9848_v9  ;;  %6498 = vmatpush3.bf16.msra.mxu0 %v9846_v13 }
  0xcc   :  { %6500 = vmatprep.subr.bf16.mxu0 %v9849_v1 }
  0xce   :  { %5799 = vmatmul.mubr.f32.gmra.mrb[10].mxu0 %v9850_v34 }
  0xcf   :  { %5801 = vmatprep.mubr.f32.mxu0 %v9851_v25  ;;  %6502 = vmatpush3.bf16.msra.mxu0 %v9849_v1 }
  0xd0   :  { %6504 = vmatprep.subr.bf16.mxu0 %v9852_v4 }
  0xd2   :  { %5802 = vmatmul.mubr.f32.gmra.mrb[12].mxu0 %v9853_v58 }
  0xd3   :  { %5804 = vmatprep.mubr.f32.mxu0 %v9854_v63  ;;  %6506 = vmatpush3.bf16.msra.mxu0 %v9852_v4  ;;  %v9874_v4 = vand.u32 4294901760, %v9873_v48  ;;  %v9883_v48 = vld [vmem:[#allocation36_spill] sm:$0xff] }
  0xd4   :  { %6508 = vmatprep.subr.bf16.mxu0 %v9855_v29 }
  0xd6   :  { %5805 = vmatmul.mubr.f32.gmra.mrb[14].mxu0 %v9858_v24 }
  0xd7   :  { %5807 = vmatprep.mubr.f32.mxu0 %v9859_v27  ;;  %6510 = vmatpush3.bf16.msra.mxu0 %v9855_v29  ;;  %v9871_v29 = vld [vmem:[#allocation26_spill] sm:$0xff] }
  0xd8   :  { %6512 = vmatprep.subr.bf16.mxu0 %v6511_v54  ;;  %v9872_v12 = vand.u32 4294901760, %v9871_v29  ;;  %v9882_v29 = vand.u32 4294901760, %v9842_v56  ;;  %v9892_v56 = vand.u32 4294901760, %v9891_v20  ;;  %v9940_v20 = vld [vmem:[#allocation68_spill] sm:$0xff] }
  0xda   :  { %5808 = vmatmul.mubr.f32.gmra.mrb[16].mxu0 %v9860_v0  ;;  %v6519_v60 = vpack.c.bf16 %v9874_v4, %v9872_v12  ;;  %v9884_v12 = vand.u32 4294901760, %v9883_v48  ;;  %v9885_v4 = vld [vmem:[#allocation37_spill] sm:$0xff] }
  0xdb   :  { %5810 = vmatprep.mubr.f32.mxu0 %v9861_v7  ;;  %v9886_v2 = vand.u32 4294901760, %v9885_v4  ;;  %v9906_v4 = vand.u32 4294901760, %v9854_v63  ;;  %v9911_v63 = vand.u32 4294901760, %v7538_v51 }
  0xdd   :  { %v6527_v40 = vpack.c.bf16 %v9886_v2, %v9884_v12  ;;  %v9905_v12 = vand.u32 4294901760, %v9853_v58  ;;  %v9909_v2 = vand.u32 4294901760, %v9860_v0  ;;  %v9910_v58 = vand.u32 4294901760, %v9861_v7 }
  0xde   :  { %5811 = vmatmul.mubr.f32.gmra.mrb[18].mxu0 %v7538_v51  ;;  %v9916_v0 = vand.u32 4294901760, %v9863_v39  ;;  %v9917_v7 = vand.u32 4294901760, %v7650_v19  ;;  %v9918_v51 = vand.u32 4294901760, %v7661_v57 }
  0xdf   :  { %5813 = vmatprep.mubr.f32.mxu0 %v7550_v61 }
  0xe2   :  { %5814 = vmatmul.mubr.f32.gmra.mrb[20].mxu0 %v7576_v8 }
  0xe3   :  { %5816 = vmatprep.mubr.f32.mxu0 %v7598_v3 }
  0xe6   :  { %5817 = vmatmul.mubr.f32.gmra.mrb[22].mxu0 %v9862_v38 }
  0xe7   :  { %5819 = vmatprep.mubr.f32.mxu0 %v9863_v39  ;;  %v9923_v39 = vand.u32 4294901760, %v7704_v32 }
  0xea   :  { %5820 = vmatmul.mubr.f32.gmra.mrb[24].mxu0 %v7650_v19  ;;  %v9926_v19 = vld [vmem:[#allocation39_spill] sm:$0xff] }
  0xeb   :  { %5822 = vmatprep.mubr.f32.mxu0 %v7661_v57  ;;  %v9929_v57 = vld [vmem:[#allocation44_spill] sm:$0xff] }
  0xee   :  { %5823 = vmatmul.mubr.f32.gmra.mrb[26].mxu0 %v7673_v37 }
  0xef   :  { %5825 = vmatprep.mubr.f32.mxu0 %v7679_v14 }
  0xf2   :  { %5826 = vmatmul.mubr.f32.gmra.mrb[28].mxu0 %v7688_v55 }
  0xf3   :  { %5828 = vmatprep.mubr.f32.mxu0 %v7697_v53 }
  0xf6   :  { %5829 = vmatmul.mubr.f32.gmra.mrb[30].mxu0 %v7704_v32  ;;  %v9931_v32 = vld [vmem:[#allocation49_spill] sm:$0xff] }
  0xf7   :  { %5863 = vmatprep.mubr.f32.mxu0 %v9864_v62  ;;  %v9876_v62 = vand.u32 4294901760, %v9839_v47  ;;  %v9889_v47 = vld [vmem:[#allocation45_spill] sm:$0xff] }
  0xfa   :  { %5864 = vmatmul.mubr.f32.vlgmr.msra.gmra.mrb[0].mxu0 %v9869_v41  ;;  %v9878_v41 = vand.u32 4294901760, %v9877_v6 }
  0xfb   :  { %6514 = vmatpush3.bf16.msra.mxu0 %v6511_v54  ;;  %5866 = vmatprep.mubr.f32.mxu0 %v9870_v26  ;;  %v9879_v54 = vld [vmem:[#allocation30_spill] sm:$0xff]  ;;  %v9881_v26 = vand.u32 4294901760, %v9841_v35  ;;  %v9890_v35 = vand.u32 4294901760, %v9889_v47  ;;  %v9938_v47 = vld [vmem:[#allocation64_spill] sm:$0xff] }
  0xfc   :  { %6516 = vmatprep.subr.bf16.mxu0 %v6515_v21  ;;  %v9880_v30 = vand.u32 4294901760, %v9879_v54 }
  0xfe   :  { %5867 = vmatmul.mubr.f32.gmra.mrb[2].mxu0 %v9875_v18  ;;  %v6523_v36 = vpack.c.bf16 %v9880_v30, %v9878_v41  ;;  %v6531_v18 = vpack.c.bf16 %v9892_v56, %v9890_v35  ;;  %v9897_v41 = vld [vmem:[#allocation57_spill] sm:$0xff]  ;;  %v9899_v30 = vand.u32 4294901760, %v9850_v34  ;;  %v9907_v34 = vand.u32 4294901760, %v9858_v24  ;;  %v9939_v35 = vld [vmem:[#allocation67_spill] sm:$0xff] }
  0xff   :  { %5869 = vmatprep.mubr.f32.mxu0 %v9876_v62  ;;  %6518 = vmatpush3.bf16.msra.mxu0 %v6515_v21  ;;  %v9887_v21 = vand.u32 4294901760, %v9844_v23  ;;  %v9894_v62 = vand.u32 4294901760, %v9848_v9  ;;  %v9895_v23 = vld [vmem:[#allocation55_spill] sm:$0xff]  ;;  %v9898_v50 = vand.u32 4294901760, %v9897_v41  ;;  %v9913_v24 = vand.u32 4294901760, %v7576_v8  ;;  %v9941_v56 = vld [vmem:[#allocation69_spill] sm:$0xff] }
 0x100   :  { %6520 = vmatprep.subr.bf16.mxu0 %v6519_v60  ;;  %v9896_v6 = vand.u32 4294901760, %v9895_v23  ;;  %v9920_v8 = vand.u32 4294901760, %v7679_v14  ;;  %v9927_v14 = vld [vmem:[#allocation41_spill] sm:$0xff] }
 0x101   :  { %v9945_v23 = vld [vmem:[#allocation73_spill] sm:$0xff] }
 0x102   :  { %5870 = vmatmul.mubr.f32.gmra.mrb[4].mxu0 %v9881_v26  ;;  %v6535_v54 = vpack.c.bf16 %v9898_v50, %v9896_v6 }
 0x103   :  { %5872 = vmatprep.mubr.f32.mxu0 %v9882_v29  ;;  %6522 = vmatpush3.bf16.msra.mxu0 %v6519_v60  ;;  %v9893_v60 = vand.u32 4294901760, %v9847_v49  ;;  %v9901_v49 = vld [vmem:[#allocation60_spill] sm:$0xff]  ;;  %v9903_v29 = vld [vmem:[#allocation61_spill] sm:$0xff] }
 0x104   :  { %6524 = vmatprep.subr.bf16.mxu0 %v6523_v36  ;;  %v9902_v26 = vand.u32 4294901760, %v9901_v49  ;;  %v9904_v9 = vand.u32 4294901760, %v9903_v29 }
 0x106   :  { %5873 = vmatmul.mubr.f32.gmra.mrb[6].mxu0 %v9887_v21  ;;  %v6539_v48 = vpack.c.bf16 %v9904_v9, %v9902_v26  ;;  %v9915_v21 = vand.u32 4294901760, %v9862_v38  ;;  %v9922_v38 = vand.u32 4294901760, %v7697_v53  ;;  %v9928_v53 = vld [vmem:[#allocation28_spill] sm:$0xff] }
 0x107   :  { %5875 = vmatprep.mubr.f32.mxu0 %v9888_v42  ;;  %6526 = vmatpush3.bf16.msra.mxu0 %v6523_v36  ;;  %v9900_v36 = vand.u32 4294901760, %v9851_v25  ;;  %v9908_v25 = vand.u32 4294901760, %v9859_v27  ;;  %v9914_v27 = vand.u32 4294901760, %v7598_v3  ;;  %v9921_v3 = vand.u32 4294901760, %v7688_v55  ;;  %v9925_v55 = vld [vmem:[#allocation23_spill] sm:$0xff] }
 0x108   :  { %6528 = vmatprep.subr.bf16.mxu0 %v6527_v40  ;;  %v9937_v42 = vld [vmem:[#allocation63_spill] sm:$0xff] }
 0x10a   :  { %5876 = vmatmul.mubr.f32.gmra.mrb[8].mxu0 %v9893_v60  ;;  %v9943_v60 = vld [vmem:[#allocation71_spill] sm:$0xff] }
 0x10b   :  { %5878 = vmatprep.mubr.f32.mxu0 %v9894_v62  ;;  %6530 = vmatpush3.bf16.msra.mxu0 %v6527_v40  ;;  %v9912_v40 = vand.u32 4294901760, %v7550_v61  ;;  %v9919_v61 = vand.u32 4294901760, %v7673_v37  ;;  %v9930_v37 = vld [vmem:[#allocation47_spill] sm:$0xff]  ;;  %v9944_v62 = vld [vmem:[#allocation72_spill] sm:$0xff] }
 0x10c   :  { %6532 = vmatprep.subr.bf16.mxu0 %v6531_v18 }
 0x10e   :  { %5879 = vmatmul.mubr.f32.gmra.mrb[10].mxu0 %v9899_v30 }
 0x10f   :  { %5881 = vmatprep.mubr.f32.mxu0 %v9900_v36  ;;  %6534 = vmatpush3.bf16.msra.mxu0 %v6531_v18  ;;  %v9942_v18 = vld [vmem:[#allocation70_spill] sm:$0xff] }
 0x110   :  { %6536 = vmatprep.subr.bf16.mxu0 %v6535_v54 }
 0x112   :  { %5882 = vmatmul.mubr.f32.gmra.mrb[12].mxu0 %v9905_v12 }
 0x113   :  { %5884 = vmatprep.mubr.f32.mxu0 %v9906_v4  ;;  %6538 = vmatpush3.bf16.msra.mxu0 %v6535_v54 }
 0x114   :  { %6540 = vmatprep.subr.bf16.mxu0 %v6539_v48 }
 0x116   :  { %5885 = vmatmul.mubr.f32.gmra.mrb[14].mxu0 %v9907_v34 }
 0x117   :  { %5887 = vmatprep.mubr.f32.mxu0 %v9908_v25  ;;  %6542 = vmatpush3.bf16.msra.mxu0 %v6539_v48 }
 0x118   :  { %6544 = vmatprep.subr.bf16.mxu0 %v7131_v10 }
 0x11a   :  { %5888 = vmatmul.mubr.f32.gmra.mrb[16].mxu0 %v9909_v2 }
 0x11b   :  { %5890 = vmatprep.mubr.f32.mxu0 %v9910_v58 }
 0x11e   :  { %5891 = vmatmul.mubr.f32.gmra.mrb[18].mxu0 %v9911_v63 }
 0x11f   :  { %5893 = vmatprep.mubr.f32.mxu0 %v9912_v40 }
 0x122   :  { %5894 = vmatmul.mubr.f32.gmra.mrb[20].mxu0 %v9913_v24 }
 0x123   :  { %5896 = vmatprep.mubr.f32.mxu0 %v9914_v27 }
 0x126   :  { %5897 = vmatmul.mubr.f32.gmra.mrb[22].mxu0 %v9915_v21 }
 0x127   :  { %5899 = vmatprep.mubr.f32.mxu0 %v9916_v0 }
 0x12a   :  { %5900 = vmatmul.mubr.f32.gmra.mrb[24].mxu0 %v9917_v7 }
 0x12b   :  { %5902 = vmatprep.mubr.f32.mxu0 %v9918_v51 }
 0x12e   :  { %5903 = vmatmul.mubr.f32.gmra.mrb[26].mxu0 %v9919_v61 }
 0x12f   :  { %5905 = vmatprep.mubr.f32.mxu0 %v9920_v8 }
 0x132   :  { %5906 = vmatmul.mubr.f32.gmra.mrb[28].mxu0 %v9921_v3 }
 0x133   :  { %5908 = vmatprep.mubr.f32.mxu0 %v9922_v38 }
 0x136   :  { %5909 = vmatmul.mubr.f32.gmra.mrb[30].mxu0 %v9923_v39 }
 0x137   :  { %5943 = vmatprep.mubr.f32.mxu0 %v7149_v17 }
 0x13a   :  { %5944 = vmatmul.mubr.f32.vlgmr.msra.gmra.mrb[0].mxu0 %v7197_v33 }
 0x13b   :  { %6546 = vmatpush3.bf16.msra.mxu0 %v7131_v10  ;;  %5946 = vmatprep.mubr.f32.mxu0 %v7223_v44  ;;  %v9924_v10 = vld [vmem:[#allocation38_spill] sm:$0xff] }
 0x13c   :  { %6548 = vmatprep.subr.bf16.mxu0 %v9837_v22 }
 0x13e   :  { %5947 = vmatmul.mubr.f32.gmra.mrb[2].mxu0 %v7225_v45 }
 0x13f   :  { %5949 = vmatprep.mubr.f32.mxu0 %v7242_v52  ;;  %6550 = vmatpush3.bf16.msra.mxu0 %v9837_v22  ;;  %v9932_v22 = vld [vmem:[#allocation50_spill] sm:$0xff] }
 0x140   :  { %6552 = vmatprep.subr.bf16.mxu0 %v9840_v16 }
 0x142   :  { %5950 = vmatmul.mubr.f32.gmra.mrb[4].mxu0 %v7261_v59 }
 0x143   :  { %5952 = vmatprep.mubr.f32.mxu0 %v7313_v11  ;;  %6554 = vmatpush3.bf16.msra.mxu0 %v9840_v16  ;;  %v9934_v16 = vld [vmem:[#allocation58_spill] sm:$0xff] }
 0x144   :  { %6556 = vmatprep.subr.bf16.mxu0 %v9843_v31 }
 0x146   :  { %5953 = vmatmul.mubr.f32.gmra.mrb[6].mxu0 %v7315_v46 }
 0x147   :  { %5955 = vmatprep.mubr.f32.mxu0 %v7336_v5  ;;  %6558 = vmatpush3.bf16.msra.mxu0 %v9843_v31  ;;  %v9935_v31 = vld [vmem:[#allocation59_spill] sm:$0xff] }
 0x148   :  { %6560 = vmatprep.subr.bf16.mxu0 %v9846_v13 }
 0x14a   :  { %5956 = vmatmul.mubr.f32.gmra.mrb[8].mxu0 %v7359_v28 }
 0x14b   :  { %5958 = vmatprep.mubr.f32.mxu0 %v7362_v15  ;;  %6562 = vmatpush3.bf16.msra.mxu0 %v9846_v13  ;;  %v9936_v13 = vld [vmem:[#allocation62_spill] sm:$0xff] }
 0x14c   :  { %6564 = vmatprep.subr.bf16.mxu0 %v9849_v1 }
 0x14e   :  { %5959 = vmatmul.mubr.f32.gmra.mrb[10].mxu0 %v7400_v43 }
 0x14f   :  { %5961 = vmatprep.mubr.f32.mxu0 %v9924_v10  ;;  %6566 = vmatpush3.bf16.msra.mxu0 %v9849_v1  ;;  %v9933_v1 = vld [vmem:[#allocation54_spill] sm:$0xff] }
 0x150   :  { %6568 = vmatprep.subr.bf16.mxu0 %v9925_v55 }
 0x152   :  { %5962 = vmatmul.mubr.f32.gmra.mrb[12].mxu0 %v9926_v19 }
 0x153   :  { %5964 = vmatprep.mubr.f32.mxu0 %v9927_v14  ;;  %6570 = vmatpush3.bf16.msra.mxu0 %v9925_v55 }
 0x154   :  { %6572 = vmatprep.subr.bf16.mxu0 %v9928_v53 }
 0x156   :  { %5965 = vmatmul.mubr.f32.gmra.mrb[14].mxu0 %v9929_v57 }
 0x157   :  { %5967 = vmatprep.mubr.f32.mxu0 %v9930_v37  ;;  %6574 = vmatpush3.bf16.msra.mxu0 %v9928_v53 }
 0x15a   :  { %5968 = vmatmul.mubr.f32.gmra.mrb[16].mxu0 %v9931_v32 }
 0x15b   :  { %5970 = vmatprep.mubr.f32.mxu0 %v9932_v22 }
 0x15e   :  { %5971 = vmatmul.mubr.f32.gmra.mrb[18].mxu0 %v9933_v1 }
 0x15f   :  { %5973 = vmatprep.mubr.f32.mxu0 %v9934_v16 }
 0x162   :  { %5974 = vmatmul.mubr.f32.gmra.mrb[20].mxu0 %v9935_v31 }
 0x163   :  { %5976 = vmatprep.mubr.f32.mxu0 %v9936_v13 }
 0x166   :  { %5977 = vmatmul.mubr.f32.gmra.mrb[22].mxu0 %v9937_v42 }
 0x167   :  { %5979 = vmatprep.mubr.f32.mxu0 %v9938_v47 }
 0x16a   :  { %5980 = vmatmul.mubr.f32.gmra.mrb[24].mxu0 %v9939_v35 }
 0x16b   :  { %5982 = vmatprep.mubr.f32.mxu0 %v9940_v20 }
 0x16e   :  { %5983 = vmatmul.mubr.f32.gmra.mrb[26].mxu0 %v9941_v56 }
 0x16f   :  { %5985 = vmatprep.mubr.f32.mxu0 %v9942_v18 }
 0x172   :  { %5986 = vmatmul.mubr.f32.gmra.mrb[28].mxu0 %v9943_v60 }
 0x173   :  { %5988 = vmatprep.mubr.f32.mxu0 %v9944_v62 }
 0x176   :  { %5989 = vmatmul.mubr.f32.gmra.mrb[30].mxu0 %v9945_v23 }
 0x177   :  { %6023 = vmatprep.mubr.f32.mxu0 %v7149_v17 }
 0x17a   :  { %6024 = vmatmul.mubr.f32.vlgmr.msra.gmra.mrb[0].mxu0 %v7197_v33 }
 0x17b   :  { %6026 = vmatprep.mubr.f32.mxu0 %v7223_v44  ;;  %v7994_v44 = vld [vmem:[%s9489_s3] ss:$0 sm:$0xff] }
 0x17e   :  { %6027 = vmatmul.mubr.f32.gmra.mrb[2].mxu0 %v7225_v45 }
 0x17f   :  { %6029 = vmatprep.mubr.f32.mxu0 %v7242_v52 }
 0x182   :  { %6030 = vmatmul.mubr.f32.gmra.mrb[4].mxu0 %v7261_v59 }
 0x183   :  { %6032 = vmatprep.mubr.f32.mxu0 %v7313_v11 }
 0x186   :  { %6033 = vmatmul.mubr.f32.gmra.mrb[6].mxu0 %v7315_v46 }
 0x187   :  { %6035 = vmatprep.mubr.f32.mxu0 %v7336_v5 }
 0x18a   :  { %6036 = vmatmul.mubr.f32.gmra.mrb[8].mxu0 %v7359_v28 }
 0x18b   :  { %6038 = vmatprep.mubr.f32.mxu0 %v7362_v15 }
 0x18e   :  { %6039 = vmatmul.mubr.f32.gmra.mrb[10].mxu0 %v7400_v43 }
 0x18f   :  { %6041 = vmatprep.mubr.f32.mxu0 %v9924_v10 }
 0x192   :  { %6042 = vmatmul.mubr.f32.gmra.mrb[12].mxu0 %v9926_v19 }
 0x193   :  { %6044 = vmatprep.mubr.f32.mxu0 %v9927_v14 }
 0x196   :  { %6045 = vmatmul.mubr.f32.gmra.mrb[14].mxu0 %v9929_v57 }
 0x197   :  { %6047 = vmatprep.mubr.f32.mxu0 %v9930_v37 }
 0x19a   :  { %6048 = vmatmul.mubr.f32.gmra.mrb[16].mxu0 %v9931_v32 }
 0x19b   :  { %6050 = vmatprep.mubr.f32.mxu0 %v9932_v22 }
 0x19e   :  { %6051 = vmatmul.mubr.f32.gmra.mrb[18].mxu0 %v9933_v1 }
 0x19f   :  { %6053 = vmatprep.mubr.f32.mxu0 %v9934_v16 }
 0x1a2   :  { %6054 = vmatmul.mubr.f32.gmra.mrb[20].mxu0 %v9935_v31 }
 0x1a3   :  { %6056 = vmatprep.mubr.f32.mxu0 %v9936_v13 }
 0x1a6   :  { %6057 = vmatmul.mubr.f32.gmra.mrb[22].mxu0 %v9937_v42 }
 0x1a7   :  { %6059 = vmatprep.mubr.f32.mxu0 %v9938_v47 }
 0x1aa   :  { %6060 = vmatmul.mubr.f32.gmra.mrb[24].mxu0 %v9939_v35 }
 0x1ab   :  { %6062 = vmatprep.mubr.f32.mxu0 %v9940_v20 }
 0x1ae   :  { %6063 = vmatmul.mubr.f32.gmra.mrb[26].mxu0 %v9941_v56 }
 0x1af   :  { %6065 = vmatprep.mubr.f32.mxu0 %v9942_v18 }
 0x1b2   :  { %6066 = vmatmul.mubr.f32.gmra.mrb[28].mxu0 %v9943_v60 }
 0x1b3   :  { %6068 = vmatprep.mubr.f32.mxu0 %v9944_v62 }
 0x1b6   :  { %6069 = vmatmul.mubr.f32.gmra.mrb[30].mxu0 %v9945_v23 }
 0x24d   :  { %v6025_v17 = vpop.f32.mrb[0].mxu0 }
 0x24e   :  { %v2060_v28 = vmul.f32 2.0, %v6025_v17  ;;  %v1868_v33 = vpop.f32.mrb[1].mxu0 }
 0x24f   :  { %v2059_v45 = vmul.f32 2.0, %v1868_v33 }
 0x250   :  { %v8000_v11 = vsub.f32 %v7994_v44, %v2060_v28 }
 0x251   :  { %v6028_v52 = vpop.f32.mrb[2].mxu0  ;;  %v7997_v59 = vsub.f32 %v7994_v44, %v2059_v45 }
 0x252   :  { %v1880_v5 = vpop.f32.mrb[3].mxu0  ;;  %v2062_v46 = vmul.f32 2.0, %v6028_v52  ;;  %v2133_v54 = vsel %vm2129_vm0, %v8000_v11, inf }
 0x253   :  { %v2061_v15 = vmul.f32 2.0, %v1880_v5  ;;  %v2130_v43 = vsel %vm2129_vm0, %v7997_v59, inf }
 0x254   :  { %2131 = vmin.xlane.f32.xlu0 %v2130_v43  ;;  %v8012_v26 = vsub.f32 %v7994_v44, %v2062_v46 }
 0x255   :  { %v6031_v6 = vpop.f32.mrb[4].mxu0  ;;  %v8005_v41 = vsub.f32 %v7994_v44, %v2061_v15 }
 0x256   :  { %v1892_v50 = vpop.f32.mrb[5].mxu0  ;;  %v2064_v30 = vmul.f32 2.0, %v6031_v6  ;;  %v2139_v34 = vsel %vm2129_vm0, %v8012_v26, inf }
 0x257   :  { %v2063_v36 = vmul.f32 2.0, %v1892_v50  ;;  %v2136_v49 = vsel %vm2129_vm0, %v8005_v41, inf }
 0x258   :  { %2134 = vmin.xlane.f32.xlu0 %v2133_v54  ;;  %2137 = vmin.xlane.f32.xlu1 %v2136_v49  ;;  %v8022_v2 = vsub.f32 %v7994_v44, %v2064_v30 }
 0x259   :  { %v6034_v29 = vpop.f32.mrb[6].mxu0  ;;  %v8015_v9 = vsub.f32 %v7994_v44, %v2063_v36 }
 0x25a   :  { %v2066_v48 = vmul.f32 2.0, %v6034_v29  ;;  %v1904_v12 = vpop.f32.mrb[7].mxu0  ;;  %v2145_v0 = vsel %vm2129_vm0, %v8022_v2, inf }
 0x25b   :  { %v2065_v4 = vmul.f32 2.0, %v1904_v12  ;;  %v2142_v25 = vsel %vm2129_vm0, %v8015_v9, inf }
 0x25c   :  { %2140 = vmin.xlane.f32.xlu1 %v2139_v34  ;;  %2143 = vmin.xlane.f32.xlu0 %v2142_v25  ;;  %v8028_v24 = vsub.f32 %v7994_v44, %v2066_v48 }
 0x25d   :  { %v6037_v58 = vpop.f32.mrb[8].mxu0  ;;  %v8025_v63 = vsub.f32 %v7994_v44, %v2065_v4 }
 0x25e   :  { %v1916_v40 = vpop.f32.mrb[9].mxu0  ;;  %v2068_v27 = vmul.f32 2.0, %v6037_v58  ;;  %v2151_v3 = vsel %vm2129_vm0, %v8028_v24, inf }
 0x25f   :  { %v2067_v21 = vmul.f32 2.0, %v1916_v40  ;;  %v2148_v7 = vsel %vm2129_vm0, %v8025_v63, inf }
 0x260   :  { %2146 = vmin.xlane.f32.xlu1 %v2145_v0  ;;  %2149 = vmin.xlane.f32.xlu0 %v2148_v7  ;;  %v8042_v55 = vsub.f32 %v7994_v44, %v2068_v27 }
 0x261   :  { %v6040_v51 = vpop.f32.mrb[10].mxu0  ;;  %v8035_v61 = vsub.f32 %v7994_v44, %v2067_v21 }
 0x262   :  { %v1928_v8 = vpop.f32.mrb[11].mxu0  ;;  %v2070_v38 = vmul.f32 2.0, %v6040_v51  ;;  %v2157_v32 = vsel %vm2129_vm0, %v8042_v55, inf }
 0x263   :  { %v2069_v39 = vmul.f32 2.0, %v1928_v8  ;;  %v2154_v10 = vsel %vm2129_vm0, %v8035_v61, inf }
 0x264   :  { %2152 = vmin.xlane.f32.xlu1 %v2151_v3  ;;  %2155 = vmin.xlane.f32.xlu0 %v2154_v10  ;;  %v8052_v1 = vsub.f32 %v7994_v44, %v2070_v38 }
 0x265   :  { %v6043_v19 = vpop.f32.mrb[12].mxu0  ;;  %v8045_v14 = vsub.f32 %v7994_v44, %v2069_v39 }
 0x266   :  { %v2072_v53 = vmul.f32 2.0, %v6043_v19  ;;  %v1940_v57 = vpop.f32.mrb[13].mxu0  ;;  %v2163_v20 = vsel %vm2129_vm0, %v8052_v1, inf }
 0x267   :  { %v2071_v37 = vmul.f32 2.0, %v1940_v57  ;;  %v2160_v22 = vsel %vm2129_vm0, %v8045_v14, inf }
 0x268   :  { %2158 = vmin.xlane.f32.xlu1 %v2157_v32  ;;  %2161 = vmin.xlane.f32.xlu0 %v2160_v22  ;;  %v8058_v42 = vsub.f32 %v7994_v44, %v2072_v53 }
 0x269   :  { %v6046_v16 = vpop.f32.mrb[14].mxu0  ;;  %v8055_v31 = vsub.f32 %v7994_v44, %v2071_v37 }
 0x26a   :  { %v1952_v13 = vpop.f32.mrb[15].mxu0  ;;  %v2074_v47 = vmul.f32 2.0, %v6046_v16  ;;  %v2169_v23 = vsel %vm2129_vm0, %v8058_v42, inf }
 0x26b   :  { %v2073_v35 = vmul.f32 2.0, %v1952_v13  ;;  %v2166_v56 = vsel %vm2129_vm0, %v8055_v31, inf }
 0x26c   :  { %2164 = vmin.xlane.f32.xlu1 %v2163_v20  ;;  %2167 = vmin.xlane.f32.xlu0 %v2166_v56  ;;  %v8072_v45 = vsub.f32 %v7994_v44, %v2074_v47 }
 0x26d   :  { %v6049_v18 = vpop.f32.mrb[16].mxu0  ;;  %v8065_v60 = vsub.f32 %v7994_v44, %v2073_v35 }
 0x26e   :  { %v1964_v62 = vpop.f32.mrb[17].mxu0  ;;  %v2076_v17 = vmul.f32 2.0, %v6049_v18  ;;  %v2175_v6 = vsel %vm2129_vm0, %v8072_v45, inf }
 0x26f   :  { %v2075_v28 = vmul.f32 2.0, %v1964_v62  ;;  %v2172_v33 = vsel %vm2129_vm0, %v8065_v60, inf }
 0x270   :  { %2170 = vmin.xlane.f32.xlu1 %v2169_v23  ;;  %2173 = vmin.xlane.f32.xlu0 %v2172_v33  ;;  %v8082_v54 = vsub.f32 %v7994_v44, %v2076_v17 }
 0x271   :  { %v6052_v52 = vpop.f32.mrb[18].mxu0  ;;  %v8075_v5 = vsub.f32 %v7994_v44, %v2075_v28 }
 0x272   :  { %v2078_v46 = vmul.f32 2.0, %v6052_v52  ;;  %v1976_v15 = vpop.f32.mrb[19].mxu0  ;;  %v2181_v4 = vsel %vm2129_vm0, %v8082_v54, inf }
 0x273   :  { %v2077_v43 = vmul.f32 2.0, %v1976_v15  ;;  %v2178_v50 = vsel %vm2129_vm0, %v8075_v5, inf }
 0x274   :  { %2176 = vmin.xlane.f32.xlu1 %v2175_v6  ;;  %2179 = vmin.xlane.f32.xlu0 %v2178_v50  ;;  %v8088_v29 = vsub.f32 %v7994_v44, %v2078_v46 }
 0x275   :  { %v6055_v30 = vpop.f32.mrb[20].mxu0  ;;  %v8085_v36 = vsub.f32 %v7994_v44, %v2077_v43 }
 0x276   :  { %v1988_v49 = vpop.f32.mrb[21].mxu0  ;;  %v2080_v48 = vmul.f32 2.0, %v6055_v30  ;;  %v2187_v27 = vsel %vm2129_vm0, %v8088_v29, inf }
 0x277   :  { %v2079_v12 = vmul.f32 2.0, %v1988_v49  ;;  %v2184_v34 = vsel %vm2129_vm0, %v8085_v36, inf }
 0x278   :  { %2182 = vmin.xlane.f32.xlu1 %v2181_v4  ;;  %2185 = vmin.xlane.f32.xlu0 %v2184_v34  ;;  %v8102_v51 = vsub.f32 %v7994_v44, %v2080_v48 }
 0x279   :  { %v6058_v25 = vpop.f32.mrb[22].mxu0  ;;  %v8095_v58 = vsub.f32 %v7994_v44, %v2079_v12 }
 0x27a   :  { %v2000_v40 = vpop.f32.mrb[23].mxu0  ;;  %v2082_v21 = vmul.f32 2.0, %v6058_v25  ;;  %v2193_v19 = vsel %vm2129_vm0, %v8102_v51, inf }
 0x27b   :  { %v2081_v0 = vmul.f32 2.0, %v2000_v40  ;;  %v2190_v7 = vsel %vm2129_vm0, %v8095_v58, inf }
 0x27c   :  { %2188 = vmin.xlane.f32.xlu1 %v2187_v27  ;;  %2191 = vmin.xlane.f32.xlu0 %v2190_v7  ;;  %v8112_v57 = vsub.f32 %v7994_v44, %v2082_v21  ;;  %v2226_v27 = vlaneseq }
 0x27d   :  { %v6061_v8 = vpop.f32.mrb[24].mxu0  ;;  %v8105_v3 = vsub.f32 %v7994_v44, %v2081_v0 }
 0x27e   :  { %v2084_v38 = vmul.f32 2.0, %v6061_v8  ;;  %v2012_v39 = vpop.f32.mrb[25].mxu0  ;;  %v2199_v35 = vsel %vm2129_vm0, %v8112_v57, inf  ;;  %v8156_v21 = vand.u32 127, %v2226_v27 }
 0x27f   :  { %v2083_v10 = vmul.f32 2.0, %v2012_v39  ;;  %v2196_v53 = vsel %vm2129_vm0, %v8105_v3, inf }
 0x280   :  { %2194 = vmin.xlane.f32.xlu1 %v2193_v19  ;;  %2197 = vmin.xlane.f32.xlu0 %v2196_v53  ;;  %v8118_v16 = vsub.f32 %v7994_v44, %v2084_v38  ;;  %9946 = vst [vmem:[#allocation14_spill] sm:$0xff] %v8156_v21 }
 0x281   :  { %v6064_v37 = vpop.f32.mrb[26].mxu0  ;;  %v8115_v32 = vsub.f32 %v7994_v44, %v2083_v10 }
 0x282   :  { %v2024_v22 = vpop.f32.mrb[27].mxu0  ;;  %v2086_v13 = vmul.f32 2.0, %v6064_v37  ;;  %v2205_v23 = vsel %vm2129_vm0, %v8118_v16, inf }
 0x283   :  { %v2085_v47 = vmul.f32 2.0, %v2024_v22  ;;  %v2202_v20 = vsel %vm2129_vm0, %v8115_v32, inf }
 0x284   :  { %2200 = vmin.xlane.f32.xlu1 %v2199_v35  ;;  %2203 = vmin.xlane.f32.xlu0 %v2202_v20  ;;  %v8132_v52 = vsub.f32 %v7994_v44, %v2086_v13 }
 0x285   :  { %v6067_v56 = vpop.f32.mrb[28].mxu0  ;;  %v8125_v18 = vsub.f32 %v7994_v44, %v2085_v47 }
 0x286   :  { %v2036_v62 = vpop.f32.mrb[29].mxu0  ;;  %v2088_v17 = vmul.f32 2.0, %v6067_v56  ;;  %v2211_v30 = vsel %vm2129_vm0, %v8132_v52, inf }
 0x287   :  { %v2087_v28 = vmul.f32 2.0, %v2036_v62  ;;  %v2208_v33 = vsel %vm2129_vm0, %v8125_v18, inf }
 0x288   :  { %2206 = vmin.xlane.f32.xlu1 %v2205_v23  ;;  %2209 = vmin.xlane.f32.xlu0 %v2208_v33  ;;  %v8142_v48 = vsub.f32 %v7994_v44, %v2088_v17 }
 0x289   :  { %v6070_v46 = vpop.f32.mrb[30].mxu0  ;;  %v8135_v15 = vsub.f32 %v7994_v44, %v2087_v28 }
 0x28a   :  { %v2090_v43 = vmul.f32 2.0, %v6070_v46  ;;  %v2048_v6 = vpop.f32.mrb[31].mxu0  ;;  %v2217_v34 = vsel %vm2129_vm0, %v8142_v48, inf }
 0x28b   :  { %v2089_v50 = vmul.f32 2.0, %v2048_v6  ;;  %v2214_v49 = vsel %vm2129_vm0, %v8135_v15, inf }
 0x28c   :  { %2212 = vmin.xlane.f32.xlu1 %v2211_v30  ;;  %2215 = vmin.xlane.f32.xlu0 %v2214_v49  ;;  %v8145_v12 = vsub.f32 %v7994_v44, %v2090_v43 }
 0x28d   :  { %v8148_v4 = vsub.f32 %v7994_v44, %v2089_v50 }
 0x28e   :  { %v2223_v40 = vsel %vm2129_vm0, %v8145_v12, inf }
 0x28f   :  { %v2220_v25 = vsel %vm2129_vm0, %v8148_v4, inf }
 0x290   :  { %2218 = vmin.xlane.f32.xlu1 %v2217_v34  ;;  %2221 = vmin.xlane.f32.xlu0 %v2220_v25 }
 0x294   :  { %2224 = vmin.xlane.f32.xlu1 %v2223_v40 }
 0x2e1   :  { %v2132_v0 = vpop.xlane.xlu0 %2131 }
 0x2e2   :  { %vm2228_vm1 = vcmp.eq.f32.partialorder %v7997_v59, %v2132_v0 }
 0x2e3   :  { %v2260_v44 = vsel %vm2228_vm1, %v8156_v21, 16 }
 0x2e4   :  { %v8161_v7 = vsel %vm2129_vm0, %v2260_v44, 2147483647 }
 0x2e5   :  { %v2135_v8 = vpop.xlane.xlu0 %2134  ;;  %v2138_v38 = vpop.xlane.xlu1 %2137  ;;  %v2294_v39 = vshra.s32 %v8161_v7, 16 }
 0x2e6   :  { %vm2229_vm2 = vcmp.eq.f32.partialorder %v8000_v11, %v2135_v8  ;;  %vm2230_vm3 = vcmp.eq.f32.partialorder %v8005_v41, %v2138_v38 }
 0x2e7   :  { %v2261_v10 = vsel %vm2229_vm2, %v8156_v21, 16  ;;  %v2262_v19 = vsel %vm2230_vm3, %v8156_v21, 16  ;;  %v8168_v53 = vcvt.s32.f32 %v2294_v39 }
 0x2e8   :  { %v8171_v59 = vsel %vm2129_vm0, %v2261_v10, 2147483647  ;;  %v8174_v37 = vsel %vm2129_vm0, %v2262_v19, 2147483647 }
 0x2e9   :  { %v2141_v22 = vpop.xlane.xlu1 %2140  ;;  %v2144_v13 = vpop.xlane.xlu0 %2143  ;;  %2297 = vmin.xlane.f32.xlu0 %v8168_v53  ;;  %v2309_v11 = vshra.s32 %v8171_v59, 16  ;;  %v2324_v41 = vshra.s32 %v8174_v37, 16 }
 0x2ea   :  { %vm2231_vm4 = vcmp.eq.f32.partialorder %v8012_v26, %v2141_v22  ;;  %vm2232_vm5 = vcmp.eq.f32.partialorder %v8015_v9, %v2144_v13 }
 0x2eb   :  { %v2263_v47 = vsel %vm2231_vm4, %v8156_v21, 16  ;;  %v2264_v35 = vsel %vm2232_vm5, %v8156_v21, 16  ;;  %v8183_v20 = vcvt.s32.f32 %v2309_v11  ;;  %v8185_v56 = vcvt.s32.f32 %v2324_v41 }
 0x2ec   :  { %v8188_v62 = vsel %vm2129_vm0, %v2263_v47, 2147483647  ;;  %v8191_v23 = vsel %vm2129_vm0, %v2264_v35, 2147483647 }
 0x2ed   :  { %v2147_v17 = vpop.xlane.xlu1 %2146  ;;  %v2150_v28 = vpop.xlane.xlu0 %2149  ;;  %2312 = vmin.xlane.f32.xlu1 %v8183_v20  ;;  %2327 = vmin.xlane.f32.xlu0 %v8185_v56  ;;  %v2339_v26 = vshra.s32 %v8188_v62, 16  ;;  %v2354_v9 = vshra.s32 %v8191_v23, 16 }
 0x2ee   :  { %vm2233_vm6 = vcmp.eq.f32.partialorder %v8022_v2, %v2147_v17  ;;  %vm2234_vm7 = vcmp.eq.f32.partialorder %v8025_v63, %v2150_v28 }
 0x2ef   :  { %v2265_v33 = vsel %vm2233_vm6, %v8156_v21, 16  ;;  %v2266_v46 = vsel %vm2234_vm7, %v8156_v21, 16  ;;  %v8201_v43 = vcvt.s32.f32 %v2339_v26  ;;  %v8203_v6 = vcvt.s32.f32 %v2354_v9 }
 0x2f0   :  { %v8206_v50 = vsel %vm2129_vm0, %v2265_v33, 2147483647  ;;  %v8209_v30 = vsel %vm2129_vm0, %v2266_v46, 2147483647 }
 0x2f1   :  { %v2153_v49 = vpop.xlane.xlu1 %2152  ;;  %v2156_v34 = vpop.xlane.xlu0 %2155  ;;  %2342 = vmin.xlane.f32.xlu1 %v8201_v43  ;;  %2357 = vmin.xlane.f32.xlu0 %v8203_v6  ;;  %v2369_v2 = vshra.s32 %v8206_v50, 16  ;;  %v2384_v63 = vshra.s32 %v8209_v30, 16 }
 0x2f2   :  { %vm2235_vm8 = vcmp.eq.f32.partialorder %v8028_v24, %v2153_v49  ;;  %vm2236_vm9 = vcmp.eq.f32.partialorder %v8035_v61, %v2156_v34 }
 0x2f3   :  { %v2267_v25 = vsel %vm2235_vm8, %v8156_v21, 16  ;;  %v2268_v40 = vsel %vm2236_vm9, %v8156_v21, 16  ;;  %v8219_v27 = vcvt.s32.f32 %v2369_v2  ;;  %v8221_v0 = vcvt.s32.f32 %v2384_v63 }
 0x2f4   :  { %v8224_v44 = vsel %vm2129_vm0, %v2267_v25, 2147483647  ;;  %v8227_v8 = vsel %vm2129_vm0, %v2268_v40, 2147483647 }
 0x2f5   :  { %v2159_v38 = vpop.xlane.xlu1 %2158  ;;  %v2162_v39 = vpop.xlane.xlu0 %2161  ;;  %2372 = vmin.xlane.f32.xlu1 %v8219_v27  ;;  %2387 = vmin.xlane.f32.xlu0 %v8221_v0  ;;  %v2399_v24 = vshra.s32 %v8224_v44, 16  ;;  %v2414_v61 = vshra.s32 %v8227_v8, 16 }
 0x2f6   :  { %vm2237_vm10 = vcmp.eq.f32.partialorder %v8042_v55, %v2159_v38  ;;  %vm2238_vm11 = vcmp.eq.f32.partialorder %v8045_v14, %v2162_v39 }
 0x2f7   :  { %v2269_v10 = vsel %vm2237_vm10, %v8156_v21, 16  ;;  %v2270_v19 = vsel %vm2238_vm11, %v8156_v21, 16  ;;  %v8237_v22 = vcvt.s32.f32 %v2399_v24  ;;  %v8239_v13 = vcvt.s32.f32 %v2414_v61 }
 0x2f8   :  { %v8242_v11 = vsel %vm2129_vm0, %v2269_v10, 2147483647  ;;  %v8245_v41 = vsel %vm2129_vm0, %v2270_v19, 2147483647 }
 0x2f9   :  { %v2165_v47 = vpop.xlane.xlu1 %2164  ;;  %v2168_v35 = vpop.xlane.xlu0 %2167  ;;  %2402 = vmin.xlane.f32.xlu1 %v8237_v22  ;;  %2417 = vmin.xlane.f32.xlu0 %v8239_v13  ;;  %v2429_v55 = vshra.s32 %v8242_v11, 16  ;;  %v2444_v14 = vshra.s32 %v8245_v41, 16 }
 0x2fa   :  { %vm2239_vm12 = vcmp.eq.f32.partialorder %v8052_v1, %v2165_v47  ;;  %vm2240_vm13 = vcmp.eq.f32.partialorder %v8055_v31, %v2168_v35 }
 0x2fb   :  { %v2271_v17 = vsel %vm2239_vm12, %v8156_v21, 16  ;;  %v2272_v28 = vsel %vm2240_vm13, %v8156_v21, 16  ;;  %v8255_v26 = vcvt.s32.f32 %v2429_v55  ;;  %v8257_v9 = vcvt.s32.f32 %v2444_v14 }
 0x2fc   :  { %v8260_v33 = vsel %vm2129_vm0, %v2271_v17, 2147483647  ;;  %v8263_v46 = vsel %vm2129_vm0, %v2272_v28, 2147483647 }
 0x2fd   :  { %v2171_v49 = vpop.xlane.xlu1 %2170  ;;  %v2174_v34 = vpop.xlane.xlu0 %2173  ;;  %2432 = vmin.xlane.f32.xlu1 %v8255_v26  ;;  %2447 = vmin.xlane.f32.xlu0 %v8257_v9  ;;  %v2459_v1 = vshra.s32 %v8260_v33, 16  ;;  %v2474_v31 = vshra.s32 %v8263_v46, 16 }
 0x2fe   :  { %vm2241_vm14 = vcmp.eq.f32.partialorder %v8058_v42, %v2171_v49  ;;  %vm2242_vm15 = vcmp.eq.f32.partialorder %v8065_v60, %v2174_v34 }
 0x2ff   :  { %v2273_v2 = vsel %vm2241_vm14, %v8156_v21, 16  ;;  %v2274_v63 = vsel %vm2242_vm15, %v8156_v21, 16  ;;  %v8273_v25 = vcvt.s32.f32 %v2459_v1  ;;  %v8275_v40 = vcvt.s32.f32 %v2474_v31 }
 0x300   :  { %v8278_v38 = vsel %vm2129_vm0, %v2273_v2, 2147483647  ;;  %v8281_v39 = vsel %vm2129_vm0, %v2274_v63, 2147483647 }
 0x301   :  { %v2177_v24 = vpop.xlane.xlu1 %2176  ;;  %v2180_v61 = vpop.xlane.xlu0 %2179  ;;  %2462 = vmin.xlane.f32.xlu1 %v8273_v25  ;;  %2477 = vmin.xlane.f32.xlu0 %v8275_v40  ;;  %v2489_v42 = vshra.s32 %v8278_v38, 16  ;;  %v2504_v60 = vshra.s32 %v8281_v39, 16 }
 0x302   :  { %vm2243_vm1 = vcmp.eq.f32.partialorder %v8072_v45, %v2177_v24  ;;  %vm2244_vm2 = vcmp.eq.f32.partialorder %v8075_v5, %v2180_v61 }
 0x303   :  { %v2275_v10 = vsel %vm2243_vm1, %v8156_v21, 16  ;;  %v2276_v19 = vsel %vm2244_vm2, %v8156_v21, 16  ;;  %v8291_v47 = vcvt.s32.f32 %v2489_v42  ;;  %v8293_v35 = vcvt.s32.f32 %v2504_v60 }
 0x304   :  { %v8296_v55 = vsel %vm2129_vm0, %v2275_v10, 2147483647  ;;  %v8299_v14 = vsel %vm2129_vm0, %v2276_v19, 2147483647 }
 0x305   :  { %v2183_v17 = vpop.xlane.xlu1 %2182  ;;  %v2186_v28 = vpop.xlane.xlu0 %2185  ;;  %2492 = vmin.xlane.f32.xlu1 %v8291_v47  ;;  %2507 = vmin.xlane.f32.xlu0 %v8293_v35  ;;  %v2519_v45 = vshra.s32 %v8296_v55, 16  ;;  %v2534_v5 = vshra.s32 %v8299_v14, 16 }
 0x306   :  { %vm2245_vm3 = vcmp.eq.f32.partialorder %v8082_v54, %v2183_v17  ;;  %vm2246_vm4 = vcmp.eq.f32.partialorder %v8085_v36, %v2186_v28 }
 0x307   :  { %v2277_v49 = vsel %vm2245_vm3, %v8156_v21, 16  ;;  %v2278_v34 = vsel %vm2246_vm4, %v8156_v21, 16  ;;  %v8309_v1 = vcvt.s32.f32 %v2519_v45  ;;  %v8311_v31 = vcvt.s32.f32 %v2534_v5 }
 0x308   :  { %v8314_v2 = vsel %vm2129_vm0, %v2277_v49, 2147483647  ;;  %v8317_v63 = vsel %vm2129_vm0, %v2278_v34, 2147483647 }
 0x309   :  { %v2189_v24 = vpop.xlane.xlu1 %2188  ;;  %v2192_v61 = vpop.xlane.xlu0 %2191  ;;  %2522 = vmin.xlane.f32.xlu1 %v8309_v1  ;;  %2537 = vmin.xlane.f32.xlu0 %v8311_v31  ;;  %v2549_v54 = vshra.s32 %v8314_v2, 16  ;;  %v2564_v36 = vshra.s32 %v8317_v63, 16 }
 0x30a   :  { %vm2247_vm5 = vcmp.eq.f32.partialorder %v8088_v29, %v2189_v24  ;;  %vm2248_vm6 = vcmp.eq.f32.partialorder %v8095_v58, %v2192_v61 }
 0x30b   :  { %v2279_v42 = vsel %vm2247_vm5, %v8156_v21, 16  ;;  %v2280_v60 = vsel %vm2248_vm6, %v8156_v21, 16  ;;  %v8327_v10 = vcvt.s32.f32 %v2549_v54  ;;  %v8329_v19 = vcvt.s32.f32 %v2564_v36 }
 0x30c   :  { %v8332_v17 = vsel %vm2129_vm0, %v2279_v42, 2147483647  ;;  %v8335_v28 = vsel %vm2129_vm0, %v2280_v60, 2147483647 }
 0x30d   :  { %v2195_v45 = vpop.xlane.xlu1 %2194  ;;  %v2198_v5 = vpop.xlane.xlu0 %2197  ;;  %2552 = vmin.xlane.f32.xlu1 %v8327_v10  ;;  %2567 = vmin.xlane.f32.xlu0 %v8329_v19  ;;  %v2579_v29 = vshra.s32 %v8332_v17, 16  ;;  %v2594_v58 = vshra.s32 %v8335_v28, 16 }
 0x30e   :  { %vm2249_vm7 = vcmp.eq.f32.partialorder %v8102_v51, %v2195_v45  ;;  %vm2250_vm8 = vcmp.eq.f32.partialorder %v8105_v3, %v2198_v5 }
 0x30f   :  { %v2281_v49 = vsel %vm2249_vm7, %v8156_v21, 16  ;;  %v2282_v34 = vsel %vm2250_vm8, %v8156_v21, 16  ;;  %v8345_v24 = vcvt.s32.f32 %v2579_v29  ;;  %v8347_v61 = vcvt.s32.f32 %v2594_v58 }
 0x310   :  { %v8350_v54 = vsel %vm2129_vm0, %v2281_v49, 2147483647  ;;  %v8353_v36 = vsel %vm2129_vm0, %v2282_v34, 2147483647 }
 0x311   :  { %9947 = vst [vmem:[#allocation17_spill] sm:$0xff] %v8345_v24  ;;  %9948 = vst [vmem:[#allocation21_spill] sm:$0xff] %v8347_v61  ;;  %v2201_v42 = vpop.xlane.xlu1 %2200  ;;  %v2204_v60 = vpop.xlane.xlu0 %2203  ;;  %2582 = vmin.xlane.f32.xlu1 %v8345_v24  ;;  %2597 = vmin.xlane.f32.xlu0 %v8347_v61  ;;  %v2609_v51 = vshra.s32 %v8350_v54, 16  ;;  %v2624_v3 = vshra.s32 %v8353_v36, 16 }
 0x312   :  { %vm2251_vm9 = vcmp.eq.f32.partialorder %v8112_v57, %v2201_v42  ;;  %vm2252_vm10 = vcmp.eq.f32.partialorder %v8115_v32, %v2204_v60 }
 0x313   :  { %v2283_v45 = vsel %vm2251_vm9, %v8156_v21, 16  ;;  %v2284_v5 = vsel %vm2252_vm10, %v8156_v21, 16  ;;  %v8363_v29 = vcvt.s32.f32 %v2609_v51  ;;  %v8365_v58 = vcvt.s32.f32 %v2624_v3 }
 0x314   :  { %v8368_v49 = vsel %vm2129_vm0, %v2283_v45, 2147483647  ;;  %v8371_v34 = vsel %vm2129_vm0, %v2284_v5, 2147483647 }
 0x315   :  { %9949 = vst [vmem:[#allocation12_spill] sm:$0xff] %v8363_v29  ;;  %9950 = vst [vmem:[#allocation22_spill] sm:$0xff] %v8365_v58  ;;  %v2207_v61 = vpop.xlane.xlu1 %2206  ;;  %v2210_v24 = vpop.xlane.xlu0 %2209  ;;  %2612 = vmin.xlane.f32.xlu1 %v8363_v29  ;;  %2627 = vmin.xlane.f32.xlu0 %v8365_v58  ;;  %v2639_v57 = vshra.s32 %v8368_v49, 16  ;;  %v2654_v32 = vshra.s32 %v8371_v34, 16 }
 0x316   :  { %vm2253_vm11 = vcmp.eq.f32.partialorder %v8118_v16, %v2207_v61  ;;  %vm2254_vm12 = vcmp.eq.f32.partialorder %v8125_v18, %v2210_v24 }
 0x317   :  { %v2285_v42 = vsel %vm2253_vm11, %v8156_v21, 16  ;;  %v2286_v60 = vsel %vm2254_vm12, %v8156_v21, 16  ;;  %v8381_v51 = vcvt.s32.f32 %v2639_v57  ;;  %v8383_v3 = vcvt.s32.f32 %v2654_v32 }
 0x318   :  { %v8386_v45 = vsel %vm2129_vm0, %v2285_v42, 2147483647  ;;  %v8389_v5 = vsel %vm2129_vm0, %v2286_v60, 2147483647 }
 0x319   :  { %9951 = vst [vmem:[#allocation24_spill] sm:$0xff] %v8383_v3  ;;  %v2213_v58 = vpop.xlane.xlu1 %2212  ;;  %v2216_v29 = vpop.xlane.xlu0 %2215  ;;  %2642 = vmin.xlane.f32.xlu1 %v8381_v51  ;;  %2657 = vmin.xlane.f32.xlu0 %v8383_v3  ;;  %v2669_v16 = vshra.s32 %v8386_v45, 16  ;;  %v2684_v18 = vshra.s32 %v8389_v5, 16 }
 0x31a   :  { %vm2255_vm13 = vcmp.eq.f32.partialorder %v8132_v52, %v2213_v58  ;;  %vm2256_vm14 = vcmp.eq.f32.partialorder %v8135_v15, %v2216_v29 }
 0x31b   :  { %v2287_v24 = vsel %vm2255_vm13, %v8156_v21, 16  ;;  %v2288_v61 = vsel %vm2256_vm14, %v8156_v21, 16  ;;  %v8399_v57 = vcvt.s32.f32 %v2669_v16  ;;  %v8401_v32 = vcvt.s32.f32 %v2684_v18 }
 0x31c   :  { %v8404_v42 = vsel %vm2129_vm0, %v2287_v24, 2147483647  ;;  %v8407_v60 = vsel %vm2129_vm0, %v2288_v61, 2147483647 }
 0x31d   :  { %9952 = vst [vmem:[#allocation13_spill] sm:$0xff] %v8399_v57  ;;  %9953 = vst [vmem:[#allocation25_spill] sm:$0xff] %v8401_v32  ;;  %v2219_v3 = vpop.xlane.xlu1 %2218  ;;  %2672 = vmin.xlane.f32.xlu1 %v8399_v57  ;;  %2687 = vmin.xlane.f32.xlu0 %v8401_v32  ;;  %v2222_v52 = vpop.xlane.xlu0 %2221  ;;  %v2699_v15 = vshra.s32 %v8404_v42, 16  ;;  %v2714_v29 = vshra.s32 %v8407_v60, 16 }
 0x31e   :  { %vm2257_vm15 = vcmp.eq.f32.partialorder %v8142_v48, %v2219_v3  ;;  %vm2258_vm1 = vcmp.eq.f32.partialorder %v8148_v4, %v2222_v52 }
 0x31f   :  { %v2289_v58 = vsel %vm2257_vm15, %v8156_v21, 16  ;;  %v2290_v16 = vsel %vm2258_vm1, %v8156_v21, 16  ;;  %v8417_v18 = vcvt.s32.f32 %v2699_v15  ;;  %v8419_v24 = vcvt.s32.f32 %v2714_v29 }
 0x320   :  { %v8422_v61 = vsel %vm2129_vm0, %v2289_v58, 2147483647  ;;  %v8425_v32 = vsel %vm2129_vm0, %v2290_v16, 2147483647 }
 0x321   :  { %2702 = vmin.xlane.f32.xlu1 %v8417_v18  ;;  %v2225_v57 = vpop.xlane.xlu1 %2224  ;;  %2717 = vmin.xlane.f32.xlu0 %v8419_v24  ;;  %v2729_v48 = vshra.s32 %v8422_v61, 16  ;;  %v2744_v4 = vshra.s32 %v8425_v32, 16 }
 0x322   :  { %vm2259_vm2 = vcmp.eq.f32.partialorder %v8145_v12, %v2225_v57  ;;  %v2293_v12 = vand.u32 65535, %v8161_v7  ;;  %v2338_v7 = vand.u32 65535, %v8188_v62  ;;  %v2368_v62 = vand.u32 65535, %v8206_v50 }
 0x323   :  { %v2291_v3 = vsel %vm2259_vm2, %v8156_v21, 16  ;;  %v8433_v52 = vcvt.s32.f32 %v2729_v48  ;;  %v8435_v15 = vcvt.s32.f32 %v2744_v4  ;;  %v2308_v4 = vand.u32 65535, %v8171_v59 }
 0x324   :  { %v8438_v29 = vsel %vm2129_vm0, %v2291_v3, 2147483647  ;;  %v2295_v48 = vcvt.s32.f32 %v2293_v12  ;;  %v2323_v3 = vand.u32 65535, %v8174_v37  ;;  %v2340_v12 = vcvt.s32.f32 %v2338_v7 }
 0x325   :  { %9954 = vst [vmem:[#allocation31_spill] sm:$0xff] %v8433_v52  ;;  %9955 = vst [vmem:[#allocation15_spill] sm:$0xff] %v8435_v15  ;;  %2732 = vmin.xlane.f32.xlu1 %v8433_v52  ;;  %2747 = vmin.xlane.f32.xlu0 %v8435_v15  ;;  %v2759_v58 = vshra.s32 %v8438_v29, 16  ;;  %v2310_v52 = vcvt.s32.f32 %v2308_v4  ;;  %v2370_v4 = vcvt.s32.f32 %v2368_v62  ;;  %v2398_v50 = vand.u32 65535, %v8224_v44 }
 0x326   :  { %9956 = vst [vmem:[#allocation32_spill] sm:$0xff] %v8438_v29  ;;  %v2353_v29 = vand.u32 65535, %v8191_v23  ;;  %v2383_v23 = vand.u32 65535, %v8209_v30  ;;  %v2413_v30 = vand.u32 65535, %v8227_v8  ;;  %v2428_v44 = vand.u32 65535, %v8242_v11 }
 0x327   :  { %v8443_v16 = vcvt.s32.f32 %v2759_v58  ;;  %v2443_v8 = vand.u32 65535, %v8245_v41  ;;  %v2458_v11 = vand.u32 65535, %v8260_v33  ;;  %v2473_v41 = vand.u32 65535, %v8263_v46 }
 0x328   :  { %v2430_v62 = vcvt.s32.f32 %v2428_v44  ;;  %v2488_v33 = vand.u32 65535, %v8278_v38  ;;  %v2503_v46 = vand.u32 65535, %v8281_v39  ;;  %v2533_v39 = vand.u32 65535, %v8299_v14 }
 0x329   :  { %9957 = vst [vmem:[#allocation33_spill] sm:$0xff] %v8443_v16  ;;  %2762 = vmin.xlane.f32.xlu1 %v8443_v16  ;;  %v2325_v16 = vcvt.s32.f32 %v2323_v3 }
 0x32a   :  { %v2505_v38 = vcvt.s32.f32 %v2503_v46 }
 0x376   :  { %v8447_v57 = vpop.xlane.xlu0 %2297 }
 0x377   :  { %vm2299_vm3 = vcmp.eq.f32.partialorder %v8168_v53, %v8447_v57 }
 0x378   :  { %v2300_v21 = vsel %vm2299_vm3, %v2295_v48, inf  ;;  %v2355_v48 = vcvt.s32.f32 %v2353_v29  ;;  %v2385_v29 = vcvt.s32.f32 %v2383_v23  ;;  %v2445_v23 = vcvt.s32.f32 %v2443_v8 }
 0x379   :  { %2301 = vmin.xlane.f32.xlu0 %v2300_v21 }
 0x37a   :  { %v8453_v15 = vpop.xlane.xlu1 %2312  ;;  %v8455_v58 = vpop.xlane.xlu0 %2327 }
 0x37b   :  { %vm2314_vm4 = vcmp.eq.f32.partialorder %v8183_v20, %v8453_v15  ;;  %vm2329_vm5 = vcmp.eq.f32.partialorder %v8185_v56, %v8455_v58 }
 0x37c   :  { %v2315_v59 = vsel %vm2314_vm4, %v2310_v52, inf  ;;  %v2330_v53 = vsel %vm2329_vm5, %v2325_v16, inf }
 0x37d   :  { %2316 = vmin.xlane.f32.xlu1 %v2315_v59  ;;  %2331 = vmin.xlane.f32.xlu0 %v2330_v53  ;;  %v2400_v59 = vcvt.s32.f32 %v2398_v50  ;;  %v2415_v53 = vcvt.s32.f32 %v2413_v30  ;;  %v2518_v50 = vand.u32 65535, %v8296_v55 }
 0x37e   :  { %v8463_v21 = vpop.xlane.xlu1 %2342  ;;  %v8465_v37 = vpop.xlane.xlu0 %2357 }
 0x37f   :  { %vm2344_vm6 = vcmp.eq.f32.partialorder %v8201_v43, %v8463_v21  ;;  %vm2359_vm7 = vcmp.eq.f32.partialorder %v8203_v6, %v8465_v37  ;;  %v2520_v14 = vcvt.s32.f32 %v2518_v50 }
 0x380   :  { %v2345_v20 = vsel %vm2344_vm6, %v2340_v12, inf  ;;  %v2360_v56 = vsel %vm2359_vm7, %v2355_v48, inf }
 0x381   :  { %2346 = vmin.xlane.f32.xlu1 %v2345_v20  ;;  %2361 = vmin.xlane.f32.xlu0 %v2360_v56 }
 0x382   :  { %v8473_v52 = vpop.xlane.xlu1 %2372  ;;  %v8475_v16 = vpop.xlane.xlu0 %2387 }
 0x383   :  { %vm2374_vm8 = vcmp.eq.f32.partialorder %v8219_v27, %v8473_v52  ;;  %vm2389_vm9 = vcmp.eq.f32.partialorder %v8221_v0, %v8475_v16 }
 0x384   :  { %v2375_v43 = vsel %vm2374_vm8, %v2370_v4, inf  ;;  %v2390_v6 = vsel %vm2389_vm9, %v2385_v29, inf  ;;  %v2460_v4 = vcvt.s32.f32 %v2458_v11  ;;  %v2475_v29 = vcvt.s32.f32 %v2473_v41 }
 0x385   :  { %2376 = vmin.xlane.f32.xlu1 %v2375_v43  ;;  %2391 = vmin.xlane.f32.xlu0 %v2390_v6  ;;  %v2490_v6 = vcvt.s32.f32 %v2488_v33 }
 0x386   :  { %v8483_v3 = vpop.xlane.xlu1 %2402  ;;  %v8485_v7 = vpop.xlane.xlu0 %2417 }
 0x387   :  { %vm2404_vm10 = vcmp.eq.f32.partialorder %v8237_v22, %v8483_v3  ;;  %vm2419_vm11 = vcmp.eq.f32.partialorder %v8239_v13, %v8485_v7 }
 0x388   :  { %v2405_v27 = vsel %vm2404_vm10, %v2400_v59, inf  ;;  %v2420_v0 = vsel %vm2419_vm11, %v2415_v53, inf }
 0x389   :  { %2406 = vmin.xlane.f32.xlu1 %v2405_v27  ;;  %2421 = vmin.xlane.f32.xlu0 %v2420_v0  ;;  %v2535_v0 = vcvt.s32.f32 %v2533_v39 }
 0x38a   :  { %v8493_v12 = vpop.xlane.xlu1 %2432  ;;  %v8495_v48 = vpop.xlane.xlu0 %2447 }
 0x38b   :  { %vm2434_vm12 = vcmp.eq.f32.partialorder %v8255_v26, %v8493_v12  ;;  %vm2449_vm13 = vcmp.eq.f32.partialorder %v8257_v9, %v8495_v48 }
 0x38c   :  { %v2435_v22 = vsel %vm2434_vm12, %v2430_v62, inf  ;;  %v2450_v13 = vsel %vm2449_vm13, %v2445_v23, inf  ;;  %v2548_v62 = vand.u32 65535, %v8314_v2  ;;  %v2563_v23 = vand.u32 65535, %v8317_v63 }
 0x38d   :  { %2436 = vmin.xlane.f32.xlu1 %v2435_v22  ;;  %2451 = vmin.xlane.f32.xlu0 %v2450_v13  ;;  %v2578_v13 = vand.u32 65535, %v8332_v17  ;;  %v2608_v17 = vand.u32 65535, %v8350_v54 }
 0x38e   :  { %v8503_v20 = vpop.xlane.xlu1 %2462  ;;  %v8505_v56 = vpop.xlane.xlu0 %2477  ;;  %v2550_v2 = vcvt.s32.f32 %v2548_v62  ;;  %v2565_v63 = vcvt.s32.f32 %v2563_v23  ;;  %v9960_v23 = vld [vmem:[#allocation12_spill] sm:$0xff] }
 0x38f   :  { %vm2464_vm14 = vcmp.eq.f32.partialorder %v8273_v25, %v8503_v20  ;;  %vm2479_vm15 = vcmp.eq.f32.partialorder %v8275_v40, %v8505_v56  ;;  %v2868_v25 = vld [vmem:[%s9488_s2] sm:$0xff]  ;;  %v2869_v40 = vld [vmem:[%s9488_s2 + $0x8] sm:$0xff]  ;;  %s7056_s2 = smov [#allocation5]  }
 0x390   :  { %v2465_v26 = vsel %vm2464_vm14, %v2460_v4, inf  ;;  %v2480_v9 = vsel %vm2479_vm15, %v2475_v29, inf  ;;  %v2967_v53 = vand.u32 4294901760, %v2868_v25  ;;  %v2970_v44 = vand.u32 4294901760, %v2869_v40  ;;  %s4929_s23 = sshll.u32 %s7056_s2, 4  ;;  %s4930_s23 = int_to_ptr.vmem [resolvable:$true] %s4929_s23 }
 0x391   :  { %2466 = vmin.xlane.f32.xlu1 %v2465_v26  ;;  %2481 = vmin.xlane.f32.xlu0 %v2480_v9  ;;  %v2593_v4 = vand.u32 65535, %v8335_v28  ;;  %v2623_v28 = vand.u32 65535, %v8353_v36  ;;  %s6980_s26 = scalar_lea.vmem %s4930_s23, 4096  ;;  %p6985_p9 = scmp.lt.s32.totalorder %s4930_s23, %s4930_s23 }
 0x392   :  { %v8514_v30 = vpop.xlane.xlu1 %2492  ;;  %v8516_v43 = vpop.xlane.xlu0 %2507  ;;  %v8553_v29 = vsub.f32 %v2868_v25, %v2967_v53  ;;  %v8555_v33 = vsub.f32 %v2869_v40, %v2970_v44  ;;  %v2610_v40 = vcvt.s32.f32 %v2608_v17  ;;  %v9962_v17 = vld [vmem:[#allocation24_spill] sm:$0xff]  ;;  %p6981_p8 = scmp.ne.s32.totalorder %s4930_s23, %s6980_s26  ;;  %p6986_p10 = scmp.lt.s32.totalorder %s6980_s26, %s6980_s26 }
 0x393   :  { %vm2494_vm1 = vcmp.eq.f32.partialorder %v8291_v47, %v8514_v30  ;;  %vm2509_vm2 = vcmp.eq.f32.partialorder %v8293_v35, %v8516_v43  ;;  %v8535_v47 = vpack.c.bf16 %v2970_v44, %v2967_v53  ;;  %v2595_v9 = vcvt.s32.f32 %v2593_v4 }
 0x394   :  { %v2495_v55 = vsel %vm2494_vm1, %v2490_v6, inf  ;;  %v2510_v59 = vsel %vm2509_vm2, %v2505_v38, inf  ;;  %v9655_v50 = vand.u32 4294901760, %v8555_v33  ;;  %v9958_v6 = vld [vmem:[#allocation17_spill] sm:$0xff]  ;;  %v2638_v44 = vand.u32 65535, %v8368_v49  ;;  %p6987_p11 = por %p6986_p10, %p6985_p9 }
 0x395   :  { %2496 = vmin.xlane.f32.xlu1 %v2495_v55  ;;  %2511 = vmin.xlane.f32.xlu0 %v2510_v59  ;;  %v9959_v38 = vld [vmem:[#allocation21_spill] sm:$0xff]  ;;  %v2625_v55 = vcvt.s32.f32 %v2623_v28 }
 0x396   :  { %v8529_v8 = vpop.xlane.xlu1 %2522  ;;  %v8531_v27 = vpop.xlane.xlu0 %2537  ;;  %6576 = vmatprep.subr.bf16.mxu1 %v8535_v47  ;;  %v3364_v25 = vsub.f32 %v8555_v33, %v9655_v50  ;;  %v2640_v49 = vcvt.s32.f32 %v2638_v44  ;;  %p6988_p12 = pnand %p6987_p11, %p6981_p8 }
 0x397   :  { %vm2524_vm3 = vcmp.eq.f32.partialorder %v8309_v1, %v8529_v8  ;;  %vm2539_vm4 = vcmp.eq.f32.partialorder %v8311_v31, %v8531_v27  ;;  %6578 = vmatpush3.bf16.msra.mxu1 %v8535_v47 }
 0x398   :  { %v2525_v35 = vsel %vm2524_vm3, %v2520_v14, inf  ;;  %v2540_v11 = vsel %vm2539_vm4, %v2535_v0, inf  ;;  %v2653_v14 = vand.u32 65535, %v8371_v34  ;;  %v3365_v62 = vand.u32 4294901760, %v3364_v25 }
 0x399   :  { %2526 = vmin.xlane.f32.xlu1 %v2525_v35  ;;  %2541 = vmin.xlane.f32.xlu0 %v2540_v11  ;;  %v9961_v35 = vld [vmem:[#allocation22_spill] sm:$0xff] }
 0x39a   :  { %v8542_v41 = vpop.xlane.xlu1 %2552  ;;  %v8544_v22 = vpop.xlane.xlu0 %2567  ;;  %v2655_v34 = vcvt.s32.f32 %v2653_v14 }
 0x39b   :  { %vm2554_vm5 = vcmp.eq.f32.partialorder %v8327_v10, %v8542_v41  ;;  %vm2569_vm6 = vcmp.eq.f32.partialorder %v8329_v19, %v8544_v22  ;;  %v2580_v10 = vcvt.s32.f32 %v2578_v13  ;;  %v9656_v19 = vand.u32 4294901760, %v8553_v29 }
 0x39c   :  { %v2555_v1 = vsel %vm2554_vm5, %v2550_v2, inf  ;;  %v2570_v31 = vsel %vm2569_vm6, %v2565_v63, inf }
 0x39d   :  { %2556 = vmin.xlane.f32.xlu1 %v2555_v1  ;;  %2571 = vmin.xlane.f32.xlu0 %v2570_v31  ;;  %v3357_v36 = vsub.f32 %v8553_v29, %v9656_v19  ;;  %v2668_v1 = vand.u32 65535, %v8386_v45  ;;  %v2683_v31 = vand.u32 65535, %v8389_v5  ;;  %v2698_v5 = vand.u32 65535, %v8404_v42 }
 0x39e   :  { %v8559_v46 = vpop.xlane.xlu1 %2582  ;;  %v8561_v26 = vpop.xlane.xlu0 %2597  ;;  %v2728_v42 = vand.u32 65535, %v8422_v61 }
 0x39f   :  { %vm2584_vm7 = vcmp.eq.f32.partialorder %v9958_v6, %v8559_v46  ;;  %vm2599_vm8 = vcmp.eq.f32.partialorder %v9959_v38, %v8561_v26  ;;  %v3358_v0 = vand.u32 4294901760, %v3357_v36  ;;  %v2670_v38 = vcvt.s32.f32 %v2668_v1 }
 0x3a0   :  { %v2585_v39 = vsel %vm2584_vm7, %v2580_v10, inf  ;;  %v2600_v54 = vsel %vm2599_vm8, %v2595_v9, inf  ;;  %v2685_v45 = vcvt.s32.f32 %v2683_v31  ;;  %v2700_v44 = vcvt.s32.f32 %v2698_v5 }
 0x3a1   :  { %2586 = vmin.xlane.f32.xlu1 %v2585_v39  ;;  %2601 = vmin.xlane.f32.xlu0 %v2600_v54  ;;  %v8585_v63 = vpack.c.bf16 %v3365_v62, %v3358_v0  ;;  %v2713_v39 = vand.u32 65535, %v8407_v60  ;;  %v9963_v54 = vld [vmem:[#allocation13_spill] sm:$0xff]  ;;  %v2743_v60 = vand.u32 65535, %v8425_v32  ;;  %v9966_v32 = vld [vmem:[#allocation31_spill] sm:$0xff]  ;;  %v2349_v5 = vcvt.f32.s32 %v8463_v21 }
 0x3a2   :  { %v8575_v59 = vpop.xlane.xlu1 %2612  ;;  %v8577_v53 = vpop.xlane.xlu0 %2627 }
 0x3a3   :  { %vm2614_vm9 = vcmp.eq.f32.partialorder %v9960_v23, %v8575_v59  ;;  %vm2629_vm10 = vcmp.eq.f32.partialorder %v9961_v35, %v8577_v53  ;;  %6580 = vmatprep.subr.bf16.mxu1 %v8585_v63  ;;  %v2715_v14 = vcvt.s32.f32 %v2713_v39  ;;  %v2364_v39 = vcvt.f32.s32 %v8465_v37 }
 0x3a4   :  { %v2615_v11 = vsel %vm2614_vm9, %v2610_v40, inf  ;;  %v2630_v2 = vsel %vm2629_vm10, %v2625_v55, inf }
 0x3a5   :  { %2616 = vmin.xlane.f32.xlu1 %v2615_v11  ;;  %2631 = vmin.xlane.f32.xlu0 %v2630_v2  ;;  %v2730_v11 = vcvt.s32.f32 %v2728_v42  ;;  %v2745_v2 = vcvt.s32.f32 %v2743_v60  ;;  %v8644_v21 = vshll.u32 %v2364_v39, 16 }
 0x3a6   :  { %v8587_v13 = vpop.xlane.xlu1 %2642  ;;  %v8589_v4 = vpop.xlane.xlu0 %2657 }
 0x3a7   :  { %vm2644_vm11 = vcmp.eq.f32.partialorder %v8381_v51, %v8587_v13  ;;  %vm2659_vm12 = vcmp.eq.f32.partialorder %v9962_v17, %v8589_v4  ;;  %v9964_v51 = vld [vmem:[#allocation25_spill] sm:$0xff] }
 0x3a8   :  { %v2645_v28 = vsel %vm2644_vm11, %v2640_v49, inf  ;;  %v2660_v10 = vsel %vm2659_vm12, %v2655_v34, inf  ;;  %v9965_v49 = vld [vmem:[#allocation32_spill] sm:$0xff]  ;;  %v9968_v17 = vld [vmem:[#allocation33_spill] sm:$0xff] }
 0x3a9   :  { %2646 = vmin.xlane.f32.xlu1 %v2645_v28  ;;  %2661 = vmin.xlane.f32.xlu0 %v2660_v10  ;;  %v2758_v61 = vand.u32 65535, %v9965_v49  ;;  %v2304_v10 = vcvt.f32.s32 %v8447_v57  ;;  %v8640_v57 = vshll.u32 %v2349_v5, 16 }
 0x3aa   :  { %v8598_v9 = vpop.xlane.xlu1 %2672  ;;  %v8600_v6 = vpop.xlane.xlu0 %2687 }
 0x3ab   :  { %vm2674_vm13 = vcmp.eq.f32.partialorder %v9963_v54, %v8598_v9  ;;  %vm2689_vm14 = vcmp.eq.f32.partialorder %v9964_v51, %v8600_v6  ;;  %v2760_v31 = vcvt.s32.f32 %v2758_v61  ;;  %v2379_v54 = vcvt.f32.s32 %v8473_v52 }
 0x3ac   :  { %v2675_v36 = vsel %vm2674_vm13, %v2670_v38, inf  ;;  %v2690_v25 = vsel %vm2689_vm14, %v2685_v45, inf  ;;  %v2319_v38 = vcvt.f32.s32 %v8453_v15  ;;  %v2334_v45 = vcvt.f32.s32 %v8455_v58 }
 0x3ad   :  { %2676 = vmin.xlane.f32.xlu1 %v2675_v36  ;;  %2691 = vmin.xlane.f32.xlu0 %v2690_v25  ;;  %v2394_v51 = vcvt.f32.s32 %v8475_v16  ;;  %v2305_v36 = vshll.u32 %v2304_v10, 16  ;;  %v2439_v15 = vcvt.f32.s32 %v8493_v12  ;;  %v2454_v58 = vcvt.f32.s32 %v8495_v48 }
 0x3ae   :  { %v8608_v40 = vpop.xlane.xlu1 %2702  ;;  %v8610_v55 = vpop.xlane.xlu0 %2717  ;;  %v2320_v25 = vshll.u32 %v2319_v38, 16  ;;  %v2335_v42 = vshll.u32 %v2334_v45, 16  ;;  %v8646_v37 = vshll.u32 %v2379_v54, 16  ;;  %v2469_v52 = vcvt.f32.s32 %v8503_v20 }
 0x3af   :  { %vm2704_vm15 = vcmp.eq.f32.partialorder %v8417_v18, %v8608_v40  ;;  %vm2719_vm1 = vcmp.eq.f32.partialorder %v8419_v24, %v8610_v55  ;;  %v9967_v18 = vld [vmem:[#allocation15_spill] sm:$0xff]  ;;  %v2484_v16 = vcvt.f32.s32 %v8505_v56  ;;  %v8650_v60 = vshll.u32 %v2394_v51, 16 }
 0x3b0   :  { %v2705_v0 = vsel %vm2704_vm15, %v2700_v44, inf  ;;  %v2720_v62 = vsel %vm2719_vm1, %v2715_v14, inf  ;;  %v2409_v44 = vcvt.f32.s32 %v8483_v3  ;;  %v2424_v14 = vcvt.f32.s32 %v8485_v7 }
 0x3b1   :  { %2706 = vmin.xlane.f32.xlu1 %v2705_v0  ;;  %2721 = vmin.xlane.f32.xlu0 %v2720_v62  ;;  %v2499_v3 = vcvt.f32.s32 %v8514_v30  ;;  %v2514_v7 = vcvt.f32.s32 %v8516_v43  ;;  %v2529_v0 = vcvt.f32.s32 %v8529_v8  ;;  %v2544_v48 = vcvt.f32.s32 %v8531_v27 }
 0x3b2   :  { %v8618_v23 = vpop.xlane.xlu1 %2732  ;;  %v8620_v35 = vpop.xlane.xlu0 %2747  ;;  %v8655_v62 = vshll.u32 %v2409_v44, 16  ;;  %v8657_v12 = vshll.u32 %v2424_v14, 16  ;;  %v8663_v20 = vshll.u32 %v2454_v58, 16  ;;  %v2574_v56 = vcvt.f32.s32 %v8544_v22 }
 0x3b3   :  { %vm2734_vm2 = vcmp.eq.f32.partialorder %v9966_v32, %v8618_v23  ;;  %vm2749_vm3 = vcmp.eq.f32.partialorder %v9967_v18, %v8620_v35  ;;  %v2589_v30 = vcvt.f32.s32 %v8559_v46  ;;  %v8667_v49 = vshll.u32 %v2469_v52, 16 }
 0x3b4   :  { %v2735_v34 = vsel %vm2734_vm2, %v2730_v11, inf  ;;  %v2750_v24 = vsel %vm2749_vm3, %v2745_v2, inf  ;;  %v2559_v11 = vcvt.f32.s32 %v8542_v41  ;;  %v8661_v2 = vshll.u32 %v2439_v15, 16 }
 0x3b5   :  { %2736 = vmin.xlane.f32.xlu1 %v2735_v34  ;;  %2751 = vmin.xlane.f32.xlu0 %v2750_v24  ;;  %v8669_v43 = vshll.u32 %v2484_v16, 16  ;;  %v2604_v8 = vcvt.f32.s32 %v8561_v26  ;;  %v2619_v61 = vcvt.f32.s32 %v8575_v59  ;;  %v8673_v32 = vshll.u32 %v2499_v3, 16 }
 0x3b6   :  { %v8627_v1 = vpop.xlane.xlu1 %2762  ;;  %v8675_v27 = vshll.u32 %v2514_v7, 16  ;;  %v8677_v41 = vshll.u32 %v2529_v0, 16  ;;  %v2634_v18 = vcvt.f32.s32 %v8577_v53  ;;  %v8680_v22 = vshll.u32 %v2544_v48, 16 }
 0x3b7   :  { %vm2764_vm4 = vcmp.eq.f32.partialorder %v9968_v17, %v8627_v1  ;;  %v8682_v46 = vshll.u32 %v2559_v11, 16  ;;  %v2649_v24 = vcvt.f32.s32 %v8587_v13  ;;  %v8685_v17 = vshll.u32 %v2574_v56, 16 }
 0x3b8   :  { %v2765_v28 = vsel %vm2764_vm4, %v2760_v31, inf  ;;  %v8687_v26 = vshll.u32 %v2589_v30, 16  ;;  %v2664_v59 = vcvt.f32.s32 %v8589_v4  ;;  %v8691_v10 = vshll.u32 %v2604_v8, 16 }
 0x3b9   :  { %2766 = vmin.xlane.f32.xlu1 %v2765_v28  ;;  %v2679_v28 = vcvt.f32.s32 %v8598_v9  ;;  %v8693_v38 = vshll.u32 %v2619_v61, 16  ;;  %v2694_v53 = vcvt.f32.s32 %v8600_v6  ;;  %v8696_v5 = vshll.u32 %v2634_v18, 16  ;;  %v9969_v9 = vld [vmem:[#allocation14_spill] sm:$0xff] }
 0x3ba   :  { %v2709_v13 = vcvt.f32.s32 %v8608_v40  ;;  %v2724_v39 = vcvt.f32.s32 %v8610_v55  ;;  %v2739_v54 = vcvt.f32.s32 %v8618_v23  ;;  %v8701_v4 = vshll.u32 %v2649_v24, 16 }
 0x3bb   :  { %v8704_v58 = vshll.u32 %v2664_v59, 16  ;;  %v8706_v6 = vshll.u32 %v2679_v28, 16  ;;  %v9661_v52 = vmov 0.0   ;;  %v8712_v55 = vshll.u32 %v2694_v53, 16 }
 0x3bc   :  { %v8716_v7 = vshll.u32 %v2709_v13, 16  ;;  %v8718_v0 = vshll.u32 %v2724_v39, 16  ;;  %v8720_v48 = vshll.u32 %v2739_v54, 16  ;;  %v2769_v28 = vcvt.f32.s32 %v8627_v1 }
 0x406   :  { %v2302_v34 = vpop.xlane.xlu0 %2301 }
 0x407   :  { %v2303_v31 = vcvt.f32.s32 %v2302_v34 }
 0x409   :  { %v2306_v45 = vadd.s32 %v2305_v36, %v2303_v31  ;;  %v2754_v36 = vcvt.f32.s32 %v8620_v35 }
 0x40a   :  { %v2317_v51 = vpop.xlane.xlu1 %2316  ;;  %v2332_v44 = vpop.xlane.xlu0 %2331 }
 0x40b   :  { %vm2772_vm5 = vcmp.eq.s32.totalorder %v9969_v9, %v2306_v45  ;;  %v2318_v14 = vcvt.f32.s32 %v2317_v51  ;;  %v2333_v15 = vcvt.f32.s32 %v2332_v44 }
 0x40c   :  { %v8710_v40 = vsel %vm2772_vm5, 1.0, %v9661_v52 }
 0x40d   :  { %v2321_v23 = vadd.s32 %v2320_v25, %v2318_v14  ;;  %v2336_v16 = vadd.s32 %v2335_v42, %v2333_v15  ;;  %v2871_v3 = vsel %vm2129_vm0, %v8710_v40, 0  ;;  %v8726_v42 = vshll.u32 %v2754_v36, 16 }
 0x40e   :  { %v2347_v11 = vpop.xlane.xlu1 %2346  ;;  %v2362_v56 = vpop.xlane.xlu0 %2361  ;;  %v8722_v35 = vsub.f32 %v2871_v3, %v2871_v3 }
 0x40f   :  { %vm2773_vm6 = vcmp.eq.s32.totalorder %v9969_v9, %v2321_v23  ;;  %vm2774_vm7 = vcmp.eq.s32.totalorder %v9969_v9, %v2336_v16  ;;  %v2348_v30 = vcvt.f32.s32 %v2347_v11  ;;  %v2363_v25 = vcvt.f32.s32 %v2362_v56 }
 0x410   :  { %v8729_v8 = vsel %vm2773_vm6, 1.0, %v9661_v52  ;;  %v8732_v61 = vsel %vm2774_vm7, 1.0, %v9661_v52  ;;  %v9654_v18 = vand.u32 4294901760, %v8722_v35 }
 0x411   :  { %v2351_v34 = vadd.s32 %v8640_v57, %v2348_v30  ;;  %v2366_v24 = vadd.s32 %v8644_v21, %v2363_v25  ;;  %v2874_v31 = vsel %vm2129_vm0, %v8729_v8, 0  ;;  %v2877_v59 = vsel %vm2129_vm0, %v8732_v61, 0 }
 0x412   :  { %v2377_v53 = vpop.xlane.xlu1 %2376  ;;  %v2392_v45 = vpop.xlane.xlu0 %2391  ;;  %v3036_v13 = vsub.f32 %v8722_v35, %v9654_v18  ;;  %v8745_v39 = vsub.f32 %v2874_v31, %v2874_v31  ;;  %v8747_v54 = vsub.f32 %v2877_v59, %v2877_v59 }
 0x413   :  { %vm2775_vm8 = vcmp.eq.s32.totalorder %v9969_v9, %v2351_v34  ;;  %vm2776_vm9 = vcmp.eq.s32.totalorder %v9969_v9, %v2366_v24  ;;  %v2378_v57 = vcvt.f32.s32 %v2377_v53  ;;  %v2393_v21 = vcvt.f32.s32 %v2392_v45 }
 0x414   :  { %v8752_v51 = vsel %vm2775_vm8, 1.0, %v9661_v52  ;;  %v8755_v1 = vsel %vm2776_vm9, 1.0, %v9661_v52  ;;  %v3037_v44 = vand.u32 4294901760, %v3036_v13  ;;  %v9652_v14 = vand.u32 4294901760, %v8745_v39 }
 0x415   :  { %v2381_v15 = vadd.s32 %v8646_v37, %v2378_v57  ;;  %v2396_v36 = vadd.s32 %v8650_v60, %v2393_v21  ;;  %v9651_v23 = vand.u32 4294901760, %v8747_v54  ;;  %v2880_v16 = vsel %vm2129_vm0, %v8752_v51, 0 }
 0x416   :  { %v2407_v3 = vpop.xlane.xlu1 %2406  ;;  %6075 = vmatprep.mubr.f32.mxu1 %v3037_v44  ;;  %v2422_v11 = vpop.xlane.xlu0 %2421  ;;  %v3046_v56 = vsub.f32 %v8745_v39, %v9652_v14  ;;  %v8766_v30 = vsub.f32 %v2880_v16, %v2880_v16  ;;  %v2883_v25 = vsel %vm2129_vm0, %v8755_v1, 0  ;;  %v8772_v37 = vpack.c.bf16 %v8555_v33, %v8553_v29 }
 0x417   :  { %vm2777_vm10 = vcmp.eq.s32.totalorder %v9969_v9, %v2381_v15  ;;  %vm2778_vm11 = vcmp.eq.s32.totalorder %v9969_v9, %v2396_v36  ;;  %v2408_v60 = vcvt.f32.s32 %v2407_v3  ;;  %v2423_v34 = vcvt.f32.s32 %v2422_v11 }
 0x418   :  { %v8777_v24 = vsel %vm2777_vm10, 1.0, %v9661_v52  ;;  %v8780_v31 = vsel %vm2778_vm11, 1.0, %v9661_v52  ;;  %v3047_v59 = vand.u32 4294901760, %v3046_v56  ;;  %v3056_v53 = vsub.f32 %v8747_v54, %v9651_v23 }
 0x419   :  { %v2411_v45 = vadd.s32 %v8655_v62, %v2408_v60  ;;  %v2426_v13 = vadd.s32 %v8657_v12, %v2423_v34  ;;  %v9649_v57 = vand.u32 4294901760, %v8766_v30  ;;  %v8788_v21 = vsub.f32 %v2883_v25, %v2883_v25 }
 0x41a   :  { %v8790_v44 = vshll.u32 %v2769_v28, 16  ;;  %v2437_v15 = vpop.xlane.xlu1 %2436  ;;  %6076 = vmatmul.mubr.f32.vlgmr.msra.gmra.mrb[0].mxu1 %v3047_v59  ;;  %v2452_v36 = vpop.xlane.xlu0 %2451  ;;  %v3057_v16 = vand.u32 4294901760, %v3056_v53  ;;  %v2886_v3 = vsel %vm2129_vm0, %v8777_v24, 0  ;;  %v2889_v11 = vsel %vm2129_vm0, %v8780_v31, 0 }
 0x41b   :  { %vm2779_vm12 = vcmp.eq.s32.totalorder %v9969_v9, %v2411_v45  ;;  %vm2780_vm13 = vcmp.eq.s32.totalorder %v9969_v9, %v2426_v13  ;;  %v2438_v62 = vcvt.f32.s32 %v2437_v15  ;;  %v2453_v12 = vcvt.f32.s32 %v2452_v36  ;;  %6582 = vmatpush3.bf16.msra.mxu1 %v8585_v63 }
 0x41c   :  { %v8800_v28 = vsel %vm2779_vm12, 1.0, %v9661_v52  ;;  %v8803_v56 = vsel %vm2780_vm13, 1.0, %v9661_v52  ;;  %6078 = vmatprep.mubr.f32.mxu1 %v3057_v16  ;;  %v3066_v25 = vsub.f32 %v8766_v30, %v9649_v57  ;;  %v9650_v60 = vand.u32 4294901760, %v8788_v21  ;;  %6584 = vmatprep.subr.bf16.mxu1 %v8772_v37 }
 0x41d   :  { %v2441_v34 = vadd.s32 %v8661_v2, %v2438_v62  ;;  %v2456_v59 = vadd.s32 %v8663_v20, %v2453_v12  ;;  %v8812_v63 = vsub.f32 %v2886_v3, %v2886_v3  ;;  %v8814_v53 = vsub.f32 %v2889_v11, %v2889_v11 }
 0x41e   :  { %v2467_v45 = vpop.xlane.xlu1 %2466  ;;  %v3067_v13 = vand.u32 4294901760, %v3066_v25  ;;  %v2482_v15 = vpop.xlane.xlu0 %2481  ;;  %v3076_v36 = vsub.f32 %v8788_v21, %v9650_v60  ;;  %v2892_v16 = vsel %vm2129_vm0, %v8800_v28, 0  ;;  %v2895_v57 = vsel %vm2129_vm0, %v8803_v56, 0 }
 0x41f   :  { %vm2781_vm14 = vcmp.eq.s32.totalorder %v9969_v9, %v2441_v34  ;;  %vm2782_vm15 = vcmp.eq.s32.totalorder %v9969_v9, %v2456_v59  ;;  %v2468_v2 = vcvt.f32.s32 %v2467_v45  ;;  %v2483_v20 = vcvt.f32.s32 %v2482_v15 }
 0x420   :  { %v8826_v3 = vsel %vm2781_vm14, 1.0, %v9661_v52  ;;  %v8829_v11 = vsel %vm2782_vm15, 1.0, %v9661_v52  ;;  %6079 = vmatmul.mubr.f32.gmra.mrb[2].mxu1 %v3067_v13  ;;  %v3077_v62 = vand.u32 4294901760, %v3076_v36  ;;  %v9653_v12 = vand.u32 4294901760, %v8812_v63 }
 0x421   :  { %v2471_v25 = vadd.s32 %v8667_v49, %v2468_v2  ;;  %v2486_v60 = vadd.s32 %v8669_v43, %v2483_v20  ;;  %v9658_v34 = vand.u32 4294901760, %v8814_v53  ;;  %v8835_v23 = vsub.f32 %v2892_v16, %v2892_v16 }
 0x422   :  { %6081 = vmatprep.mubr.f32.mxu1 %v3077_v62  ;;  %v2497_v59 = vpop.xlane.xlu1 %2496  ;;  %v3086_v45 = vsub.f32 %v8812_v63, %v9653_v12  ;;  %v2512_v15 = vpop.xlane.xlu0 %2511  ;;  %v8840_v14 = vsub.f32 %v2895_v57, %v2895_v57  ;;  %v2898_v13 = vsel %vm2129_vm0, %v8826_v3, 0  ;;  %v2901_v49 = vsel %vm2129_vm0, %v8829_v11, 0 }
 0x423   :  { %9970 = vst [vmem:[#allocation16_spill] sm:$0xff] %v8835_v23  ;;  %vm2783_vm1 = vcmp.eq.s32.totalorder %v9969_v9, %v2471_v25  ;;  %vm2784_vm2 = vcmp.eq.s32.totalorder %v9969_v9, %v2486_v60  ;;  %v2498_v43 = vcvt.f32.s32 %v2497_v59  ;;  %v2513_v36 = vcvt.f32.s32 %v2512_v15 }
 0x424   :  { %v8849_v16 = vsel %vm2783_vm1, 1.0, %v9661_v52  ;;  %v8852_v2 = vsel %vm2784_vm2, 1.0, %v9661_v52  ;;  %v3087_v57 = vand.u32 4294901760, %v3086_v45  ;;  %v3096_v20 = vsub.f32 %v8814_v53, %v9658_v34 }
 0x425   :  { %v2501_v62 = vadd.s32 %v8673_v32, %v2498_v43  ;;  %v2516_v12 = vadd.s32 %v8675_v27, %v2513_v36  ;;  %v9657_v25 = vand.u32 4294901760, %v8835_v23  ;;  %v9663_v60 = vand.u32 4294901760, %v8840_v14 }
 0x426   :  { %6082 = vmatmul.mubr.f32.gmra.mrb[4].mxu1 %v3087_v57  ;;  %v3097_v59 = vand.u32 4294901760, %v3096_v20  ;;  %v2527_v15 = vpop.xlane.xlu1 %2526  ;;  %v2542_v18 = vpop.xlane.xlu0 %2541  ;;  %v8861_v50 = vsub.f32 %v2898_v13, %v2898_v13  ;;  %v8863_v19 = vsub.f32 %v2901_v49, %v2901_v49  ;;  %v2904_v45 = vsel %vm2129_vm0, %v8849_v16, 0 }
 0x427   :  { %vm2785_vm3 = vcmp.eq.s32.totalorder %v9969_v9, %v2501_v62  ;;  %vm2786_vm4 = vcmp.eq.s32.totalorder %v9969_v9, %v2516_v12  ;;  %v2528_v32 = vcvt.f32.s32 %v2527_v15  ;;  %v3106_v27 = vsub.f32 %v8835_v23, %v9657_v25 }
 0x428   :  { %9971 = vst [vmem:[#allocation34_spill] sm:$0xff] %v8861_v50  ;;  %9972 = vst [vmem:[#allocation35_spill] sm:$0xff] %v8863_v19  ;;  %v8873_v43 = vsel %vm2785_vm3, 1.0, %v9661_v52  ;;  %v8876_v13 = vsel %vm2786_vm4, 1.0, %v9661_v52  ;;  %6084 = vmatprep.mubr.f32.mxu1 %v3097_v59  ;;  %v2543_v49 = vcvt.f32.s32 %v2542_v18  ;;  %v3116_v36 = vsub.f32 %v8840_v14, %v9663_v60 }
 0x429   :  { %v2531_v57 = vadd.s32 %v8677_v41, %v2528_v32  ;;  %v3107_v12 = vand.u32 4294901760, %v3106_v27  ;;  %v9664_v20 = vand.u32 4294901760, %v8861_v50  ;;  %v9665_v62 = vand.u32 4294901760, %v8863_v19 }
 0x42a   :  { %v2546_v15 = vadd.s32 %v8680_v22, %v2543_v49  ;;  %v3117_v25 = vand.u32 4294901760, %v3116_v36  ;;  %v2557_v34 = vpop.xlane.xlu1 %2556  ;;  %v2572_v23 = vpop.xlane.xlu0 %2571  ;;  %v8885_v52 = vsub.f32 %v2904_v45, %v2904_v45  ;;  %v2907_v18 = vsel %vm2129_vm0, %v8852_v2, 0 }
 0x42b   :  { %vm2787_vm5 = vcmp.eq.s32.totalorder %v9969_v9, %v2531_v57  ;;  %6085 = vmatmul.mubr.f32.gmra.mrb[6].mxu1 %v3107_v12  ;;  %v2558_v59 = vcvt.f32.s32 %v2557_v34  ;;  %v3126_v41 = vsub.f32 %v8861_v50, %v9664_v20  ;;  %v2573_v32 = vcvt.f32.s32 %v2572_v23 }
 0x42c   :  { %9973 = vst [vmem:[#allocation20_spill] sm:$0xff] %v8885_v52  ;;  %v9974_v27 = vmov 0.0   ;;  %vm2788_vm6 = vcmp.eq.s32.totalorder %v9969_v9, %v2546_v15  ;;  %6087 = vmatprep.mubr.f32.mxu1 %v3117_v25  ;;  %v3136_v22 = vsub.f32 %v8863_v19, %v9665_v62  ;;  %v9666_v45 = vand.u32 4294901760, %v8885_v52 }
 0x42d   :  { %v8894_v60 = vsel %vm2787_vm5, 1.0, %v9974_v27  ;;  %v8902_v49 = vsel %vm2788_vm6, 1.0, %v9974_v27  ;;  %v2561_v34 = vadd.s32 %v8682_v46, %v2558_v59  ;;  %v3127_v36 = vand.u32 4294901760, %v3126_v41 }
 0x42e   :  { %v2576_v23 = vadd.s32 %v8685_v17, %v2573_v32  ;;  %v3137_v57 = vand.u32 4294901760, %v3136_v22  ;;  %v2587_v12 = vpop.xlane.xlu1 %2586  ;;  %v3146_v25 = vsub.f32 %v8885_v52, %v9666_v45  ;;  %v2602_v15 = vpop.xlane.xlu0 %2601  ;;  %v8909_v20 = vsub.f32 %v2907_v18, %v2907_v18 }
 0x42f   :  { %v2910_v62 = vsel %vm2129_vm0, %v8873_v43, 0  ;;  %vm2789_vm7 = vcmp.eq.s32.totalorder %v9969_v9, %v2561_v34  ;;  %6088 = vmatmul.mubr.f32.gmra.mrb[8].mxu1 %v3127_v36  ;;  %v2588_v46 = vcvt.f32.s32 %v2587_v12  ;;  %v2603_v59 = vcvt.f32.s32 %v2602_v15 }
 0x430   :  { %9975 = vst [vmem:[#allocation40_spill] sm:$0xff] %v8909_v20  ;;  %vm2790_vm8 = vcmp.eq.s32.totalorder %v9969_v9, %v2576_v23  ;;  %v8916_v17 = vsel %vm2789_vm7, 1.0, %v9974_v27  ;;  %6090 = vmatprep.mubr.f32.mxu1 %v3137_v57  ;;  %v3147_v32 = vand.u32 4294901760, %v3146_v25  ;;  %v9669_v18 = vand.u32 4294901760, %v8909_v20 }
 0x431   :  { %v8919_v41 = vsel %vm2790_vm8, 1.0, %v9974_v27  ;;  %v2591_v22 = vadd.s32 %v8687_v26, %v2588_v46  ;;  %v2606_v45 = vadd.s32 %v8691_v10, %v2603_v59  ;;  %v8924_v34 = vsub.f32 %v2910_v62, %v2910_v62 }
 0x432   :  { %v2913_v36 = vsel %vm2129_vm0, %v8876_v13, 0  ;;  %v3156_v23 = vsub.f32 %v8909_v20, %v9669_v18  ;;  %v2617_v12 = vpop.xlane.xlu1 %2616  ;;  %v2632_v15 = vpop.xlane.xlu0 %2631  ;;  %v2916_v57 = vsel %vm2129_vm0, %v8894_v60, 0  ;;  %v2919_v26 = vsel %vm2129_vm0, %v8902_v49, 0 }
 0x433   :  { %9976 = vst [vmem:[#allocation42_spill] sm:$0xff] %v8924_v34  ;;  %v8931_v52 = vsub.f32 %v2913_v36, %v2913_v36  ;;  %vm2791_vm9 = vcmp.eq.s32.totalorder %v9969_v9, %v2591_v22  ;;  %6091 = vmatmul.mubr.f32.gmra.mrb[10].mxu1 %v3147_v32  ;;  %vm2792_vm10 = vcmp.eq.s32.totalorder %v9969_v9, %v2606_v45  ;;  %v2618_v10 = vcvt.f32.s32 %v2617_v12 }
 0x434   :  { %v9676_v62 = vand.u32 4294901760, %v8924_v34  ;;  %v8941_v25 = vsel %vm2791_vm9, 1.0, %v9974_v27  ;;  %v8944_v46 = vsel %vm2792_vm10, 1.0, %v9974_v27  ;;  %v3157_v59 = vand.u32 4294901760, %v3156_v23 }
 0x435   :  { %9977 = vst [vmem:[#allocation43_spill] sm:$0xff] %v8931_v52  ;;  %v2633_v36 = vcvt.f32.s32 %v2632_v15  ;;  %v2621_v18 = vadd.s32 %v8693_v38, %v2618_v10  ;;  %v9677_v32 = vand.u32 4294901760, %v8931_v52  ;;  %v8951_v45 = vsub.f32 %v2916_v57, %v2916_v57 }
 0x436   :  { %v3166_v22 = vsub.f32 %v8924_v34, %v9676_v62  ;;  %6093 = vmatprep.mubr.f32.mxu1 %v3157_v59  ;;  %v2647_v20 = vpop.xlane.xlu1 %2646  ;;  %v2662_v19 = vpop.xlane.xlu0 %2661  ;;  %v8954_v50 = vsub.f32 %v2919_v26, %v2919_v26  ;;  %v2922_v23 = vsel %vm2129_vm0, %v8916_v17, 0  ;;  %v2925_v38 = vsel %vm2129_vm0, %v8919_v41, 0 }
 0x437   :  { %9978 = vst [vmem:[#allocation46_spill] sm:$0xff] %v8951_v45  ;;  %v2636_v12 = vadd.s32 %v8696_v5, %v2633_v36  ;;  %vm2793_vm11 = vcmp.eq.s32.totalorder %v9969_v9, %v2621_v18  ;;  %v3176_v57 = vsub.f32 %v8931_v52, %v9677_v32  ;;  %v2648_v10 = vcvt.f32.s32 %v2647_v20 }
 0x438   :  { %9979 = vst [vmem:[#allocation51_spill] sm:$0xff] %v8954_v50  ;;  %v3167_v15 = vand.u32 4294901760, %v3166_v22  ;;  %v8965_v5 = vsel %vm2793_vm11, 1.0, %v9974_v27  ;;  %v9682_v26 = vand.u32 4294901760, %v8951_v45  ;;  %v2663_v59 = vcvt.f32.s32 %v2662_v19 }
 0x439   :  { %vm2794_vm12 = vcmp.eq.s32.totalorder %v9969_v9, %v2636_v12  ;;  %v3177_v62 = vand.u32 4294901760, %v3176_v57  ;;  %v2651_v18 = vadd.s32 %v8701_v4, %v2648_v10  ;;  %v9683_v22 = vand.u32 4294901760, %v8954_v50 }
 0x43a   :  { %6094 = vmatmul.mubr.f32.gmra.mrb[12].mxu1 %v3167_v15  ;;  %v8970_v36 = vsel %vm2794_vm12, 1.0, %v9974_v27  ;;  %v3186_v20 = vsub.f32 %v8951_v45, %v9682_v26  ;;  %v2666_v32 = vadd.s32 %v8704_v58, %v2663_v59  ;;  %v2677_v52 = vpop.xlane.xlu1 %2676  ;;  %v8978_v12 = vsub.f32 %v2922_v23, %v2922_v23  ;;  %v2692_v34 = vpop.xlane.xlu0 %2691 }
 0x43b   :  { %v8980_v19 = vsub.f32 %v2925_v38, %v2925_v38  ;;  %6096 = vmatprep.mubr.f32.mxu1 %v3177_v62  ;;  %vm2795_vm13 = vcmp.eq.s32.totalorder %v9969_v9, %v2651_v18  ;;  %v3196_v4 = vsub.f32 %v8954_v50, %v9683_v22  ;;  %v2678_v15 = vcvt.f32.s32 %v2677_v52 }
 0x43c   :  { %9980 = vst [vmem:[#allocation52_spill] sm:$0xff] %v8978_v12  ;;  %v2693_v57 = vcvt.f32.s32 %v2692_v34  ;;  %v8987_v10 = vsel %vm2795_vm13, 1.0, %v9974_v27  ;;  %v3187_v26 = vand.u32 4294901760, %v3186_v20  ;;  %vm2796_vm14 = vcmp.eq.s32.totalorder %v9969_v9, %v2666_v32 }
 0x43d   :  { %9981 = vst [vmem:[#allocation53_spill] sm:$0xff] %v8980_v19  ;;  %v9684_v58 = vand.u32 4294901760, %v8978_v12  ;;  %v8992_v23 = vsel %vm2796_vm14, 1.0, %v9974_v27  ;;  %v3197_v62 = vand.u32 4294901760, %v3196_v4  ;;  %v2681_v38 = vadd.s32 %v8706_v6, %v2678_v15 }
 0x43e   :  { %9982 = vst [vmem:[#allocation56_spill] sm:$0xff] %v8992_v23  ;;  %v2696_v59 = vadd.s32 %v8712_v55, %v2693_v57  ;;  %6097 = vmatmul.mubr.f32.gmra.mrb[14].mxu1 %v3187_v26  ;;  %v9689_v34 = vand.u32 4294901760, %v8980_v19  ;;  %v2707_v18 = vpop.xlane.xlu1 %2706  ;;  %v2928_v32 = vsel %vm2129_vm0, %v8941_v25, 0  ;;  %v2722_v20 = vpop.xlane.xlu0 %2721  ;;  %v2931_v22 = vsel %vm2129_vm0, %v8944_v46, 0 }
 0x43f   :  { %v3206_v52 = vsub.f32 %v8978_v12, %v9684_v58  ;;  %6099 = vmatprep.mubr.f32.mxu1 %v3197_v62  ;;  %vm2797_vm15 = vcmp.eq.s32.totalorder %v9969_v9, %v2681_v38  ;;  %v2708_v6 = vcvt.f32.s32 %v2707_v18  ;;  %v9006_v55 = vsub.f32 %v2928_v32, %v2928_v32 }
 0x440   :  { %vm2798_vm1 = vcmp.eq.s32.totalorder %v9969_v9, %v2696_v59  ;;  %v9009_v26 = vsel %vm2797_vm15, 1.0, %v9974_v27  ;;  %v3216_v57 = vsub.f32 %v8980_v19, %v9689_v34  ;;  %v2723_v58 = vcvt.f32.s32 %v2722_v20 }
 0x441   :  { %9983 = vst [vmem:[#allocation65_spill] sm:$0xff] %v9006_v55  ;;  %9984 = vst [vmem:[#allocation66_spill] sm:$0xff] %v9009_v26  ;;  %v3207_v4 = vand.u32 4294901760, %v3206_v52  ;;  %v9012_v15 = vsel %vm2798_vm1, 1.0, %v9974_v27  ;;  %v2711_v62 = vadd.s32 %v8716_v7, %v2708_v6  ;;  %v9694_v38 = vand.u32 4294901760, %v9006_v55 }
 0x442   :  { %9985 = vst [vmem:[#allocation18_spill] sm:$0xff] %v9012_v15  ;;  %v9019_v59 = vsub.f32 %v2931_v22, %v2931_v22  ;;  %v3217_v18 = vand.u32 4294901760, %v3216_v57  ;;  %v2737_v32 = vpop.xlane.xlu1 %2736  ;;  %v2934_v52 = vsel %vm2129_vm0, %v8965_v5, 0  ;;  %v2752_v12 = vpop.xlane.xlu0 %2751  ;;  %v2937_v50 = vsel %vm2129_vm0, %v8970_v36, 0 }
 0x443   :  { %6100 = vmatmul.mubr.f32.gmra.mrb[16].mxu1 %v3207_v4  ;;  %v2940_v34 = vsel %vm2129_vm0, %v8987_v10, 0  ;;  %vm2799_vm2 = vcmp.eq.s32.totalorder %v9969_v9, %v2711_v62  ;;  %v3226_v7 = vsub.f32 %v9006_v55, %v9694_v38  ;;  %v2726_v22 = vadd.s32 %v8718_v0, %v2723_v58 }
 0x444   :  { %v9700_v20 = vand.u32 4294901760, %v9019_v59  ;;  %6102 = vmatprep.mubr.f32.mxu1 %v3217_v18  ;;  %v9034_v6 = vsel %vm2799_vm2, 1.0, %v9974_v27  ;;  %v2738_v4 = vcvt.f32.s32 %v2737_v32  ;;  %v9036_v57 = vsub.f32 %v2934_v52, %v2934_v52 }
 0x445   :  { %9986 = vst [vmem:[#allocation19_spill] sm:$0xff] %v9034_v6  ;;  %v2753_v19 = vcvt.f32.s32 %v2752_v12  ;;  %v3227_v45 = vand.u32 4294901760, %v3226_v7  ;;  %vm2800_vm3 = vcmp.eq.s32.totalorder %v9969_v9, %v2726_v22  ;;  %v9042_v38 = vsub.f32 %v2937_v50, %v2937_v50 }
 0x446   :  { %9987 = vst [vmem:[#allocation26_spill] sm:$0xff] %v9036_v57  ;;  %v3236_v62 = vsub.f32 %v9019_v59, %v9700_v20  ;;  %v9045_v0 = vsel %vm2800_vm3, 1.0, %v9974_v27  ;;  %v2741_v58 = vadd.s32 %v8720_v48, %v2738_v4  ;;  %v9697_v18 = vand.u32 4294901760, %v9036_v57  ;;  %v2767_v52 = vpop.xlane.xlu1 %2766 }
 0x447   :  { %9988 = vst [vmem:[#allocation27_spill] sm:$0xff] %v9042_v38  ;;  %9989 = vst [vmem:[#allocation29_spill] sm:$0xff] %v9045_v0  ;;  %v2756_v32 = vadd.s32 %v8726_v42, %v2753_v19  ;;  %6103 = vmatmul.mubr.f32.gmra.mrb[18].mxu1 %v3227_v45  ;;  %v9699_v7 = vand.u32 4294901760, %v9042_v38  ;;  %v2768_v22 = vcvt.f32.s32 %v2767_v52  ;;  %v9051_v55 = vsub.f32 %v2940_v34, %v2940_v34 }
 0x448   :  { %v3237_v12 = vand.u32 4294901760, %v3236_v62  ;;  %vm2801_vm4 = vcmp.eq.s32.totalorder %v9969_v9, %v2741_v58  ;;  %v3246_v50 = vsub.f32 %v9036_v57, %v9697_v18  ;;  %v2943_v48 = vsel %vm2129_vm0, %v8992_v23, 0 }
 0x449   :  { %9990 = vst [vmem:[#allocation30_spill] sm:$0xff] %v9051_v55  ;;  %vm2802_vm5 = vcmp.eq.s32.totalorder %v9969_v9, %v2756_v32  ;;  %v9061_v42 = vsel %vm2801_vm4, 1.0, %v9974_v27  ;;  %v3256_v19 = vsub.f32 %v9042_v38, %v9699_v7  ;;  %v2771_v34 = vadd.s32 %v8790_v44, %v2768_v22 }
 0x44a   :  { %6105 = vmatprep.mubr.f32.mxu1 %v3237_v12  ;;  %9991 = vst [vmem:[#allocation36_spill] sm:$0xff] %v9061_v42  ;;  %v9064_v45 = vsel %vm2802_vm5, 1.0, %v9974_v27  ;;  %v3247_v4 = vand.u32 4294901760, %v3246_v50  ;;  %v9698_v58 = vand.u32 4294901760, %v9051_v55  ;;  %v9073_v32 = vsub.f32 %v2943_v48, %v2943_v48 }
 0x44b   :  { %9992 = vst [vmem:[#allocation37_spill] sm:$0xff] %v9064_v45  ;;  %v2961_v62 = vsel %vm2129_vm0, %v9064_v45, 0  ;;  %v3257_v52 = vand.u32 4294901760, %v3256_v19  ;;  %vm2803_vm6 = vcmp.eq.s32.totalorder %v9969_v9, %v2771_v34  ;;  %v2946_v12 = vsel %vm2129_vm0, %v9009_v26, 0 }
 0x44c   :  { %9993 = vst [vmem:[#allocation45_spill] sm:$0xff] %v9073_v32  ;;  %v2949_v18 = vsel %vm2129_vm0, %v9012_v15, 0  ;;  %6106 = vmatmul.mubr.f32.gmra.mrb[20].mxu1 %v3247_v4  ;;  %v9081_v44 = vsel %vm2803_vm6, 1.0, %v9974_v27  ;;  %v3266_v22 = vsub.f32 %v9051_v55, %v9698_v58  ;;  %v9705_v50 = vand.u32 4294901760, %v9073_v32 }
 0x44d   :  { %9994 = vst [vmem:[#allocation48_spill] sm:$0xff] %v9081_v44  ;;  %v9087_v48 = vsub.f32 %v2946_v12, %v2946_v12  ;;  %6108 = vmatprep.mubr.f32.mxu1 %v3257_v52  ;;  %v2964_v9 = vsel %vm2129_vm0, %v9081_v44, 0  ;;  %v9091_v19 = vsub.f32 %v2949_v18, %v2949_v18  ;;  %v2952_v34 = vsel %vm2129_vm0, %v9034_v6, 0 }
 0x44e   :  { %v2955_v27 = vsel %vm2129_vm0, %v9045_v0, 0  ;;  %v3267_v4 = vand.u32 4294901760, %v3266_v22  ;;  %v3276_v58 = vsub.f32 %v9073_v32, %v9705_v50  ;;  %v9101_v7 = vsub.f32 %v2952_v34, %v2952_v34 }
 0x44f   :  { %9995 = vst [vmem:[#allocation55_spill] sm:$0xff] %v9087_v48  ;;  %v9710_v12 = vand.u32 4294901760, %v9087_v48  ;;  %v9713_v52 = vand.u32 4294901760, %v9091_v19  ;;  %v9104_v20 = vsub.f32 %v2955_v27, %v2955_v27  ;;  %v2958_v18 = vsel %vm2129_vm0, %v9061_v42, 0 }
 0x450   :  { %v9108_v55 = vsub.f32 %v2961_v62, %v2961_v62  ;;  %6109 = vmatmul.mubr.f32.gmra.mrb[22].mxu1 %v3267_v4  ;;  %v3277_v38 = vand.u32 4294901760, %v3276_v58  ;;  %v9714_v50 = vand.u32 4294901760, %v9101_v7  ;;  %v9114_v32 = vsub.f32 %v2958_v18, %v2958_v18 }
 0x451   :  { %v3286_v22 = vsub.f32 %v9087_v48, %v9710_v12  ;;  %v3296_v34 = vsub.f32 %v9091_v19, %v9713_v52  ;;  %v9715_v27 = vand.u32 4294901760, %v9104_v20  ;;  %v9121_v62 = vsub.f32 %v2964_v9, %v2964_v9 }
 0x452   :  { %v9717_v57 = vand.u32 4294901760, %v9108_v55  ;;  %6111 = vmatprep.mubr.f32.mxu1 %v3277_v38  ;;  %v3306_v4 = vsub.f32 %v9101_v7, %v9714_v50  ;;  %v9718_v12 = vand.u32 4294901760, %v9114_v32 }
 0x453   :  { %v3287_v58 = vand.u32 4294901760, %v3286_v22  ;;  %v3297_v18 = vand.u32 4294901760, %v3296_v34  ;;  %v3316_v48 = vsub.f32 %v9104_v20, %v9715_v27  ;;  %v9716_v38 = vand.u32 4294901760, %v9121_v62 }
 0x454   :  { %v3307_v52 = vand.u32 4294901760, %v3306_v4  ;;  %v3326_v9 = vsub.f32 %v9114_v32, %v9718_v12  ;;  %v3336_v50 = vsub.f32 %v9108_v55, %v9717_v57  ;;  %v10011_v57 = vld [vmem:[#allocation27_spill] sm:$0xff]  ;;  %v10012_v12 = vld [vmem:[#allocation30_spill] sm:$0xff] }
 0x455   :  { %6112 = vmatmul.mubr.f32.gmra.mrb[24].mxu1 %v3287_v58  ;;  %v3317_v22 = vand.u32 4294901760, %v3316_v48  ;;  %v3346_v27 = vsub.f32 %v9121_v62, %v9716_v38  ;;  %v10010_v38 = vld [vmem:[#allocation26_spill] sm:$0xff] }
 0x456   :  { %6114 = vmatprep.mubr.f32.mxu1 %v3297_v18  ;;  %v3327_v34 = vand.u32 4294901760, %v3326_v9  ;;  %v3337_v58 = vand.u32 4294901760, %v3336_v50  ;;  %v9997_v50 = vand.u32 4294901760, %v8555_v33  ;;  %v10000_v33 = vld [vmem:[#allocation35_spill] sm:$0xff]  ;;  %v10002_v18 = vld [vmem:[#allocation40_spill] sm:$0xff]  ;;  %v10003_v9 = vld [vmem:[#allocation42_spill] sm:$0xff] }
 0x457   :  { %v3347_v4 = vand.u32 4294901760, %v3346_v27  ;;  %v10001_v27 = vld [vmem:[#allocation20_spill] sm:$0xff] }
 0x459   :  { %6115 = vmatmul.mubr.f32.gmra.mrb[26].mxu1 %v3307_v52  ;;  %v9998_v52 = vld [vmem:[#allocation16_spill] sm:$0xff] }
 0x45a   :  { %6117 = vmatprep.mubr.f32.mxu1 %v3317_v22  ;;  %v10004_v22 = vld [vmem:[#allocation43_spill] sm:$0xff] }
 0x45d   :  { %6118 = vmatmul.mubr.f32.gmra.mrb[28].mxu1 %v3327_v34  ;;  %v10005_v34 = vld [vmem:[#allocation46_spill] sm:$0xff] }
 0x45e   :  { %6120 = vmatprep.mubr.f32.mxu1 %v3337_v58  ;;  %v10006_v58 = vld [vmem:[#allocation51_spill] sm:$0xff] }
 0x461   :  { %6121 = vmatmul.mubr.f32.gmra.mrb[30].mxu1 %v3347_v4  ;;  %v10007_v4 = vld [vmem:[#allocation52_spill] sm:$0xff] }
 0x462   :  { %6127 = vmatprep.mubr.msk.f32.mxu1 %vm2129_vm0, %v8710_v40 }
 0x465   :  { %6128 = vmatmul.mubr.msk.f32.vlgmr.msra.gmra.mrb[0].mxu1 %vm2129_vm0, %v8729_v8 }
 0x466   :  { %6130 = vmatprep.mubr.msk.f32.mxu1 %vm2129_vm0, %v8732_v61  ;;  %6586 = vmatpush3.bf16.msra.mxu1 %v8772_v37  ;;  %v9996_v37 = vand.u32 4294901760, %v8553_v29  ;;  %v9999_v29 = vld [vmem:[#allocation34_spill] sm:$0xff] }
 0x467   :  { %6588 = vmatprep.subr.bf16.mxu1 %v8535_v47 }
 0x468   :  { %v6591_v48 = vpack.c.bf16 %v9997_v50, %v9996_v37  ;;  %v10008_v37 = vld [vmem:[#allocation53_spill] sm:$0xff] }
 0x469   :  { %6131 = vmatmul.mubr.msk.f32.gmra.mrb[2].mxu1 %vm2129_vm0, %v8752_v51  ;;  %v10009_v50 = vld [vmem:[#allocation65_spill] sm:$0xff] }
 0x46a   :  { %6133 = vmatprep.mubr.msk.f32.mxu1 %vm2129_vm0, %v8755_v1 }
 0x46d   :  { %6134 = vmatmul.mubr.msk.f32.gmra.mrb[4].mxu1 %vm2129_vm0, %v8777_v24 }
 0x46e   :  { %6136 = vmatprep.mubr.msk.f32.mxu1 %vm2129_vm0, %v8780_v31 }
 0x471   :  { %6137 = vmatmul.mubr.msk.f32.gmra.mrb[6].mxu1 %vm2129_vm0, %v8800_v28 }
 0x472   :  { %6139 = vmatprep.mubr.msk.f32.mxu1 %vm2129_vm0, %v8803_v56 }
 0x475   :  { %6140 = vmatmul.mubr.msk.f32.gmra.mrb[8].mxu1 %vm2129_vm0, %v8826_v3 }
 0x476   :  { %6142 = vmatprep.mubr.msk.f32.mxu1 %vm2129_vm0, %v8829_v11 }
 0x479   :  { %6143 = vmatmul.mubr.msk.f32.gmra.mrb[10].mxu1 %vm2129_vm0, %v8849_v16 }
 0x47a   :  { %6145 = vmatprep.mubr.msk.f32.mxu1 %vm2129_vm0, %v8852_v2 }
 0x47d   :  { %6146 = vmatmul.mubr.msk.f32.gmra.mrb[12].mxu1 %vm2129_vm0, %v8873_v43 }
 0x47e   :  { %6148 = vmatprep.mubr.msk.f32.mxu1 %vm2129_vm0, %v8876_v13 }
 0x481   :  { %6149 = vmatmul.mubr.msk.f32.gmra.mrb[14].mxu1 %vm2129_vm0, %v8894_v60 }
 0x482   :  { %6151 = vmatprep.mubr.msk.f32.mxu1 %vm2129_vm0, %v8902_v49 }
 0x485   :  { %6152 = vmatmul.mubr.msk.f32.gmra.mrb[16].mxu1 %vm2129_vm0, %v8916_v17 }
 0x486   :  { %6154 = vmatprep.mubr.msk.f32.mxu1 %vm2129_vm0, %v8919_v41 }
 0x489   :  { %6155 = vmatmul.mubr.msk.f32.gmra.mrb[18].mxu1 %vm2129_vm0, %v8941_v25 }
 0x48a   :  { %6157 = vmatprep.mubr.msk.f32.mxu1 %vm2129_vm0, %v8944_v46 }
 0x48d   :  { %6158 = vmatmul.mubr.msk.f32.gmra.mrb[20].mxu1 %vm2129_vm0, %v8965_v5 }
 0x48e   :  { %6160 = vmatprep.mubr.msk.f32.mxu1 %vm2129_vm0, %v8970_v36 }
 0x491   :  { %6161 = vmatmul.mubr.msk.f32.gmra.mrb[22].mxu1 %vm2129_vm0, %v8987_v10 }
 0x492   :  { %6163 = vmatprep.mubr.msk.f32.mxu1 %vm2129_vm0, %v8992_v23  ;;  %v10020_v23 = vand.u32 4294901760, %v8812_v63 }
 0x495   :  { %6164 = vmatmul.mubr.msk.f32.gmra.mrb[24].mxu1 %vm2129_vm0, %v9009_v26  ;;  %v10019_v26 = vand.u32 4294901760, %v8788_v21 }
 0x496   :  { %6166 = vmatprep.mubr.msk.f32.mxu1 %vm2129_vm0, %v9012_v15  ;;  %v10018_v15 = vand.u32 4294901760, %v8766_v30 }
 0x499   :  { %6167 = vmatmul.mubr.msk.f32.gmra.mrb[26].mxu1 %vm2129_vm0, %v9034_v6  ;;  %v10017_v6 = vand.u32 4294901760, %v8747_v54 }
 0x49a   :  { %6169 = vmatprep.mubr.msk.f32.mxu1 %vm2129_vm0, %v9045_v0  ;;  %v10016_v0 = vand.u32 4294901760, %v8745_v39 }
 0x49d   :  { %6170 = vmatmul.mubr.msk.f32.gmra.mrb[28].mxu1 %vm2129_vm0, %v9061_v42  ;;  %v10015_v42 = vand.u32 4294901760, %v8722_v35 }
 0x49e   :  { %6172 = vmatprep.mubr.msk.f32.mxu1 %vm2129_vm0, %v9064_v45  ;;  %v10014_v45 = vld [vmem:[#allocation55_spill] sm:$0xff] }
 0x4a1   :  { %6173 = vmatmul.mubr.msk.f32.gmra.mrb[30].mxu1 %vm2129_vm0, %v9081_v44  ;;  %v10013_v44 = vld [vmem:[#allocation45_spill] sm:$0xff] }
 0x4a2   :  { %6179 = vmatprep.mubr.f32.mxu1 %v8722_v35  ;;  %v10021_v35 = vand.u32 4294901760, %v8814_v53 }
 0x4a5   :  { %6180 = vmatmul.mubr.f32.vlgmr.msra.gmra.mrb[0].mxu1 %v8745_v39  ;;  %v10022_v39 = vand.u32 4294901760, %v9998_v52 }
 0x4a6   :  { %6182 = vmatprep.mubr.f32.mxu1 %v8747_v54  ;;  %6590 = vmatpush3.bf16.msra.mxu1 %v8535_v47  ;;  %v10023_v54 = vand.u32 4294901760, %v8840_v14 }
 0x4a7   :  { %6592 = vmatprep.subr.bf16.mxu1 %v6591_v48 }
 0x4a9   :  { %6183 = vmatmul.mubr.f32.gmra.mrb[2].mxu1 %v8766_v30  ;;  %v10025_v30 = vand.u32 4294901760, %v10000_v33 }
 0x4aa   :  { %6185 = vmatprep.mubr.f32.mxu1 %v8788_v21  ;;  %v10026_v21 = vand.u32 4294901760, %v10001_v27 }
 0x4ad   :  { %6186 = vmatmul.mubr.f32.gmra.mrb[4].mxu1 %v8812_v63  ;;  %v10027_v63 = vand.u32 4294901760, %v10002_v18 }
 0x4ae   :  { %6188 = vmatprep.mubr.f32.mxu1 %v8814_v53  ;;  %v10028_v53 = vand.u32 4294901760, %v10003_v9 }
 0x4b1   :  { %6189 = vmatmul.mubr.f32.gmra.mrb[6].mxu1 %v9998_v52  ;;  %v10036_v52 = vand.u32 4294901760, %v10010_v38 }
 0x4b2   :  { %6191 = vmatprep.mubr.f32.mxu1 %v8840_v14  ;;  %v10030_v14 = vand.u32 4294901760, %v10005_v34 }
 0x4b5   :  { %6192 = vmatmul.mubr.f32.gmra.mrb[8].mxu1 %v9999_v29 }
 0x4b6   :  { %6194 = vmatprep.mubr.f32.mxu1 %v10000_v33  ;;  %v10038_v33 = vand.u32 4294901760, %v10012_v12 }
 0x4b9   :  { %6195 = vmatmul.mubr.f32.gmra.mrb[10].mxu1 %v10001_v27  ;;  %v10039_v27 = vand.u32 4294901760, %v10013_v44 }
 0x4ba   :  { %6197 = vmatprep.mubr.f32.mxu1 %v10002_v18  ;;  %v10040_v18 = vand.u32 4294901760, %v10014_v45 }
 0x4bd   :  { %6198 = vmatmul.mubr.f32.gmra.mrb[12].mxu1 %v10003_v9  ;;  %v10041_v9 = vand.u32 4294901760, %v9091_v19 }
 0x4be   :  { %6200 = vmatprep.mubr.f32.mxu1 %v10004_v22 }
 0x4c1   :  { %6201 = vmatmul.mubr.f32.gmra.mrb[14].mxu1 %v10005_v34 }
 0x4c2   :  { %6203 = vmatprep.mubr.f32.mxu1 %v10006_v58 }
 0x4c5   :  { %6204 = vmatmul.mubr.f32.gmra.mrb[16].mxu1 %v10007_v4 }
 0x4c6   :  { %6206 = vmatprep.mubr.f32.mxu1 %v10008_v37 }
 0x4c9   :  { %6207 = vmatmul.mubr.f32.gmra.mrb[18].mxu1 %v10009_v50 }
 0x4ca   :  { %6209 = vmatprep.mubr.f32.mxu1 %v9019_v59 }
 0x4cd   :  { %6210 = vmatmul.mubr.f32.gmra.mrb[20].mxu1 %v10010_v38  ;;  %v10043_v38 = vand.u32 4294901760, %v9104_v20 }
 0x4ce   :  { %6212 = vmatprep.mubr.f32.mxu1 %v10011_v57 }
 0x4d1   :  { %6213 = vmatmul.mubr.f32.gmra.mrb[22].mxu1 %v10012_v12  ;;  %v10045_v12 = vand.u32 4294901760, %v9108_v55 }
 0x4d2   :  { %6215 = vmatprep.mubr.f32.mxu1 %v10013_v44  ;;  %v10046_v44 = vand.u32 4294901760, %v9121_v62 }
 0x4d5   :  { %6216 = vmatmul.mubr.f32.gmra.mrb[24].mxu1 %v10014_v45  ;;  %v10051_v45 = vld [vmem:[#allocation29_spill] sm:$0xff] }
 0x4d6   :  { %6218 = vmatprep.mubr.f32.mxu1 %v9091_v19  ;;  %v10053_v19 = vld [vmem:[#allocation37_spill] sm:$0xff] }
 0x4d9   :  { %6219 = vmatmul.mubr.f32.gmra.mrb[26].mxu1 %v9101_v7 }
 0x4da   :  { %6221 = vmatprep.mubr.f32.mxu1 %v9104_v20  ;;  %v10049_v20 = vld [vmem:[#allocation18_spill] sm:$0xff] }
 0x4dd   :  { %6222 = vmatmul.mubr.f32.gmra.mrb[28].mxu1 %v9114_v32 }
 0x4de   :  { %6224 = vmatprep.mubr.f32.mxu1 %v9108_v55  ;;  %v10048_v55 = vld [vmem:[#allocation66_spill] sm:$0xff] }
 0x4e1   :  { %6225 = vmatmul.mubr.f32.gmra.mrb[30].mxu1 %v9121_v62  ;;  %v10054_v62 = vld [vmem:[#allocation48_spill] sm:$0xff] }
 0x4e2   :  { %6231 = vmatprep.mubr.f32.mxu1 %v10015_v42  ;;  %v10034_v42 = vand.u32 4294901760, %v10009_v50 }
 0x4e5   :  { %6232 = vmatmul.mubr.f32.vlgmr.msra.gmra.mrb[0].mxu1 %v10016_v0  ;;  %v10033_v0 = vand.u32 4294901760, %v10008_v37 }
 0x4e6   :  { %6234 = vmatprep.mubr.f32.mxu1 %v10017_v6  ;;  %6594 = vmatpush3.bf16.msra.mxu1 %v6591_v48  ;;  %v10024_v6 = vand.u32 4294901760, %v9999_v29  ;;  %v10035_v48 = vand.u32 4294901760, %v9019_v59  ;;  %v10037_v29 = vand.u32 4294901760, %v10011_v57  ;;  %v10042_v59 = vand.u32 4294901760, %v9101_v7  ;;  %v10050_v7 = vld [vmem:[#allocation19_spill] sm:$0xff] }
 0x4e7   :  { %6596 = vmatprep.subr.bf16.mxu1 %v8535_v47  ;;  %v10044_v57 = vand.u32 4294901760, %v9114_v32  ;;  %v10052_v32 = vld [vmem:[#allocation36_spill] sm:$0xff] }
 0x4e9   :  { %6235 = vmatmul.mubr.f32.gmra.mrb[2].mxu1 %v10018_v15  ;;  %v10032_v15 = vand.u32 4294901760, %v10007_v4  ;;  %v6932_v4 = vld [vmem:[#allocation2 + $0x38] sm:$0xff] }
 0x4ea   :  { %6237 = vmatprep.mubr.f32.mxu1 %v10019_v26  ;;  %v10031_v26 = vand.u32 4294901760, %v10006_v58 }
 0x4ed   :  { %6238 = vmatmul.mubr.f32.gmra.mrb[4].mxu1 %v10020_v23  ;;  %v10029_v23 = vand.u32 4294901760, %v10004_v22 }
 0x4ee   :  { %6240 = vmatprep.mubr.f32.mxu1 %v10021_v35 }
 0x4f1   :  { %6241 = vmatmul.mubr.f32.gmra.mrb[6].mxu1 %v10022_v39 }
 0x4f2   :  { %6243 = vmatprep.mubr.f32.mxu1 %v10023_v54  ;;  %v6933_v54 = vld [vmem:[#allocation2 + $0x30] sm:$0xff] }
 0x4f5   :  { %6244 = vmatmul.mubr.f32.gmra.mrb[8].mxu1 %v10024_v6 }
 0x4f6   :  { %6246 = vmatprep.mubr.f32.mxu1 %v10025_v30 }
 0x4f9   :  { %6247 = vmatmul.mubr.f32.gmra.mrb[10].mxu1 %v10026_v21 }
 0x4fa   :  { %6249 = vmatprep.mubr.f32.mxu1 %v10027_v63 }
 0x4fd   :  { %6250 = vmatmul.mubr.f32.gmra.mrb[12].mxu1 %v10028_v53  ;;  %v6934_v53 = vld [vmem:[#allocation2 + $0x48] sm:$0xff] }
 0x4fe   :  { %6252 = vmatprep.mubr.f32.mxu1 %v10029_v23 }
 0x501   :  { %6253 = vmatmul.mubr.f32.gmra.mrb[14].mxu1 %v10030_v14 }
 0x502   :  { %6255 = vmatprep.mubr.f32.mxu1 %v10031_v26 }
 0x505   :  { %6256 = vmatmul.mubr.f32.gmra.mrb[16].mxu1 %v10032_v15 }
 0x506   :  { %6258 = vmatprep.mubr.f32.mxu1 %v10033_v0  ;;  %v6935_v0 = vld [vmem:[#allocation2 + $0x40] sm:$0xff] }
 0x509   :  { %6259 = vmatmul.mubr.f32.gmra.mrb[18].mxu1 %v10034_v42 }
 0x50a   :  { %6261 = vmatprep.mubr.f32.mxu1 %v10035_v48 }
 0x50d   :  { %6262 = vmatmul.mubr.f32.gmra.mrb[20].mxu1 %v10036_v52 }
 0x50e   :  { %6264 = vmatprep.mubr.f32.mxu1 %v10037_v29 }
 0x511   :  { %6265 = vmatmul.mubr.f32.gmra.mrb[22].mxu1 %v10038_v33  ;;  %v6936_v33 = vld [vmem:[#allocation2 + $0x58] sm:$0xff] }
 0x512   :  { %6267 = vmatprep.mubr.f32.mxu1 %v10039_v27 }
 0x515   :  { %6268 = vmatmul.mubr.f32.gmra.mrb[24].mxu1 %v10040_v18 }
 0x516   :  { %6270 = vmatprep.mubr.f32.mxu1 %v10041_v9 }
 0x519   :  { %6271 = vmatmul.mubr.f32.gmra.mrb[26].mxu1 %v10042_v59 }
 0x51a   :  { %6273 = vmatprep.mubr.f32.mxu1 %v10043_v38  ;;  %v6937_v38 = vld [vmem:[#allocation2 + $0x50] sm:$0xff] }
 0x51d   :  { %6274 = vmatmul.mubr.f32.gmra.mrb[28].mxu1 %v10044_v57 }
 0x51e   :  { %6276 = vmatprep.mubr.f32.mxu1 %v10045_v12 }
 0x521   :  { %6277 = vmatmul.mubr.f32.gmra.mrb[30].mxu1 %v10046_v44 }
 0x522   :  { %6283 = vmatprep.mubr.msk.f32.mxu1 %vm2129_vm0, %v8710_v40 }
 0x525   :  { %6284 = vmatmul.mubr.msk.f32.vlgmr.msra.gmra.mrb[0].mxu1 %vm2129_vm0, %v8729_v8 }
 0x526   :  { %6286 = vmatprep.mubr.msk.f32.mxu1 %vm2129_vm0, %v8732_v61  ;;  %6598 = vmatpush3.bf16.msra.mxu1 %v8535_v47  ;;  %v10047_v47 = vld [vmem:[#allocation56_spill] sm:$0xff] }
 0x529   :  { %6287 = vmatmul.mubr.msk.f32.gmra.mrb[2].mxu1 %vm2129_vm0, %v8752_v51 }
 0x52a   :  { %6289 = vmatprep.mubr.msk.f32.mxu1 %vm2129_vm0, %v8755_v1 }
 0x52d   :  { %6290 = vmatmul.mubr.msk.f32.gmra.mrb[4].mxu1 %vm2129_vm0, %v8777_v24 }
 0x52e   :  { %6292 = vmatprep.mubr.msk.f32.mxu1 %vm2129_vm0, %v8780_v31 }
 0x531   :  { %6293 = vmatmul.mubr.msk.f32.gmra.mrb[6].mxu1 %vm2129_vm0, %v8800_v28 }
 0x532   :  { %6295 = vmatprep.mubr.msk.f32.mxu1 %vm2129_vm0, %v8803_v56 }
 0x535   :  { %6296 = vmatmul.mubr.msk.f32.gmra.mrb[8].mxu1 %vm2129_vm0, %v8826_v3 }
 0x536   :  { %6298 = vmatprep.mubr.msk.f32.mxu1 %vm2129_vm0, %v8829_v11 }
 0x539   :  { %6299 = vmatmul.mubr.msk.f32.gmra.mrb[10].mxu1 %vm2129_vm0, %v8849_v16 }
 0x53a   :  { %6301 = vmatprep.mubr.msk.f32.mxu1 %vm2129_vm0, %v8852_v2 }
 0x53d   :  { %6302 = vmatmul.mubr.msk.f32.gmra.mrb[12].mxu1 %vm2129_vm0, %v8873_v43 }
 0x53e   :  { %6304 = vmatprep.mubr.msk.f32.mxu1 %vm2129_vm0, %v8876_v13 }
 0x541   :  { %6305 = vmatmul.mubr.msk.f32.gmra.mrb[14].mxu1 %vm2129_vm0, %v8894_v60 }
 0x542   :  { %6307 = vmatprep.mubr.msk.f32.mxu1 %vm2129_vm0, %v8902_v49 }
 0x545   :  { %6308 = vmatmul.mubr.msk.f32.gmra.mrb[16].mxu1 %vm2129_vm0, %v8916_v17 }
 0x546   :  { %6310 = vmatprep.mubr.msk.f32.mxu1 %vm2129_vm0, %v8919_v41 }
 0x549   :  { %6311 = vmatmul.mubr.msk.f32.gmra.mrb[18].mxu1 %vm2129_vm0, %v8941_v25 }
 0x54a   :  { %6313 = vmatprep.mubr.msk.f32.mxu1 %vm2129_vm0, %v8944_v46 }
 0x54d   :  { %6314 = vmatmul.mubr.msk.f32.gmra.mrb[20].mxu1 %vm2129_vm0, %v8965_v5 }
 0x54e   :  { %6316 = vmatprep.mubr.msk.f32.mxu1 %vm2129_vm0, %v8970_v36 }
 0x551   :  { %6317 = vmatmul.mubr.msk.f32.gmra.mrb[22].mxu1 %vm2129_vm0, %v8987_v10 }
 0x552   :  { %6319 = vmatprep.mubr.msk.f32.mxu1 %vm2129_vm0, %v10047_v47 }
 0x555   :  { %6320 = vmatmul.mubr.msk.f32.gmra.mrb[24].mxu1 %vm2129_vm0, %v10048_v55 }
 0x556   :  { %6322 = vmatprep.mubr.msk.f32.mxu1 %vm2129_vm0, %v10049_v20 }
 0x559   :  { %6323 = vmatmul.mubr.msk.f32.gmra.mrb[26].mxu1 %vm2129_vm0, %v10050_v7 }
 0x55a   :  { %6325 = vmatprep.mubr.msk.f32.mxu1 %vm2129_vm0, %v10051_v45 }
 0x55d   :  { %6326 = vmatmul.mubr.msk.f32.gmra.mrb[28].mxu1 %vm2129_vm0, %v10052_v32 }
 0x55e   :  { %6328 = vmatprep.mubr.msk.f32.mxu1 %vm2129_vm0, %v10053_v19 }
 0x561   :  { %6329 = vmatmul.mubr.msk.f32.gmra.mrb[30].mxu1 %vm2129_vm0, %v10054_v62 }
 0x562   :  { %6335 = vmatprep.mubr.msk.f32.mxu1 %vm2129_vm0, %v8710_v40 }
 0x565   :  { %6336 = vmatmul.mubr.msk.f32.vlgmr.msra.gmra.mrb[0].mxu1 %vm2129_vm0, %v8729_v8  ;;  %v6926_v8 = vld [vmem:[#allocation2 + $0x8] sm:$0xff] }
 0x566   :  { %6338 = vmatprep.mubr.msk.f32.mxu1 %vm2129_vm0, %v8732_v61 }
 0x569   :  { %6339 = vmatmul.mubr.msk.f32.gmra.mrb[2].mxu1 %vm2129_vm0, %v8752_v51 }
 0x56a   :  { %6341 = vmatprep.mubr.msk.f32.mxu1 %vm2129_vm0, %v8755_v1  ;;  %v6927_v1 = vld [vmem:[#allocation2] sm:$0xff] }
 0x56d   :  { %6342 = vmatmul.mubr.msk.f32.gmra.mrb[4].mxu1 %vm2129_vm0, %v8777_v24 }
 0x56e   :  { %6344 = vmatprep.mubr.msk.f32.mxu1 %vm2129_vm0, %v8780_v31 }
 0x571   :  { %6345 = vmatmul.mubr.msk.f32.gmra.mrb[6].mxu1 %vm2129_vm0, %v8800_v28 }
 0x572   :  { %6347 = vmatprep.mubr.msk.f32.mxu1 %vm2129_vm0, %v8803_v56 }
 0x575   :  { %6348 = vmatmul.mubr.msk.f32.gmra.mrb[8].mxu1 %vm2129_vm0, %v8826_v3  ;;  %v6928_v3 = vld [vmem:[#allocation2 + $0x18] sm:$0xff] }
 0x576   :  { %6350 = vmatprep.mubr.msk.f32.mxu1 %vm2129_vm0, %v8829_v11 }
 0x579   :  { %6351 = vmatmul.mubr.msk.f32.gmra.mrb[10].mxu1 %vm2129_vm0, %v8849_v16 }
 0x57a   :  { %6353 = vmatprep.mubr.msk.f32.mxu1 %vm2129_vm0, %v8852_v2 }
 0x57d   :  { %6354 = vmatmul.mubr.msk.f32.gmra.mrb[12].mxu1 %vm2129_vm0, %v8873_v43 }
 0x57e   :  { %6356 = vmatprep.mubr.msk.f32.mxu1 %vm2129_vm0, %v8876_v13 }
 0x581   :  { %6357 = vmatmul.mubr.msk.f32.gmra.mrb[14].mxu1 %vm2129_vm0, %v8894_v60  ;;  %v6929_v60 = vld [vmem:[#allocation2 + $0x10] sm:$0xff] }
 0x582   :  { %6359 = vmatprep.mubr.msk.f32.mxu1 %vm2129_vm0, %v8902_v49 }
 0x585   :  { %6360 = vmatmul.mubr.msk.f32.gmra.mrb[16].mxu1 %vm2129_vm0, %v8916_v17  ;;  %v6930_v17 = vld [vmem:[#allocation2 + $0x28] sm:$0xff] }
 0x586   :  { %6362 = vmatprep.mubr.msk.f32.mxu1 %vm2129_vm0, %v8919_v41 }
 0x589   :  { %6363 = vmatmul.mubr.msk.f32.gmra.mrb[18].mxu1 %vm2129_vm0, %v8941_v25 }
 0x58a   :  { %6365 = vmatprep.mubr.msk.f32.mxu1 %vm2129_vm0, %v8944_v46 }
 0x58d   :  { %6366 = vmatmul.mubr.msk.f32.gmra.mrb[20].mxu1 %vm2129_vm0, %v8965_v5 }
 0x58e   :  { %6368 = vmatprep.mubr.msk.f32.mxu1 %vm2129_vm0, %v8970_v36  ;;  %v6931_v36 = vld [vmem:[#allocation2 + $0x20] sm:$0xff] }
 0x591   :  { %6369 = vmatmul.mubr.msk.f32.gmra.mrb[22].mxu1 %vm2129_vm0, %v8987_v10 }
 0x592   :  { %6371 = vmatprep.mubr.msk.f32.mxu1 %vm2129_vm0, %v10047_v47 }
 0x595   :  { %6372 = vmatmul.mubr.msk.f32.gmra.mrb[24].mxu1 %vm2129_vm0, %v10048_v55  ;;  %v6938_v55 = vld [vmem:[#allocation2 + $0x68] sm:$0xff] }
 0x596   :  { %6374 = vmatprep.mubr.msk.f32.mxu1 %vm2129_vm0, %v10049_v20 }
 0x599   :  { %6375 = vmatmul.mubr.msk.f32.gmra.mrb[26].mxu1 %vm2129_vm0, %v10050_v7 }
 0x59a   :  { %6377 = vmatprep.mubr.msk.f32.mxu1 %vm2129_vm0, %v10051_v45 }
 0x59d   :  { %6378 = vmatmul.mubr.msk.f32.gmra.mrb[28].mxu1 %vm2129_vm0, %v10052_v32 }
 0x59e   :  { %6380 = vmatprep.mubr.msk.f32.mxu1 %vm2129_vm0, %v10053_v19  ;;  %v6939_v19 = vld [vmem:[#allocation2 + $0x60] sm:$0xff] }
 0x5a1   :  { %6381 = vmatmul.mubr.msk.f32.gmra.mrb[30].mxu1 %vm2129_vm0, %v10054_v62 }
 0x638   :  { %v6337_v40 = vpop.f32.mrb[0].mxu1 }
 0x639   :  { %v4759_v61 = vsub.f32 %v6926_v8, %v6337_v40  ;;  %4791 = vst [vmem:[#allocation5 + $0x8] sm:$0xff] %v6337_v40  ;;  %v4568_v51 = vpop.f32.mrb[1].mxu1 }
 0x63a   :  { %v4758_v24 = vsub.f32 %v6927_v1, %v4568_v51  ;;  %4790 = vst [vmem:[#allocation5] sm:$0xff] %v4568_v51  ;;  %v6940_v51 = vld [vmem:[#allocation2 + $0x78] sm:$0xff] }
 0x63b   :  { %4823 = vst [vmem:[#allocation6 + $0x8] sm:$0xff] %v4759_v61  ;;  %v4855_v31 = vmul.f32 %v4759_v61, %v4759_v61 }
 0x63c   :  { %4822 = vst [vmem:[#allocation6] sm:$0xff] %v4758_v24  ;;  %v4854_v28 = vmul.f32 %v4758_v24, %v4758_v24  ;;  %v6340_v56 = vpop.f32.mrb[2].mxu1 }
 0x63d   :  { %v4761_v11 = vsub.f32 %v6928_v3, %v6340_v56  ;;  %4793 = vst [vmem:[#allocation5 + $0x18] sm:$0xff] %v6340_v56  ;;  %v4580_v16 = vpop.f32.mrb[3].mxu1  ;;  %v6941_v56 = vld [vmem:[#allocation2 + $0x70] sm:$0xff] }
 0x63e   :  { %v4886_v2 = vadd.f32 %v4855_v31, %v4854_v28  ;;  %v4760_v43 = vsub.f32 %v6929_v60, %v4580_v16  ;;  %4792 = vst [vmem:[#allocation5 + $0x10] sm:$0xff] %v4580_v16  ;;  %v6942_v60 = vld [vmem:[#allocation2 + $0x88] sm:$0xff] }
 0x63f   :  { %4825 = vst [vmem:[#allocation6 + $0x18] sm:$0xff] %v4761_v11  ;;  %v4857_v46 = vmul.f32 %v4761_v11, %v4761_v11 }
 0x640   :  { %4824 = vst [vmem:[#allocation6 + $0x10] sm:$0xff] %v4760_v43  ;;  %v4856_v13 = vmul.f32 %v4760_v43, %v4760_v43  ;;  %v6343_v49 = vpop.f32.mrb[4].mxu1 }
 0x641   :  { %v4763_v41 = vsub.f32 %v6930_v17, %v6343_v49  ;;  %4795 = vst [vmem:[#allocation5 + $0x28] sm:$0xff] %v6343_v49  ;;  %v4592_v25 = vpop.f32.mrb[5].mxu1 }
 0x642   :  { %v4887_v5 = vadd.f32 %v4886_v2, %v4856_v13  ;;  %v4762_v10 = vsub.f32 %v6931_v36, %v4592_v25  ;;  %4794 = vst [vmem:[#allocation5 + $0x20] sm:$0xff] %v4592_v25 }
 0x643   :  { %4827 = vst [vmem:[#allocation6 + $0x28] sm:$0xff] %v4763_v41  ;;  %v4859_v35 = vmul.f32 %v4763_v41, %v4763_v41  ;;  %v6943_v41 = vld [vmem:[#allocation2 + $0x80] sm:$0xff] }
 0x644   :  { %4826 = vst [vmem:[#allocation6 + $0x20] sm:$0xff] %v4762_v10  ;;  %v4858_v22 = vmul.f32 %v4762_v10, %v4762_v10  ;;  %v4888_v34 = vadd.f32 %v4887_v5, %v4857_v46  ;;  %v6346_v58 = vpop.f32.mrb[6].mxu1  ;;  %v6944_v10 = vld [vmem:[#allocation2 + $0x98] sm:$0xff] }
 0x645   :  { %v4765_v37 = vsub.f32 %v6932_v4, %v6346_v58  ;;  %4797 = vst [vmem:[#allocation5 + $0x38] sm:$0xff] %v6346_v58  ;;  %v4604_v50 = vpop.f32.mrb[7].mxu1 }
 0x646   :  { %v4889_v39 = vadd.f32 %v4888_v34, %v4858_v22  ;;  %v4764_v6 = vsub.f32 %v6933_v54, %v4604_v50  ;;  %4796 = vst [vmem:[#allocation5 + $0x30] sm:$0xff] %v4604_v50 }
 0x647   :  { %4829 = vst [vmem:[#allocation6 + $0x38] sm:$0xff] %v4765_v37  ;;  %v4861_v26 = vmul.f32 %v4765_v37, %v4765_v37  ;;  %v6945_v37 = vld [vmem:[#allocation2 + $0x90] sm:$0xff] }
 0x648   :  { %4828 = vst [vmem:[#allocation6 + $0x30] sm:$0xff] %v4764_v6  ;;  %v4860_v30 = vmul.f32 %v4764_v6, %v4764_v6  ;;  %v4890_v21 = vadd.f32 %v4889_v39, %v4859_v35  ;;  %v6349_v63 = vpop.f32.mrb[8].mxu1  ;;  %v6946_v6 = vld [vmem:[#allocation2 + $0xa8] sm:$0xff] }
 0x649   :  { %v4767_v23 = vsub.f32 %v6934_v53, %v6349_v63  ;;  %4799 = vst [vmem:[#allocation5 + $0x48] sm:$0xff] %v6349_v63  ;;  %v4616_v14 = vpop.f32.mrb[9].mxu1 }
 0x64a   :  { %v4891_v15 = vadd.f32 %v4890_v21, %v4860_v30  ;;  %v4766_v42 = vsub.f32 %v6935_v0, %v4616_v14  ;;  %4798 = vst [vmem:[#allocation5 + $0x40] sm:$0xff] %v4616_v14 }
 0x64b   :  { %4831 = vst [vmem:[#allocation6 + $0x48] sm:$0xff] %v4767_v23  ;;  %v4863_v9 = vmul.f32 %v4767_v23, %v4767_v23  ;;  %v6947_v23 = vld [vmem:[#allocation2 + $0xa0] sm:$0xff] }
 0x64c   :  { %4830 = vst [vmem:[#allocation6 + $0x40] sm:$0xff] %v4766_v42  ;;  %v4862_v48 = vmul.f32 %v4766_v42, %v4766_v42  ;;  %v4892_v52 = vadd.f32 %v4891_v15, %v4861_v26  ;;  %v6352_v29 = vpop.f32.mrb[10].mxu1  ;;  %v6948_v42 = vld [vmem:[#allocation2 + $0xb8] sm:$0xff] }
 0x64d   :  { %v4769_v27 = vsub.f32 %v6936_v33, %v6352_v29  ;;  %4801 = vst [vmem:[#allocation5 + $0x58] sm:$0xff] %v6352_v29  ;;  %v4628_v18 = vpop.f32.mrb[11].mxu1 }
 0x64e   :  { %v4893_v59 = vadd.f32 %v4892_v52, %v4862_v48  ;;  %v4768_v57 = vsub.f32 %v6937_v38, %v4628_v18  ;;  %4800 = vst [vmem:[#allocation5 + $0x50] sm:$0xff] %v4628_v18 }
 0x64f   :  { %4833 = vst [vmem:[#allocation6 + $0x58] sm:$0xff] %v4769_v27  ;;  %v4865_v45 = vmul.f32 %v4769_v27, %v4769_v27  ;;  %v6949_v27 = vld [vmem:[#allocation2 + $0xb0] sm:$0xff] }
 0x650   :  { %4832 = vst [vmem:[#allocation6 + $0x50] sm:$0xff] %v4768_v57  ;;  %v4864_v12 = vmul.f32 %v4768_v57, %v4768_v57  ;;  %v4894_v44 = vadd.f32 %v4893_v59, %v4863_v9  ;;  %v6355_v47 = vpop.f32.mrb[12].mxu1  ;;  %v6950_v57 = vld [vmem:[#allocation2 + $0xc8] sm:$0xff] }
 0x651   :  { %v4771_v20 = vsub.f32 %v6938_v55, %v6355_v47  ;;  %4803 = vst [vmem:[#allocation5 + $0x68] sm:$0xff] %v6355_v47  ;;  %v4640_v7 = vpop.f32.mrb[13].mxu1 }
 0x652   :  { %v4895_v32 = vadd.f32 %v4894_v44, %v4864_v12  ;;  %v4770_v62 = vsub.f32 %v6939_v19, %v4640_v7  ;;  %4802 = vst [vmem:[#allocation5 + $0x60] sm:$0xff] %v4640_v7 }
 0x653   :  { %4835 = vst [vmem:[#allocation6 + $0x68] sm:$0xff] %v4771_v20  ;;  %v4867_v31 = vmul.f32 %v4771_v20, %v4771_v20  ;;  %v6951_v20 = vld [vmem:[#allocation2 + $0xc0] sm:$0xff] }
 0x654   :  { %4834 = vst [vmem:[#allocation6 + $0x60] sm:$0xff] %v4770_v62  ;;  %v4866_v40 = vmul.f32 %v4770_v62, %v4770_v62  ;;  %v4896_v8 = vadd.f32 %v4895_v32, %v4865_v45  ;;  %v6358_v61 = vpop.f32.mrb[14].mxu1  ;;  %v6952_v62 = vld [vmem:[#allocation2 + $0xd8] sm:$0xff] }
 0x655   :  { %v4773_v1 = vsub.f32 %v6940_v51, %v6358_v61  ;;  %4805 = vst [vmem:[#allocation5 + $0x78] sm:$0xff] %v6358_v61  ;;  %v4652_v24 = vpop.f32.mrb[15].mxu1 }
 0x656   :  { %v4897_v28 = vadd.f32 %v4896_v8, %v4866_v40  ;;  %v4772_v3 = vsub.f32 %v6941_v56, %v4652_v24  ;;  %4804 = vst [vmem:[#allocation5 + $0x70] sm:$0xff] %v4652_v24 }
 0x657   :  { %4837 = vst [vmem:[#allocation6 + $0x78] sm:$0xff] %v4773_v1  ;;  %v4869_v49 = vmul.f32 %v4773_v1, %v4773_v1  ;;  %v6953_v1 = vld [vmem:[#allocation2 + $0xd0] sm:$0xff] }
 0x658   :  { %4836 = vst [vmem:[#allocation6 + $0x70] sm:$0xff] %v4772_v3  ;;  %v4868_v11 = vmul.f32 %v4772_v3, %v4772_v3  ;;  %v4898_v16 = vadd.f32 %v4897_v28, %v4867_v31  ;;  %v6361_v2 = vpop.f32.mrb[16].mxu1  ;;  %v6954_v3 = vld [vmem:[#allocation2 + $0xe8] sm:$0xff] }
 0x659   :  { %v4775_v43 = vsub.f32 %v6942_v60, %v6361_v2  ;;  %4807 = vst [vmem:[#allocation5 + $0x88] sm:$0xff] %v6361_v2  ;;  %v4664_v13 = vpop.f32.mrb[17].mxu1 }
 0x65a   :  { %v4899_v17 = vadd.f32 %v4898_v16, %v4868_v11  ;;  %v4774_v25 = vsub.f32 %v6943_v41, %v4664_v13  ;;  %4806 = vst [vmem:[#allocation5 + $0x80] sm:$0xff] %v4664_v13 }
 0x65b   :  { %4839 = vst [vmem:[#allocation6 + $0x88] sm:$0xff] %v4775_v43  ;;  %v4871_v58 = vmul.f32 %v4775_v43, %v4775_v43  ;;  %v6955_v43 = vld [vmem:[#allocation2 + $0xe0] sm:$0xff] }
 0x65c   :  { %4838 = vst [vmem:[#allocation6 + $0x80] sm:$0xff] %v4774_v25  ;;  %v4870_v46 = vmul.f32 %v4774_v25, %v4774_v25  ;;  %v4900_v5 = vadd.f32 %v4899_v17, %v4869_v49  ;;  %v6364_v36 = vpop.f32.mrb[18].mxu1  ;;  %v6956_v25 = vld [vmem:[#allocation2 + $0xf8] sm:$0xff] }
 0x65d   :  { %v4777_v22 = vsub.f32 %v6944_v10, %v6364_v36  ;;  %4809 = vst [vmem:[#allocation5 + $0x98] sm:$0xff] %v6364_v36  ;;  %v4676_v34 = vpop.f32.mrb[19].mxu1 }
 0x65e   :  { %v4901_v4 = vadd.f32 %v4900_v5, %v4870_v46  ;;  %v4776_v50 = vsub.f32 %v6945_v37, %v4676_v34  ;;  %4808 = vst [vmem:[#allocation5 + $0x90] sm:$0xff] %v4676_v34 }
 0x65f   :  { %4841 = vst [vmem:[#allocation6 + $0x98] sm:$0xff] %v4777_v22  ;;  %v4873_v63 = vmul.f32 %v4777_v22, %v4777_v22  ;;  %v6957_v22 = vld [vmem:[#allocation2 + $0xf0] sm:$0xff] }
 0x660   :  { %4840 = vst [vmem:[#allocation6 + $0x90] sm:$0xff] %v4776_v50  ;;  %v4872_v35 = vmul.f32 %v4776_v50, %v4776_v50  ;;  %v4902_v39 = vadd.f32 %v4901_v4, %v4871_v58  ;;  %v6367_v54 = vpop.f32.mrb[20].mxu1 }
 0x661   :  { %v4779_v30 = vsub.f32 %v6946_v6, %v6367_v54  ;;  %4811 = vst [vmem:[#allocation5 + $0xa8] sm:$0xff] %v6367_v54  ;;  %v4688_v21 = vpop.f32.mrb[21].mxu1 }
 0x662   :  { %v4903_v53 = vadd.f32 %v4902_v39, %v4872_v35  ;;  %v4778_v14 = vsub.f32 %v6947_v23, %v4688_v21  ;;  %4810 = vst [vmem:[#allocation5 + $0xa0] sm:$0xff] %v4688_v21 }
 0x663   :  { %4843 = vst [vmem:[#allocation6 + $0xa8] sm:$0xff] %v4779_v30  ;;  %v4875_v29 = vmul.f32 %v4779_v30, %v4779_v30 }
 0x664   :  { %4842 = vst [vmem:[#allocation6 + $0xa0] sm:$0xff] %v4778_v14  ;;  %v4874_v26 = vmul.f32 %v4778_v14, %v4778_v14  ;;  %v4904_v15 = vadd.f32 %v4903_v53, %v4873_v63  ;;  %v6370_v0 = vpop.f32.mrb[22].mxu1 }
 0x665   :  { %v4781_v48 = vsub.f32 %v6948_v42, %v6370_v0  ;;  %4813 = vst [vmem:[#allocation5 + $0xb8] sm:$0xff] %v6370_v0  ;;  %v4700_v52 = vpop.f32.mrb[23].mxu1 }
 0x666   :  { %v4905_v33 = vadd.f32 %v4904_v15, %v4874_v26  ;;  %v4780_v18 = vsub.f32 %v6949_v27, %v4700_v52  ;;  %4812 = vst [vmem:[#allocation5 + $0xb0] sm:$0xff] %v4700_v52 }
 0x667   :  { %4845 = vst [vmem:[#allocation6 + $0xb8] sm:$0xff] %v4781_v48  ;;  %v4877_v47 = vmul.f32 %v4781_v48, %v4781_v48 }
 0x668   :  { %4844 = vst [vmem:[#allocation6 + $0xb0] sm:$0xff] %v4780_v18  ;;  %v4876_v9 = vmul.f32 %v4780_v18, %v4780_v18  ;;  %v4906_v59 = vadd.f32 %v4905_v33, %v4875_v29  ;;  %v6373_v38 = vpop.f32.mrb[24].mxu1 }
 0x669   :  { %v4783_v12 = vsub.f32 %v6950_v57, %v6373_v38  ;;  %4815 = vst [vmem:[#allocation5 + $0xc8] sm:$0xff] %v6373_v38  ;;  %v4712_v44 = vpop.f32.mrb[25].mxu1 }
 0x66a   :  { %v4907_v55 = vadd.f32 %v4906_v59, %v4876_v9  ;;  %v4782_v7 = vsub.f32 %v6951_v20, %v4712_v44  ;;  %4814 = vst [vmem:[#allocation5 + $0xc0] sm:$0xff] %v4712_v44 }
 0x66b   :  { %4847 = vst [vmem:[#allocation6 + $0xc8] sm:$0xff] %v4783_v12  ;;  %v4879_v61 = vmul.f32 %v4783_v12, %v4783_v12 }
 0x66c   :  { %4846 = vst [vmem:[#allocation6 + $0xc0] sm:$0xff] %v4782_v7  ;;  %v4878_v45 = vmul.f32 %v4782_v7, %v4782_v7  ;;  %v4908_v32 = vadd.f32 %v4907_v55, %v4877_v47  ;;  %v6376_v19 = vpop.f32.mrb[26].mxu1 }
 0x66d   :  { %v4785_v40 = vsub.f32 %v6952_v62, %v6376_v19  ;;  %4817 = vst [vmem:[#allocation5 + $0xd8] sm:$0xff] %v6376_v19  ;;  %v4724_v8 = vpop.f32.mrb[27].mxu1 }
 0x66e   :  { %v4909_v51 = vadd.f32 %v4908_v32, %v4878_v45  ;;  %v4784_v24 = vsub.f32 %v6953_v1, %v4724_v8  ;;  %4816 = vst [vmem:[#allocation5 + $0xd0] sm:$0xff] %v4724_v8 }
 0x66f   :  { %4849 = vst [vmem:[#allocation6 + $0xd8] sm:$0xff] %v4785_v40  ;;  %v4881_v2 = vmul.f32 %v4785_v40, %v4785_v40 }
 0x670   :  { %4848 = vst [vmem:[#allocation6 + $0xd0] sm:$0xff] %v4784_v24  ;;  %v4880_v31 = vmul.f32 %v4784_v24, %v4784_v24  ;;  %v4910_v28 = vadd.f32 %v4909_v51, %v4879_v61  ;;  %v6379_v56 = vpop.f32.mrb[28].mxu1 }
 0x671   :  { %v4787_v11 = vsub.f32 %v6954_v3, %v6379_v56  ;;  %4819 = vst [vmem:[#allocation5 + $0xe8] sm:$0xff] %v6379_v56  ;;  %v4736_v16 = vpop.f32.mrb[29].mxu1 }
 0x672   :  { %v4911_v60 = vadd.f32 %v4910_v28, %v4880_v31  ;;  %v4786_v13 = vsub.f32 %v6955_v43, %v4736_v16  ;;  %4818 = vst [vmem:[#allocation5 + $0xe0] sm:$0xff] %v4736_v16 }
 0x673   :  { %4851 = vst [vmem:[#allocation6 + $0xe8] sm:$0xff] %v4787_v11  ;;  %v4883_v36 = vmul.f32 %v4787_v11, %v4787_v11 }
 0x674   :  { %4850 = vst [vmem:[#allocation6 + $0xe0] sm:$0xff] %v4786_v13  ;;  %v4882_v49 = vmul.f32 %v4786_v13, %v4786_v13  ;;  %v4912_v17 = vadd.f32 %v4911_v60, %v4881_v2  ;;  %v6382_v41 = vpop.f32.mrb[30].mxu1 }
 0x675   :  { %v4789_v46 = vsub.f32 %v6956_v25, %v6382_v41  ;;  %4821 = vst [vmem:[#allocation5 + $0xf8] sm:$0xff] %v6382_v41  ;;  %v4748_v5 = vpop.f32.mrb[31].mxu1 }
 0x676   :  { %v4913_v10 = vadd.f32 %v4912_v17, %v4882_v49  ;;  %v4788_v34 = vsub.f32 %v6957_v22, %v4748_v5  ;;  %4820 = vst [vmem:[#allocation5 + $0xf0] sm:$0xff] %v4748_v5 }
 0x677   :  { %4853 = vst [vmem:[#allocation6 + $0xf8] sm:$0xff] %v4789_v46 }
 0x678   :  { %6991 = shalt.err (!%p6988_p12)
}
 0x679   :  { %s6992_s29 = scalar_lea.hbm %s9490_s4, 4096 }
 0x67a   :  { %p6993_p13 = scmp.ne.s32.totalorder %s9490_s4, %s6992_s29  ;;  %p6996_p0 = scmp.lt.u32.totalorder %s6992_s29, %s9490_s4 }
 0x67c   :  { %p6998_p1 = pnand %p6996_p0, %p6993_p13 }
 0x67e   :  { %7001 = shalt.err (!%p6998_p1)
}
 0x67f   :  { %4935 = dma.vmem_to_hbm [thread:$0]  %s4930_s23, 4096, %s9490_s4, [#allocation4], %s7053_s7, %s7053_s7, %s7054_s8   ;;  %4852 = vst [vmem:[#allocation6 + $0xf0] sm:$0xff] %v4788_v34  ;;  %v4884_v58 = vmul.f32 %v4788_v34, %v4788_v34  ;;  %v4914_v4 = vadd.f32 %v4913_v10, %v4883_v36 }
 0x680   :  { %s7002_s14 = scalar_lea.vmem %s9437_s25, 4096  ;;  %p7007_p3 = scmp.lt.s32.totalorder %s9437_s25, %s9437_s25 }
 0x681   :  { %p7003_p2 = scmp.ne.s32.totalorder %s9437_s25, %s7002_s14  ;;  %p7008_p4 = scmp.lt.s32.totalorder %s7002_s14, %s7002_s14 }
 0x683   :  { %p7009_p5 = por %p7008_p4, %p7007_p3 }
 0x685   :  { %p7010_p6 = pnand %p7009_p5, %p7003_p2 }
 0x687   :  { %7013 = shalt.err (!%p7010_p6)
}
 0x688   :  { %s7014_s17 = scalar_lea.hbm %s9491_s5, 4096 }
 0x689   :  { %p7015_p7 = scmp.ne.s32.totalorder %s9491_s5, %s7014_s17  ;;  %p7018_p8 = scmp.lt.u32.totalorder %s7014_s17, %s9491_s5 }
 0x68b   :  { %p7020_p9 = pnand %p7018_p8, %p7015_p7 }
 0x68d   :  { %7023 = shalt.err (!%p7020_p9)
}
 0x68e   :  { %4947 = dma.vmem_to_hbm [thread:$0]  %s9437_s25, 4096, %s9491_s5, [#allocation7], %s7053_s7, %s7053_s7, %s7054_s8   ;;  %v4885_v37 = vmul.f32 %v4789_v46, %v4789_v46  ;;  %v4915_v50 = vadd.f32 %v4914_v4, %v4884_v58 }
 0x68f   :  { %s7058_s20 = smov [#allocation8]  }
 0x690   :  { %v4916_v35 = vadd.f32 %v4915_v50, %v4885_v37  ;;  %s4954_s21 = sshll.u32 %s7058_s20, 4  ;;  %s4955_s21 = int_to_ptr.vmem [resolvable:$true] %s4954_s21 }
 0x691   :  { %s7024_s22 = scalar_lea.vmem %s4955_s21, 16  ;;  %s7028_s2 = scalar_lea.vmem %s4955_s21, 32 }
 0x692   :  { %v4917_v39 = vrot.slane %v4916_v35, 4  ;;  %p7025_p10 = scmp.ne.s32.totalorder %s4955_s21, %s7024_s22  ;;  %p7029_p11 = scmp.lt.s32.totalorder %s4955_s21, %s4955_s21 }
 0x693   :  { %p7030_p12 = scmp.lt.s32.totalorder %s7028_s2, %s7024_s22 }
 0x694   :  { %v4918_v54 = vadd.f32 %v4917_v39, %v4916_v35 }
 0x695   :  { %p7031_p13 = por %p7030_p12, %p7029_p11 }
 0x696   :  { %v4919_v6 = vrot.slane %v4918_v54, 2 }
 0x697   :  { %p7032_p0 = pnand %p7031_p13, %p7025_p10 }
 0x698   :  { %v4920_v30 = vadd.f32 %v4919_v6, %v4918_v54 }
 0x69a   :  { %v4921_v21 = vrot.slane %v4920_v30, 1 }
 0x69c   :  { %v4922_v63 = vadd.f32 %v4921_v21, %v4920_v30 }
 0x69e   :  { %4923 = vst [vmem:[#allocation8] sm:$0x1] %v4922_v63 }
 0x69f   :  { %7035 = shalt.err (!%p7032_p0)
}
 0x6a0   :  { %s7036_s8 = scalar_lea.hbm %s9492_s6, 16 }
 0x6a1   :  { %p7037_p1 = scmp.ne.s32.totalorder %s9492_s6, %s7036_s8  ;;  %p7040_p2 = scmp.lt.u32.totalorder %s7036_s8, %s9492_s6 }
 0x6a3   :  { %p7042_p3 = pnand %p7040_p2, %p7037_p1 }
 0x6a5   :  { %7045 = shalt.err (!%p7042_p3)
}
 0x6a6   :  { %4957 = dma.vmem_to_hbm [thread:$0]  %s4955_s21, 16, %s9492_s6, [#allocation7]  }
 0x6a7   :  { %7048 = dma.done.wait [#allocation4], 4096  }
 0x6a8   :  { %7049 = vsyncadd [#allocation4], 4294963200 }
 0x6a9   :  { %7050 = dma.done.wait [#allocation7], 4112  }
 0x6aa   :  { %7051 = vsyncadd [#allocation7], 4294963184 }
 0x6ab   :  { %4967 = vsyncpa [#allocation3], 1 }
 0x6ac   :  { %4968 = vsyncpa [#allocation4], 1 }
 0x6ad   :  { %4969 = vsyncpa [#allocation7], 1 }

</bundles_post_ra>
